<compile_context>
chip_gen: v7x
topology: tpu7x:2x2x1
jax: 0.10.0
libtpu: 0.0.40
codegen_flags: <defaults>
</compile_context>

<pallas_src>
import functools

import jax
import jax.numpy as jnp
from jax.experimental import pallas as pl
from jax.experimental.pallas import tpu as pltpu

BN_EPS = 1e-5
VMEM_LIMIT_BYTES = 32 * 1024 * 1024  # safe on v5e/v6e/v7x; tiles here are tiny
PAD_C = 128                          # lane-dense channel padding carried between layers


# ------------------------------- helpers ----------------------------------- #

def _round_up(x, m):
    return ((x + m - 1) // m) * m


def _pad_k(k):
    """Pad K so a tile size (whole-K or 512) divides it exactly."""
    kp = _round_up(k, 128)
    if kp > 2048:
        kp = _round_up(kp, 512)
    return kp


# ----------------------------- Pallas kernel -------------------------------- #

def fused_matmul_kernel(x_ref, w_ref, b_ref, *rest, relu, has_res, single_k):
    """o = relu?( x @ w + b (+ res) ).

    x:(tm,tk) bf16, w:(tk,tn) bf16 (BN scale pre-folded), b:(1,tn) f32,
    optional res:(tm,tn) bf16, out:(tm,tn) bf16/f32.
    single_k: one K step -> no accumulator scratch, direct store.
    multi-K:  resident f32 accumulator scratch; K is last grid axis ('arbitrary').
    """
    if has_res:
        r_ref, rest = rest[0], rest[1:]
    else:
        r_ref = None

    def epilogue(y):
        y = y + b_ref[...]                       # bias in f32
        if has_res:
            y = y + r_ref[...].astype(jnp.float32)   # residual add in f32
        if relu:
            y = jnp.maximum(y, 0.0)
        return y

    if single_k:
        (o_ref,) = rest
        y = jnp.dot(x_ref[...], w_ref[...], preferred_element_type=jnp.float32)
        o_ref[...] = epilogue(y).astype(o_ref.dtype)
    else:
        o_ref, acc_ref = rest
        k = pl.program_id(2)

        @pl.when(k == 0)
        def _():
            acc_ref[...] = jnp.zeros_like(acc_ref)

        acc_ref[...] += jnp.dot(x_ref[...], w_ref[...],
                                preferred_element_type=jnp.float32)

        @pl.when(k == pl.num_programs(2) - 1)
        def _():
            o_ref[...] = epilogue(acc_ref[...]).astype(o_ref.dtype)


# --------------------------- pallas_call wrapper ----------------------------- #

def fused_matmul(x2d, packed, *, relu, residual=None, out_dtype=jnp.bfloat16):
    """x2d:(M,Kraw) float; packed: dict(w=(Kp,Np) bf16, b=(1,Np) f32).

    Returns (M, Np) out_dtype = relu?( x @ w + b (+ residual) ).
    Output stays lane-dense (Np multiple of 128) — no column slicing here.
    """
    w, b = packed["w"], packed["b"]
    M, k_raw = x2d.shape
    kp, np_ = w.shape

    # Tile selection: lane-dense N=128 tiles; whole-K when it fits (single K step);
    # tm=128 for large M (>=2 parallel tiles feeds both v7x TensorCores on the
    # stem), full-extent tm for small M (no M padding / slicing).
    tn = 128
    tk = kp if kp <= 2048 else 512
    tm = 128 if M >= 128 else M
    mp = _round_up(M, tm)
    nk = kp // tk
    single_k = (nk == 1)

    x_p = x2d.astype(jnp.bfloat16)
    if (mp, kp) != (M, k_raw):
        x_p = jnp.pad(x_p, ((0, mp - M), (0, kp - k_raw)))

    operands = [x_p, w, b]
    in_specs = [
        pl.BlockSpec((tm, tk), lambda i, j, k: (i, k)),
        pl.BlockSpec((tk, tn), lambda i, j, k: (k, j)),
        pl.BlockSpec((1, tn), lambda i, j, k: (0, j)),
    ]
    has_res = residual is not None
    res_bytes = 0
    if has_res:
        r = residual.astype(jnp.bfloat16)
        if r.shape != (mp, np_):
            r = jnp.pad(r, ((0, mp - r.shape[0]), (0, np_ - r.shape[1])))
        operands.append(r)
        in_specs.append(pl.BlockSpec((tm, tn), lambda i, j, k: (i, j)))
        res_bytes = mp * np_ * 2

    out_bytes = mp * np_ * jnp.dtype(out_dtype).itemsize
    cost = pl.CostEstimate(
        flops=2 * mp * kp * np_,
        transcendentals=0,
        bytes_accessed=mp * kp * 2 + kp * np_ * 2 + np_ * 4 + res_bytes + out_bytes,
    )

    kernel = functools.partial(fused_matmul_kernel, relu=relu,
                               has_res=has_res, single_k=single_k)
    out = pl.pallas_call(
        kernel,
        out_shape=jax.ShapeDtypeStruct((mp, np_), out_dtype),
        grid_spec=pltpu.PrefetchScalarGridSpec(
            num_scalar_prefetch=0,
            grid=(mp // tm, np_ // tn, nk),
            in_specs=in_specs,
            out_specs=pl.BlockSpec((tm, tn), lambda i, j, k: (i, j)),
            scratch_shapes=([] if single_k
                            else [pltpu.VMEM((tm, tn), jnp.float32)]),
        ),
        compiler_params=pltpu.CompilerParams(
            dimension_semantics=("parallel", "parallel", "arbitrary"),
            vmem_limit_bytes=VMEM_LIMIT_BYTES,
        ),
        cost_estimate=cost,
    )(*operands)
    if mp != M:
        out = out[:M]
    return out


# ------------------------------ XLA-side glue -------------------------------- #

def _im2col_3x3(x, stride):
    """x:(N,H,W,C) NHWC (bf16), pad=1, 3x3 kernel -> (N*Ho*Wo, 9*C), (N,Ho,Wo)."""
    N, H, W, C = x.shape
    xp = jnp.pad(x, ((0, 0), (1, 1), (1, 1), (0, 0)))
    Ho = (H + 2 - 3) // stride + 1
    Wo = (W + 2 - 3) // stride + 1
    taps = []
    for dh in range(3):
        for dw in range(3):
            taps.append(
                xp[:, dh:dh + stride * (Ho - 1) + 1:stride,
                      dw:dw + stride * (Wo - 1) + 1:stride, :])
    patches = jnp.concatenate(taps, axis=-1)           # (N,Ho,Wo,9C) (kh,kw,cin)
    return patches.reshape(N * Ho * Wo, 9 * C), (N, Ho, Wo)


def maxpool3x3_s2(x):
    """MaxPool2d(3, stride=2, padding=1): pairwise max of 9 taps (no stacking)."""
    N, H, W, C = x.shape
    xp = jnp.pad(x, ((0, 0), (1, 1), (1, 1), (0, 0)), constant_values=-jnp.inf)
    Ho = (H + 2 - 3) // 2 + 1
    Wo = (W + 2 - 3) // 2 + 1
    out = None
    for dh in range(3):
        for dw in range(3):
            tap = xp[:, dh:dh + 2 * (Ho - 1) + 1:2,
                        dw:dw + 2 * (Wo - 1) + 1:2, :]
            out = tap if out is None else jnp.maximum(out, tap)
    return out


# ----------------------------- parameter setup ------------------------------ #

def _kaiming_conv(key, cout, cin, k):
    # kaiming_normal_(mode='fan_out', nonlinearity='relu'): std = sqrt(2/(cout*k*k))
    fan_out = cout * k * k
    std = (2.0 / fan_out) ** 0.5
    return jax.random.normal(key, (cout, cin, k, k), jnp.float32) * std


def _bn_affine(c):
    gamma = jnp.ones((c,), jnp.float32)
    beta = jnp.zeros((c,), jnp.float32)
    mean = jnp.zeros((c,), jnp.float32)
    var = jnp.ones((c,), jnp.float32)
    scale = gamma / jnp.sqrt(var + BN_EPS)
    bias = beta - mean * scale
    return scale, bias


def _conv3x3_to_mat(w, cin_pad):
    """(Cout,Cin,3,3) -> (9*cin_pad, Cout); row order (kh,kw,cin) matches im2col.

    cin is zero-padded to cin_pad so the matmul accepts channel-padded activations.
    """
    cout, cin = w.shape[0], w.shape[1]
    wp = jnp.pad(w, ((0, 0), (0, cin_pad - cin), (0, 0), (0, 0)))
    return jnp.transpose(wp, (2, 3, 1, 0)).reshape(9 * cin_pad, cout)


def _pack_matmul_weights(w2d, bias):
    """Pre-pad (lane-dense N, K-aligned), pre-cast to bf16, done once at prep."""
    k, n = w2d.shape
    kp, np_ = _pad_k(k), _round_up(n, 128)
    w = jnp.pad(w2d, ((0, kp - k), (0, np_ - n))).astype(jnp.bfloat16)
    b = jnp.pad(bias, (0, np_ - n)).reshape(1, np_).astype(jnp.float32)
    return {"w": w, "b": b}


def make_resnet_params(key, layers=(1, 1, 1, 1), num_classes=10):
    expansion = 1  # BasicBlock
    keys = iter(jax.random.split(key, 128))
    params = {"num_classes": num_classes}

    # Stem: conv3x3(3->16) + bn1 folded. Output columns padded to PAD_C (zeros),
    # which establishes the channel-padded activation layout for all later layers.
    w = _kaiming_conv(next(keys), 16, 3, 3)
    s, b = _bn_affine(16)
    params["stem"] = _pack_matmul_weights(_conv3x3_to_mat(w, 3) * s[None, :], b)

    inplanes = 16
    stages = []
    for planes, nblocks, stride in zip((16, 32, 64, 128), layers, (1, 2, 2, 2)):
        blocks = []
        for bi in range(nblocks):
            st = stride if bi == 0 else 1
            w1 = _kaiming_conv(next(keys), planes, inplanes, 3)
            s1, b1 = _bn_affine(planes)
            w2 = _kaiming_conv(next(keys), planes, planes, 3)
            s2, b2 = _bn_affine(planes)
            # Activations carry PAD_C channels between layers -> build weights
            # against the padded layout (zero rows for padded input channels).
            w1m = _conv3x3_to_mat(w1, PAD_C) * s1[None, :]
            w2m = _conv3x3_to_mat(w2, PAD_C) * s2[None, :]

            blk = {"stride": st,
                   "c1": _pack_matmul_weights(w1m, b1),
                   "c2": None,
                   "fused_ds": None}
            if st != 1 or inplanes != planes * expansion:
                wd = _kaiming_conv(next(keys), planes * expansion, inplanes, 1)
                sd, bd = _bn_affine(planes * expansion)
                wdm = jnp.pad(wd[:, :, 0, 0],
                              ((0, 0), (0, PAD_C - inplanes))).T * sd[None, :]
                # Fuse conv2+bn2 and the 1x1 downsample+bn into ONE matmul along K.
                blk["fused_ds"] = _pack_matmul_weights(
                    jnp.concatenate([w2m, wdm], axis=0), b2 + bd)
            else:
                blk["c2"] = _pack_matmul_weights(w2m, b2)
            inplanes = planes * expansion
            blocks.append(blk)
        stages.append(blocks)
    params["stages"] = stages

    # FC packing hoisted here (done once), avg-pool happens in f32 at forward time.
    fc_in = 128 * expansion
    bound = 1.0 / (fc_in ** 0.5)
    fc_w = jax.random.uniform(next(keys), (num_classes, fc_in),
                              jnp.float32, -bound, bound).T     # (fc_in, classes)
    fc_b = jax.random.uniform(next(keys), (num_classes,),
                              jnp.float32, -bound, bound)
    params["fc"] = _pack_matmul_weights(fc_w, fc_b)
    return params


# -------------------------------- forward ----------------------------------- #

def basic_block(x, blk):
    st = blk["stride"]
    cp = x.shape[-1]                                      # PAD_C channel layout

    # conv1 + bn1 + relu
    x2d, (N, Ho, Wo) = _im2col_3x3(x, st)
    out1 = fused_matmul(x2d, blk["c1"], relu=True).reshape(N, Ho, Wo, -1)

    # conv2 + bn2 (+ fused downsample | residual) + relu — single kernel either way.
    x2d2, _ = _im2col_3x3(out1, 1)
    M = N * Ho * Wo
    if blk["fused_ds"] is not None:
        xs = x[:, ::st, ::st, :].reshape(M, cp)           # 1x1-conv stride view
        x2d2 = jnp.concatenate([x2d2, xs], axis=1)
        out = fused_matmul(x2d2, blk["fused_ds"], relu=True)
    else:
        out = fused_matmul(x2d2, blk["c2"], relu=True,
                           residual=x.reshape(M, cp))     # identity residual (bf16)
    return out.reshape(N, Ho, Wo, -1)


def resnet_forward(x_nchw, params):
    # PyTorch input is NCHW; kernels use NHWC. Activations are bf16 throughout.
    x = jnp.transpose(x_nchw, (0, 2, 3, 1)).astype(jnp.bfloat16)

    # Stem: conv1 + bn1 + relu, then maxpool.
    x2d, (N, Ho, Wo) = _im2col_3x3(x, 1)
    x = fused_matmul(x2d, params["stem"], relu=True).reshape(N, Ho, Wo, -1)
    x = maxpool3x3_s2(x)

    for blocks in params["stages"]:
        for blk in blocks:
            x = basic_block(x, blk)

    # Global avg-pool in f32, then FC matmul (weights pre-packed at param time).
    pooled = jnp.mean(x.astype(jnp.float32), axis=(1, 2))        # (N, 128)
    logits = fused_matmul(pooled, params["fc"], relu=False, out_dtype=jnp.float32)
    return logits[:, :params["num_classes"]]


# ---------------------------------- main ------------------------------------ #

if __name__ == "__main__":
    key = jax.random.PRNGKey(0)
    k_x, k_p = jax.random.split(key)

    # Input: batch=2, channels=3 (module requires 3), spatial=16 (NCHW).
    x = jax.random.normal(k_x, (2, 3, 16, 16), jnp.float32)
    params = make_resnet_params(k_p, layers=(1, 1, 1, 1), num_classes=10)

    # Whole forward under one jit; params are closed over (weights become consts).
    forward = jax.jit(lambda xin: resnet_forward(xin, params))

    out = jax.block_until_ready(forward(x))

    assert out.shape == (2, 10), out.shape
    assert bool(jnp.all(jnp.isfinite(out)))
    print("KERNEL_OK")
</pallas_src>

<mosaic_0001>
module attributes {stable_mosaic.version = 11 : i64} {
  func.func @fused_matmul_kernel(%arg0: i32, %arg1: i32, %arg2: i32, %arg3: memref<128x128xbf16, #tpu.memory_space<vmem>>, %arg4: memref<128x128xbf16, #tpu.memory_space<vmem>>, %arg5: memref<1x128xf32, #tpu.memory_space<vmem>>, %arg6: memref<128x128xbf16, #tpu.memory_space<vmem>>) attributes {dimension_semantics = [#tpu.dimension_semantics<parallel>, #tpu.dimension_semantics<parallel>, #tpu.dimension_semantics<arbitrary>], iteration_bounds = array<i64: 4, 1, 1>, scalar_prefetch = 0 : i64, scratch_operands = 0 : i64, tpu.core_type = #tpu.core_type<tc>, window_params = [{transform_indices = @transform_0, window_bounds = array<i64: 128, 128>}, {transform_indices = @transform_1, window_bounds = array<i64: 128, 128>}, {transform_indices = @transform_2, window_bounds = array<i64: 1, 128>}, {transform_indices = @transform_3, window_bounds = array<i64: 128, 128>}]} {
    %c0 = arith.constant 0 : index
    %c0_0 = arith.constant 0 : index
    %0 = vector.load %arg3[%c0, %c0_0] : memref<128x128xbf16, #tpu.memory_space<vmem>>, vector<128x128xbf16>
    %c0_1 = arith.constant 0 : index
    %c0_2 = arith.constant 0 : index
    %1 = vector.load %arg4[%c0_1, %c0_2] : memref<128x128xbf16, #tpu.memory_space<vmem>>, vector<128x128xbf16>
    %cst = arith.constant dense<0.000000e+00> : vector<128x128xf32>
    %2 = tpu.matmul %0, %1, %cst {dimension_numbers = #tpu.dot_dimension_numbers<[1], [0], [0], [1], [0, 0, 1, 1], [], []>} : vector<128x128xbf16>, vector<128x128xbf16>, vector<128x128xf32> -> vector<128x128xf32>
    %c0_3 = arith.constant 0 : index
    %c0_4 = arith.constant 0 : index
    %3 = vector.load %arg5[%c0_3, %c0_4] : memref<1x128xf32, #tpu.memory_space<vmem>>, vector<1x128xf32>
    %4 = vector.broadcast %3 : vector<1x128xf32> to vector<128x128xf32>
    %5 = arith.addf %2, %4 : vector<128x128xf32>
    %cst_5 = arith.constant 0.000000e+00 : f32
    %6 = vector.broadcast %cst_5 : f32 to vector<128x128xf32>
    %7 = arith.maximumf %5, %6 : vector<128x128xf32>
    %8 = arith.truncf %7 : vector<128x128xf32> to vector<128x128xbf16>
    %c0_6 = arith.constant 0 : index
    %c0_7 = arith.constant 0 : index
    %9 = vector.load %arg6[%c0_6, %c0_7] : memref<128x128xbf16, #tpu.memory_space<vmem>>, vector<128x128xbf16>
    tpu.vector_store %arg6[%c0_6, %c0_7], %8 {strides = array<i32>} : memref<128x128xbf16, #tpu.memory_space<vmem>>, vector<128x128xbf16>,
    return
  }
  func.func @transform_0(%arg0: i32, %arg1: i32, %arg2: i32) -> (i32, i32) {
    %c0_i32 = arith.constant 0 : i32
    return %arg0, %arg2 : i32, i32
  }
  func.func @transform_1(%arg0: i32, %arg1: i32, %arg2: i32) -> (i32, i32) {
    %c0_i32 = arith.constant 0 : i32
    return %arg2, %arg1 : i32, i32
  }
  func.func @transform_2(%arg0: i32, %arg1: i32, %arg2: i32) -> (i32, i32) {
    %c0_i32 = arith.constant 0 : i32
    %c0_i32_0 = arith.constant 0 : i32
    return %c0_i32, %arg1 : i32, i32
  }
  func.func @transform_3(%arg0: i32, %arg1: i32, %arg2: i32) -> (i32, i32) {
    %c0_i32 = arith.constant 0 : i32
    return %arg0, %arg1 : i32, i32
  }
}

module attributes {stable_mosaic.version = 11 : i64} {
  func.func @fused_matmul_kernel(%arg0: i32, %arg1: i32, %arg2: i32, %arg3: memref<128x1152xbf16, #tpu.memory_space<vmem>>, %arg4: memref<1152x128xbf16, #tpu.memory_space<vmem>>, %arg5: memref<1x128xf32, #tpu.memory_space<vmem>>, %arg6: memref<128x128xbf16, #tpu.memory_space<vmem>>) attributes {dimension_semantics = [#tpu.dimension_semantics<parallel>, #tpu.dimension_semantics<parallel>, #tpu.dimension_semantics<arbitrary>], iteration_bounds = array<i64: 1, 1, 1>, scalar_prefetch = 0 : i64, scratch_operands = 0 : i64, tpu.core_type = #tpu.core_type<tc>, window_params = [{transform_indices = @transform_0, window_bounds = array<i64: 128, 1152>}, {transform_indices = @transform_1, window_bounds = array<i64: 1152, 128>}, {transform_indices = @transform_2, window_bounds = array<i64: 1, 128>}, {transform_indices = @transform_3, window_bounds = array<i64: 128, 128>}]} {
    %c0 = arith.constant 0 : index
    %c0_0 = arith.constant 0 : index
    %0 = vector.load %arg3[%c0, %c0_0] : memref<128x1152xbf16, #tpu.memory_space<vmem>>, vector<128x1152xbf16>
    %c0_1 = arith.constant 0 : index
    %c0_2 = arith.constant 0 : index
    %1 = vector.load %arg4[%c0_1, %c0_2] : memref<1152x128xbf16, #tpu.memory_space<vmem>>, vector<1152x128xbf16>
    %cst = arith.constant dense<0.000000e+00> : vector<128x128xf32>
    %2 = tpu.matmul %0, %1, %cst {dimension_numbers = #tpu.dot_dimension_numbers<[1], [0], [0], [1], [0, 0, 1, 1], [], []>} : vector<128x1152xbf16>, vector<1152x128xbf16>, vector<128x128xf32> -> vector<128x128xf32>
    %c0_3 = arith.constant 0 : index
    %c0_4 = arith.constant 0 : index
    %3 = vector.load %arg5[%c0_3, %c0_4] : memref<1x128xf32, #tpu.memory_space<vmem>>, vector<1x128xf32>
    %4 = vector.broadcast %3 : vector<1x128xf32> to vector<128x128xf32>
    %5 = arith.addf %2, %4 : vector<128x128xf32>
    %cst_5 = arith.constant 0.000000e+00 : f32
    %6 = vector.broadcast %cst_5 : f32 to vector<128x128xf32>
    %7 = arith.maximumf %5, %6 : vector<128x128xf32>
    %8 = arith.truncf %7 : vector<128x128xf32> to vector<128x128xbf16>
    %c0_6 = arith.constant 0 : index
    %c0_7 = arith.constant 0 : index
    %9 = vector.load %arg6[%c0_6, %c0_7] : memref<128x128xbf16, #tpu.memory_space<vmem>>, vector<128x128xbf16>
    tpu.vector_store %arg6[%c0_6, %c0_7], %8 {strides = array<i32>} : memref<128x128xbf16, #tpu.memory_space<vmem>>, vector<128x128xbf16>,
    return
  }
  func.func @transform_0(%arg0: i32, %arg1: i32, %arg2: i32) -> (i32, i32) {
    %c0_i32 = arith.constant 0 : i32
    return %arg0, %arg2 : i32, i32
  }
  func.func @transform_1(%arg0: i32, %arg1: i32, %arg2: i32) -> (i32, i32) {
    %c0_i32 = arith.constant 0 : i32
    return %arg2, %arg1 : i32, i32
  }
  func.func @transform_2(%arg0: i32, %arg1: i32, %arg2: i32) -> (i32, i32) {
    %c0_i32 = arith.constant 0 : i32
    %c0_i32_0 = arith.constant 0 : i32
    return %c0_i32, %arg1 : i32, i32
  }
  func.func @transform_3(%arg0: i32, %arg1: i32, %arg2: i32) -> (i32, i32) {
    %c0_i32 = arith.constant 0 : i32
    return %arg0, %arg1 : i32, i32
  }
}

module attributes {stable_mosaic.version = 11 : i64} {
  func.func @fused_matmul_kernel(%arg0: i32, %arg1: i32, %arg2: i32, %arg3: memref<128x1152xbf16, #tpu.memory_space<vmem>>, %arg4: memref<1152x128xbf16, #tpu.memory_space<vmem>>, %arg5: memref<1x128xf32, #tpu.memory_space<vmem>>, %arg6: memref<128x128xbf16, #tpu.memory_space<vmem>>, %arg7: memref<128x128xbf16, #tpu.memory_space<vmem>>) attributes {dimension_semantics = [#tpu.dimension_semantics<parallel>, #tpu.dimension_semantics<parallel>, #tpu.dimension_semantics<arbitrary>], iteration_bounds = array<i64: 1, 1, 1>, scalar_prefetch = 0 : i64, scratch_operands = 0 : i64, tpu.core_type = #tpu.core_type<tc>, window_params = [{transform_indices = @transform_0, window_bounds = array<i64: 128, 1152>}, {transform_indices = @transform_1, window_bounds = array<i64: 1152, 128>}, {transform_indices = @transform_2, window_bounds = array<i64: 1, 128>}, {transform_indices = @transform_3, window_bounds = array<i64: 128, 128>}, {transform_indices = @transform_4, window_bounds = array<i64: 128, 128>}]} {
    %c0 = arith.constant 0 : index
    %c0_0 = arith.constant 0 : index
    %0 = vector.load %arg3[%c0, %c0_0] : memref<128x1152xbf16, #tpu.memory_space<vmem>>, vector<128x1152xbf16>
    %c0_1 = arith.constant 0 : index
    %c0_2 = arith.constant 0 : index
    %1 = vector.load %arg4[%c0_1, %c0_2] : memref<1152x128xbf16, #tpu.memory_space<vmem>>, vector<1152x128xbf16>
    %cst = arith.constant dense<0.000000e+00> : vector<128x128xf32>
    %2 = tpu.matmul %0, %1, %cst {dimension_numbers = #tpu.dot_dimension_numbers<[1], [0], [0], [1], [0, 0, 1, 1], [], []>} : vector<128x1152xbf16>, vector<1152x128xbf16>, vector<128x128xf32> -> vector<128x128xf32>
    %c0_3 = arith.constant 0 : index
    %c0_4 = arith.constant 0 : index
    %3 = vector.load %arg5[%c0_3, %c0_4] : memref<1x128xf32, #tpu.memory_space<vmem>>, vector<1x128xf32>
    %4 = vector.broadcast %3 : vector<1x128xf32> to vector<128x128xf32>
    %5 = arith.addf %2, %4 : vector<128x128xf32>
    %c0_5 = arith.constant 0 : index
    %c0_6 = arith.constant 0 : index
    %6 = vector.load %arg6[%c0_5, %c0_6] : memref<128x128xbf16, #tpu.memory_space<vmem>>, vector<128x128xbf16>
    %7 = arith.extf %6 : vector<128x128xbf16> to vector<128x128xf32>
    %8 = arith.addf %5, %7 : vector<128x128xf32>
    %cst_7 = arith.constant 0.000000e+00 : f32
    %9 = vector.broadcast %cst_7 : f32 to vector<128x128xf32>
    %10 = arith.maximumf %8, %9 : vector<128x128xf32>
    %11 = arith.truncf %10 : vector<128x128xf32> to vector<128x128xbf16>
    %c0_8 = arith.constant 0 : index
    %c0_9 = arith.constant 0 : index
    %12 = vector.load %arg7[%c0_8, %c0_9] : memref<128x128xbf16, #tpu.memory_space<vmem>>, vector<128x128xbf16>
    tpu.vector_store %arg7[%c0_8, %c0_9], %11 {strides = array<i32>} : memref<128x128xbf16, #tpu.memory_space<vmem>>, vector<128x128xbf16>,
    return
  }
  func.func @transform_0(%arg0: i32, %arg1: i32, %arg2: i32) -> (i32, i32) {
    %c0_i32 = arith.constant 0 : i32
    return %arg0, %arg2 : i32, i32
  }
  func.func @transform_1(%arg0: i32, %arg1: i32, %arg2: i32) -> (i32, i32) {
    %c0_i32 = arith.constant 0 : i32
    return %arg2, %arg1 : i32, i32
  }
  func.func @transform_2(%arg0: i32, %arg1: i32, %arg2: i32) -> (i32, i32) {
    %c0_i32 = arith.constant 0 : i32
    %c0_i32_0 = arith.constant 0 : i32
    return %c0_i32, %arg1 : i32, i32
  }
  func.func @transform_3(%arg0: i32, %arg1: i32, %arg2: i32) -> (i32, i32) {
    %c0_i32 = arith.constant 0 : i32
    return %arg0, %arg1 : i32, i32
  }
  func.func @transform_4(%arg0: i32, %arg1: i32, %arg2: i32) -> (i32, i32) {
    %c0_i32 = arith.constant 0 : i32
    return %arg0, %arg1 : i32, i32
  }
}

module attributes {stable_mosaic.version = 11 : i64} {
  func.func @fused_matmul_kernel(%arg0: i32, %arg1: i32, %arg2: i32, %arg3: memref<32x1152xbf16, #tpu.memory_space<vmem>>, %arg4: memref<1152x128xbf16, #tpu.memory_space<vmem>>, %arg5: memref<1x128xf32, #tpu.memory_space<vmem>>, %arg6: memref<32x128xbf16, #tpu.memory_space<vmem>>) attributes {dimension_semantics = [#tpu.dimension_semantics<parallel>, #tpu.dimension_semantics<parallel>, #tpu.dimension_semantics<arbitrary>], iteration_bounds = array<i64: 1, 1, 1>, scalar_prefetch = 0 : i64, scratch_operands = 0 : i64, tpu.core_type = #tpu.core_type<tc>, window_params = [{transform_indices = @transform_0, window_bounds = array<i64: 32, 1152>}, {transform_indices = @transform_1, window_bounds = array<i64: 1152, 128>}, {transform_indices = @transform_2, window_bounds = array<i64: 1, 128>}, {transform_indices = @transform_3, window_bounds = array<i64: 32, 128>}]} {
    %c0 = arith.constant 0 : index
    %c0_0 = arith.constant 0 : index
    %0 = vector.load %arg3[%c0, %c0_0] : memref<32x1152xbf16, #tpu.memory_space<vmem>>, vector<32x1152xbf16>
    %c0_1 = arith.constant 0 : index
    %c0_2 = arith.constant 0 : index
    %1 = vector.load %arg4[%c0_1, %c0_2] : memref<1152x128xbf16, #tpu.memory_space<vmem>>, vector<1152x128xbf16>
    %cst = arith.constant dense<0.000000e+00> : vector<32x128xf32>
    %2 = tpu.matmul %0, %1, %cst {dimension_numbers = #tpu.dot_dimension_numbers<[1], [0], [0], [1], [0, 0, 1, 1], [], []>} : vector<32x1152xbf16>, vector<1152x128xbf16>, vector<32x128xf32> -> vector<32x128xf32>
    %c0_3 = arith.constant 0 : index
    %c0_4 = arith.constant 0 : index
    %3 = vector.load %arg5[%c0_3, %c0_4] : memref<1x128xf32, #tpu.memory_space<vmem>>, vector<1x128xf32>
    %4 = vector.broadcast %3 : vector<1x128xf32> to vector<32x128xf32>
    %5 = arith.addf %2, %4 : vector<32x128xf32>
    %cst_5 = arith.constant 0.000000e+00 : f32
    %6 = vector.broadcast %cst_5 : f32 to vector<32x128xf32>
    %7 = arith.maximumf %5, %6 : vector<32x128xf32>
    %8 = arith.truncf %7 : vector<32x128xf32> to vector<32x128xbf16>
    %c0_6 = arith.constant 0 : index
    %c0_7 = arith.constant 0 : index
    %9 = vector.load %arg6[%c0_6, %c0_7] : memref<32x128xbf16, #tpu.memory_space<vmem>>, vector<32x128xbf16>
    tpu.vector_store %arg6[%c0_6, %c0_7], %8 {strides = array<i32>} : memref<32x128xbf16, #tpu.memory_space<vmem>>, vector<32x128xbf16>,
    return
  }
  func.func @transform_0(%arg0: i32, %arg1: i32, %arg2: i32) -> (i32, i32) {
    %c0_i32 = arith.constant 0 : i32
    return %arg0, %arg2 : i32, i32
  }
  func.func @transform_1(%arg0: i32, %arg1: i32, %arg2: i32) -> (i32, i32) {
    %c0_i32 = arith.constant 0 : i32
    return %arg2, %arg1 : i32, i32
  }
  func.func @transform_2(%arg0: i32, %arg1: i32, %arg2: i32) -> (i32, i32) {
    %c0_i32 = arith.constant 0 : i32
    %c0_i32_0 = arith.constant 0 : i32
    return %c0_i32, %arg1 : i32, i32
  }
  func.func @transform_3(%arg0: i32, %arg1: i32, %arg2: i32) -> (i32, i32) {
    %c0_i32 = arith.constant 0 : i32
    return %arg0, %arg1 : i32, i32
  }
}

module attributes {stable_mosaic.version = 11 : i64} {
  func.func @fused_matmul_kernel(%arg0: i32, %arg1: i32, %arg2: i32, %arg3: memref<32x1280xbf16, #tpu.memory_space<vmem>>, %arg4: memref<1280x128xbf16, #tpu.memory_space<vmem>>, %arg5: memref<1x128xf32, #tpu.memory_space<vmem>>, %arg6: memref<32x128xbf16, #tpu.memory_space<vmem>>) attributes {dimension_semantics = [#tpu.dimension_semantics<parallel>, #tpu.dimension_semantics<parallel>, #tpu.dimension_semantics<arbitrary>], iteration_bounds = array<i64: 1, 1, 1>, scalar_prefetch = 0 : i64, scratch_operands = 0 : i64, tpu.core_type = #tpu.core_type<tc>, window_params = [{transform_indices = @transform_0, window_bounds = array<i64: 32, 1280>}, {transform_indices = @transform_1, window_bounds = array<i64: 1280, 128>}, {transform_indices = @transform_2, window_bounds = array<i64: 1, 128>}, {transform_indices = @transform_3, window_bounds = array<i64: 32, 128>}]} {
    %c0 = arith.constant 0 : index
    %c0_0 = arith.constant 0 : index
    %0 = vector.load %arg3[%c0, %c0_0] : memref<32x1280xbf16, #tpu.memory_space<vmem>>, vector<32x1280xbf16>
    %c0_1 = arith.constant 0 : index
    %c0_2 = arith.constant 0 : index
    %1 = vector.load %arg4[%c0_1, %c0_2] : memref<1280x128xbf16, #tpu.memory_space<vmem>>, vector<1280x128xbf16>
    %cst = arith.constant dense<0.000000e+00> : vector<32x128xf32>
    %2 = tpu.matmul %0, %1, %cst {dimension_numbers = #tpu.dot_dimension_numbers<[1], [0], [0], [1], [0, 0, 1, 1], [], []>} : vector<32x1280xbf16>, vector<1280x128xbf16>, vector<32x128xf32> -> vector<32x128xf32>
    %c0_3 = arith.constant 0 : index
    %c0_4 = arith.constant 0 : index
    %3 = vector.load %arg5[%c0_3, %c0_4] : memref<1x128xf32, #tpu.memory_space<vmem>>, vector<1x128xf32>
    %4 = vector.broadcast %3 : vector<1x128xf32> to vector<32x128xf32>
    %5 = arith.addf %2, %4 : vector<32x128xf32>
    %cst_5 = arith.constant 0.000000e+00 : f32
    %6 = vector.broadcast %cst_5 : f32 to vector<32x128xf32>
    %7 = arith.maximumf %5, %6 : vector<32x128xf32>
    %8 = arith.truncf %7 : vector<32x128xf32> to vector<32x128xbf16>
    %c0_6 = arith.constant 0 : index
    %c0_7 = arith.constant 0 : index
    %9 = vector.load %arg6[%c0_6, %c0_7] : memref<32x128xbf16, #tpu.memory_space<vmem>>, vector<32x128xbf16>
    tpu.vector_store %arg6[%c0_6, %c0_7], %8 {strides = array<i32>} : memref<32x128xbf16, #tpu.memory_space<vmem>>, vector<32x128xbf16>,
    return
  }
  func.func @transform_0(%arg0: i32, %arg1: i32, %arg2: i32) -> (i32, i32) {
    %c0_i32 = arith.constant 0 : i32
    return %arg0, %arg2 : i32, i32
  }
  func.func @transform_1(%arg0: i32, %arg1: i32, %arg2: i32) -> (i32, i32) {
    %c0_i32 = arith.constant 0 : i32
    return %arg2, %arg1 : i32, i32
  }
  func.func @transform_2(%arg0: i32, %arg1: i32, %arg2: i32) -> (i32, i32) {
    %c0_i32 = arith.constant 0 : i32
    %c0_i32_0 = arith.constant 0 : i32
    return %c0_i32, %arg1 : i32, i32
  }
  func.func @transform_3(%arg0: i32, %arg1: i32, %arg2: i32) -> (i32, i32) {
    %c0_i32 = arith.constant 0 : i32
    return %arg0, %arg1 : i32, i32
  }
}

module attributes {stable_mosaic.version = 11 : i64} {
  func.func @fused_matmul_kernel(%arg0: i32, %arg1: i32, %arg2: i32, %arg3: memref<8x1152xbf16, #tpu.memory_space<vmem>>, %arg4: memref<1152x128xbf16, #tpu.memory_space<vmem>>, %arg5: memref<1x128xf32, #tpu.memory_space<vmem>>, %arg6: memref<8x128xbf16, #tpu.memory_space<vmem>>) attributes {dimension_semantics = [#tpu.dimension_semantics<parallel>, #tpu.dimension_semantics<parallel>, #tpu.dimension_semantics<arbitrary>], iteration_bounds = array<i64: 1, 1, 1>, scalar_prefetch = 0 : i64, scratch_operands = 0 : i64, tpu.core_type = #tpu.core_type<tc>, window_params = [{transform_indices = @transform_0, window_bounds = array<i64: 8, 1152>}, {transform_indices = @transform_1, window_bounds = array<i64: 1152, 128>}, {transform_indices = @transform_2, window_bounds = array<i64: 1, 128>}, {transform_indices = @transform_3, window_bounds = array<i64: 8, 128>}]} {
    %c0 = arith.constant 0 : index
    %c0_0 = arith.constant 0 : index
    %0 = vector.load %arg3[%c0, %c0_0] : memref<8x1152xbf16, #tpu.memory_space<vmem>>, vector<8x1152xbf16>
    %c0_1 = arith.constant 0 : index
    %c0_2 = arith.constant 0 : index
    %1 = vector.load %arg4[%c0_1, %c0_2] : memref<1152x128xbf16, #tpu.memory_space<vmem>>, vector<1152x128xbf16>
    %cst = arith.constant dense<0.000000e+00> : vector<8x128xf32>
    %2 = tpu.matmul %0, %1, %cst {dimension_numbers = #tpu.dot_dimension_numbers<[1], [0], [0], [1], [0, 0, 1, 1], [], []>} : vector<8x1152xbf16>, vector<1152x128xbf16>, vector<8x128xf32> -> vector<8x128xf32>
    %c0_3 = arith.constant 0 : index
    %c0_4 = arith.constant 0 : index
    %3 = vector.load %arg5[%c0_3, %c0_4] : memref<1x128xf32, #tpu.memory_space<vmem>>, vector<1x128xf32>
    %4 = vector.broadcast %3 : vector<1x128xf32> to vector<8x128xf32>
    %5 = arith.addf %2, %4 : vector<8x128xf32>
    %cst_5 = arith.constant 0.000000e+00 : f32
    %6 = vector.broadcast %cst_5 : f32 to vector<8x128xf32>
    %7 = arith.maximumf %5, %6 : vector<8x128xf32>
    %8 = arith.truncf %7 : vector<8x128xf32> to vector<8x128xbf16>
    %c0_6 = arith.constant 0 : index
    %c0_7 = arith.constant 0 : index
    %9 = vector.load %arg6[%c0_6, %c0_7] : memref<8x128xbf16, #tpu.memory_space<vmem>>, vector<8x128xbf16>
    tpu.vector_store %arg6[%c0_6, %c0_7], %8 {strides = array<i32>} : memref<8x128xbf16, #tpu.memory_space<vmem>>, vector<8x128xbf16>,
    return
  }
  func.func @transform_0(%arg0: i32, %arg1: i32, %arg2: i32) -> (i32, i32) {
    %c0_i32 = arith.constant 0 : i32
    return %arg0, %arg2 : i32, i32
  }
  func.func @transform_1(%arg0: i32, %arg1: i32, %arg2: i32) -> (i32, i32) {
    %c0_i32 = arith.constant 0 : i32
    return %arg2, %arg1 : i32, i32
  }
  func.func @transform_2(%arg0: i32, %arg1: i32, %arg2: i32) -> (i32, i32) {
    %c0_i32 = arith.constant 0 : i32
    %c0_i32_0 = arith.constant 0 : i32
    return %c0_i32, %arg1 : i32, i32
  }
  func.func @transform_3(%arg0: i32, %arg1: i32, %arg2: i32) -> (i32, i32) {
    %c0_i32 = arith.constant 0 : i32
    return %arg0, %arg1 : i32, i32
  }
}

module attributes {stable_mosaic.version = 11 : i64} {
  func.func @fused_matmul_kernel(%arg0: i32, %arg1: i32, %arg2: i32, %arg3: memref<2x1152xbf16, #tpu.memory_space<vmem>>, %arg4: memref<1152x128xbf16, #tpu.memory_space<vmem>>, %arg5: memref<1x128xf32, #tpu.memory_space<vmem>>, %arg6: memref<2x128xbf16, #tpu.memory_space<vmem>>) attributes {dimension_semantics = [#tpu.dimension_semantics<parallel>, #tpu.dimension_semantics<parallel>, #tpu.dimension_semantics<arbitrary>], iteration_bounds = array<i64: 1, 1, 1>, scalar_prefetch = 0 : i64, scratch_operands = 0 : i64, tpu.core_type = #tpu.core_type<tc>, window_params = [{transform_indices = @transform_0, window_bounds = array<i64: 2, 1152>}, {transform_indices = @transform_1, window_bounds = array<i64: 1152, 128>}, {transform_indices = @transform_2, window_bounds = array<i64: 1, 128>}, {transform_indices = @transform_3, window_bounds = array<i64: 2, 128>}]} {
    %c0 = arith.constant 0 : index
    %c0_0 = arith.constant 0 : index
    %0 = vector.load %arg3[%c0, %c0_0] : memref<2x1152xbf16, #tpu.memory_space<vmem>>, vector<2x1152xbf16>
    %c0_1 = arith.constant 0 : index
    %c0_2 = arith.constant 0 : index
    %1 = vector.load %arg4[%c0_1, %c0_2] : memref<1152x128xbf16, #tpu.memory_space<vmem>>, vector<1152x128xbf16>
    %cst = arith.constant dense<0.000000e+00> : vector<2x128xf32>
    %2 = tpu.matmul %0, %1, %cst {dimension_numbers = #tpu.dot_dimension_numbers<[1], [0], [0], [1], [0, 0, 1, 1], [], []>} : vector<2x1152xbf16>, vector<1152x128xbf16>, vector<2x128xf32> -> vector<2x128xf32>
    %c0_3 = arith.constant 0 : index
    %c0_4 = arith.constant 0 : index
    %3 = vector.load %arg5[%c0_3, %c0_4] : memref<1x128xf32, #tpu.memory_space<vmem>>, vector<1x128xf32>
    %4 = vector.broadcast %3 : vector<1x128xf32> to vector<2x128xf32>
    %5 = arith.addf %2, %4 : vector<2x128xf32>
    %cst_5 = arith.constant 0.000000e+00 : f32
    %6 = vector.broadcast %cst_5 : f32 to vector<2x128xf32>
    %7 = arith.maximumf %5, %6 : vector<2x128xf32>
    %8 = arith.truncf %7 : vector<2x128xf32> to vector<2x128xbf16>
    %c0_6 = arith.constant 0 : index
    %c0_7 = arith.constant 0 : index
    %9 = vector.load %arg6[%c0_6, %c0_7] : memref<2x128xbf16, #tpu.memory_space<vmem>>, vector<2x128xbf16>
    tpu.vector_store %arg6[%c0_6, %c0_7], %8 {strides = array<i32>} : memref<2x128xbf16, #tpu.memory_space<vmem>>, vector<2x128xbf16>,
    return
  }
  func.func @transform_0(%arg0: i32, %arg1: i32, %arg2: i32) -> (i32, i32) {
    %c0_i32 = arith.constant 0 : i32
    return %arg0, %arg2 : i32, i32
  }
  func.func @transform_1(%arg0: i32, %arg1: i32, %arg2: i32) -> (i32, i32) {
    %c0_i32 = arith.constant 0 : i32
    return %arg2, %arg1 : i32, i32
  }
  func.func @transform_2(%arg0: i32, %arg1: i32, %arg2: i32) -> (i32, i32) {
    %c0_i32 = arith.constant 0 : i32
    %c0_i32_0 = arith.constant 0 : i32
    return %c0_i32, %arg1 : i32, i32
  }
  func.func @transform_3(%arg0: i32, %arg1: i32, %arg2: i32) -> (i32, i32) {
    %c0_i32 = arith.constant 0 : i32
    return %arg0, %arg1 : i32, i32
  }
}

module attributes {stable_mosaic.version = 11 : i64} {
  func.func @fused_matmul_kernel(%arg0: i32, %arg1: i32, %arg2: i32, %arg3: memref<8x1280xbf16, #tpu.memory_space<vmem>>, %arg4: memref<1280x128xbf16, #tpu.memory_space<vmem>>, %arg5: memref<1x128xf32, #tpu.memory_space<vmem>>, %arg6: memref<8x128xbf16, #tpu.memory_space<vmem>>) attributes {dimension_semantics = [#tpu.dimension_semantics<parallel>, #tpu.dimension_semantics<parallel>, #tpu.dimension_semantics<arbitrary>], iteration_bounds = array<i64: 1, 1, 1>, scalar_prefetch = 0 : i64, scratch_operands = 0 : i64, tpu.core_type = #tpu.core_type<tc>, window_params = [{transform_indices = @transform_0, window_bounds = array<i64: 8, 1280>}, {transform_indices = @transform_1, window_bounds = array<i64: 1280, 128>}, {transform_indices = @transform_2, window_bounds = array<i64: 1, 128>}, {transform_indices = @transform_3, window_bounds = array<i64: 8, 128>}]} {
    %c0 = arith.constant 0 : index
    %c0_0 = arith.constant 0 : index
    %0 = vector.load %arg3[%c0, %c0_0] : memref<8x1280xbf16, #tpu.memory_space<vmem>>, vector<8x1280xbf16>
    %c0_1 = arith.constant 0 : index
    %c0_2 = arith.constant 0 : index
    %1 = vector.load %arg4[%c0_1, %c0_2] : memref<1280x128xbf16, #tpu.memory_space<vmem>>, vector<1280x128xbf16>
    %cst = arith.constant dense<0.000000e+00> : vector<8x128xf32>
    %2 = tpu.matmul %0, %1, %cst {dimension_numbers = #tpu.dot_dimension_numbers<[1], [0], [0], [1], [0, 0, 1, 1], [], []>} : vector<8x1280xbf16>, vector<1280x128xbf16>, vector<8x128xf32> -> vector<8x128xf32>
    %c0_3 = arith.constant 0 : index
    %c0_4 = arith.constant 0 : index
    %3 = vector.load %arg5[%c0_3, %c0_4] : memref<1x128xf32, #tpu.memory_space<vmem>>, vector<1x128xf32>
    %4 = vector.broadcast %3 : vector<1x128xf32> to vector<8x128xf32>
    %5 = arith.addf %2, %4 : vector<8x128xf32>
    %cst_5 = arith.constant 0.000000e+00 : f32
    %6 = vector.broadcast %cst_5 : f32 to vector<8x128xf32>
    %7 = arith.maximumf %5, %6 : vector<8x128xf32>
    %8 = arith.truncf %7 : vector<8x128xf32> to vector<8x128xbf16>
    %c0_6 = arith.constant 0 : index
    %c0_7 = arith.constant 0 : index
    %9 = vector.load %arg6[%c0_6, %c0_7] : memref<8x128xbf16, #tpu.memory_space<vmem>>, vector<8x128xbf16>
    tpu.vector_store %arg6[%c0_6, %c0_7], %8 {strides = array<i32>} : memref<8x128xbf16, #tpu.memory_space<vmem>>, vector<8x128xbf16>,
    return
  }
  func.func @transform_0(%arg0: i32, %arg1: i32, %arg2: i32) -> (i32, i32) {
    %c0_i32 = arith.constant 0 : i32
    return %arg0, %arg2 : i32, i32
  }
  func.func @transform_1(%arg0: i32, %arg1: i32, %arg2: i32) -> (i32, i32) {
    %c0_i32 = arith.constant 0 : i32
    return %arg2, %arg1 : i32, i32
  }
  func.func @transform_2(%arg0: i32, %arg1: i32, %arg2: i32) -> (i32, i32) {
    %c0_i32 = arith.constant 0 : i32
    %c0_i32_0 = arith.constant 0 : i32
    return %c0_i32, %arg1 : i32, i32
  }
  func.func @transform_3(%arg0: i32, %arg1: i32, %arg2: i32) -> (i32, i32) {
    %c0_i32 = arith.constant 0 : i32
    return %arg0, %arg1 : i32, i32
  }
}

module attributes {stable_mosaic.version = 11 : i64} {
  func.func @fused_matmul_kernel(%arg0: i32, %arg1: i32, %arg2: i32, %arg3: memref<2x128xbf16, #tpu.memory_space<vmem>>, %arg4: memref<128x128xbf16, #tpu.memory_space<vmem>>, %arg5: memref<1x128xf32, #tpu.memory_space<vmem>>, %arg6: memref<2x128xf32, #tpu.memory_space<vmem>>) attributes {dimension_semantics = [#tpu.dimension_semantics<parallel>, #tpu.dimension_semantics<parallel>, #tpu.dimension_semantics<arbitrary>], iteration_bounds = array<i64: 1, 1, 1>, scalar_prefetch = 0 : i64, scratch_operands = 0 : i64, tpu.core_type = #tpu.core_type<tc>, window_params = [{transform_indices = @transform_0, window_bounds = array<i64: 2, 128>}, {transform_indices = @transform_1, window_bounds = array<i64: 128, 128>}, {transform_indices = @transform_2, window_bounds = array<i64: 1, 128>}, {transform_indices = @transform_3, window_bounds = array<i64: 2, 128>}]} {
    %c0 = arith.constant 0 : index
    %c0_0 = arith.constant 0 : index
    %0 = vector.load %arg3[%c0, %c0_0] : memref<2x128xbf16, #tpu.memory_space<vmem>>, vector<2x128xbf16>
    %c0_1 = arith.constant 0 : index
    %c0_2 = arith.constant 0 : index
    %1 = vector.load %arg4[%c0_1, %c0_2] : memref<128x128xbf16, #tpu.memory_space<vmem>>, vector<128x128xbf16>
    %cst = arith.constant dense<0.000000e+00> : vector<2x128xf32>
    %2 = tpu.matmul %0, %1, %cst {dimension_numbers = #tpu.dot_dimension_numbers<[1], [0], [0], [1], [0, 0, 1, 1], [], []>} : vector<2x128xbf16>, vector<128x128xbf16>, vector<2x128xf32> -> vector<2x128xf32>
    %c0_3 = arith.constant 0 : index
    %c0_4 = arith.constant 0 : index
    %3 = vector.load %arg5[%c0_3, %c0_4] : memref<1x128xf32, #tpu.memory_space<vmem>>, vector<1x128xf32>
    %4 = vector.broadcast %3 : vector<1x128xf32> to vector<2x128xf32>
    %5 = arith.addf %2, %4 : vector<2x128xf32>
    %c0_5 = arith.constant 0 : index
    %c0_6 = arith.constant 0 : index
    %6 = vector.load %arg6[%c0_5, %c0_6] : memref<2x128xf32, #tpu.memory_space<vmem>>, vector<2x128xf32>
    tpu.vector_store %arg6[%c0_5, %c0_6], %5 {strides = array<i32>} : memref<2x128xf32, #tpu.memory_space<vmem>>, vector<2x128xf32>,
    return
  }
  func.func @transform_0(%arg0: i32, %arg1: i32, %arg2: i32) -> (i32, i32) {
    %c0_i32 = arith.constant 0 : i32
    return %arg0, %arg2 : i32, i32
  }
  func.func @transform_1(%arg0: i32, %arg1: i32, %arg2: i32) -> (i32, i32) {
    %c0_i32 = arith.constant 0 : i32
    return %arg2, %arg1 : i32, i32
  }
  func.func @transform_2(%arg0: i32, %arg1: i32, %arg2: i32) -> (i32, i32) {
    %c0_i32 = arith.constant 0 : i32
    %c0_i32_0 = arith.constant 0 : i32
    return %c0_i32, %arg1 : i32, i32
  }
  func.func @transform_3(%arg0: i32, %arg1: i32, %arg2: i32) -> (i32, i32) {
    %c0_i32 = arith.constant 0 : i32
    return %arg0, %arg1 : i32, i32
  }
}

module attributes {stable_mosaic.version = 11 : i64} {
  func.func @fused_matmul_kernel(%arg0: i32, %arg1: i32, %arg2: i32, %arg3: memref<2x1280xbf16, #tpu.memory_space<vmem>>, %arg4: memref<1280x128xbf16, #tpu.memory_space<vmem>>, %arg5: memref<1x128xf32, #tpu.memory_space<vmem>>, %arg6: memref<2x128xbf16, #tpu.memory_space<vmem>>) attributes {dimension_semantics = [#tpu.dimension_semantics<parallel>, #tpu.dimension_semantics<parallel>, #tpu.dimension_semantics<arbitrary>], iteration_bounds = array<i64: 1, 1, 1>, scalar_prefetch = 0 : i64, scratch_operands = 0 : i64, tpu.core_type = #tpu.core_type<tc>, window_params = [{transform_indices = @transform_0, window_bounds = array<i64: 2, 1280>}, {transform_indices = @transform_1, window_bounds = array<i64: 1280, 128>}, {transform_indices = @transform_2, window_bounds = array<i64: 1, 128>}, {transform_indices = @transform_3, window_bounds = array<i64: 2, 128>}]} {
    %c0 = arith.constant 0 : index
    %c0_0 = arith.constant 0 : index
    %0 = vector.load %arg3[%c0, %c0_0] : memref<2x1280xbf16, #tpu.memory_space<vmem>>, vector<2x1280xbf16>
    %c0_1 = arith.constant 0 : index
    %c0_2 = arith.constant 0 : index
    %1 = vector.load %arg4[%c0_1, %c0_2] : memref<1280x128xbf16, #tpu.memory_space<vmem>>, vector<1280x128xbf16>
    %cst = arith.constant dense<0.000000e+00> : vector<2x128xf32>
    %2 = tpu.matmul %0, %1, %cst {dimension_numbers = #tpu.dot_dimension_numbers<[1], [0], [0], [1], [0, 0, 1, 1], [], []>} : vector<2x1280xbf16>, vector<1280x128xbf16>, vector<2x128xf32> -> vector<2x128xf32>
    %c0_3 = arith.constant 0 : index
    %c0_4 = arith.constant 0 : index
    %3 = vector.load %arg5[%c0_3, %c0_4] : memref<1x128xf32, #tpu.memory_space<vmem>>, vector<1x128xf32>
    %4 = vector.broadcast %3 : vector<1x128xf32> to vector<2x128xf32>
    %5 = arith.addf %2, %4 : vector<2x128xf32>
    %cst_5 = arith.constant 0.000000e+00 : f32
    %6 = vector.broadcast %cst_5 : f32 to vector<2x128xf32>
    %7 = arith.maximumf %5, %6 : vector<2x128xf32>
    %8 = arith.truncf %7 : vector<2x128xf32> to vector<2x128xbf16>
    %c0_6 = arith.constant 0 : index
    %c0_7 = arith.constant 0 : index
    %9 = vector.load %arg6[%c0_6, %c0_7] : memref<2x128xbf16, #tpu.memory_space<vmem>>, vector<2x128xbf16>
    tpu.vector_store %arg6[%c0_6, %c0_7], %8 {strides = array<i32>} : memref<2x128xbf16, #tpu.memory_space<vmem>>, vector<2x128xbf16>,
    return
  }
  func.func @transform_0(%arg0: i32, %arg1: i32, %arg2: i32) -> (i32, i32) {
    %c0_i32 = arith.constant 0 : i32
    return %arg0, %arg2 : i32, i32
  }
  func.func @transform_1(%arg0: i32, %arg1: i32, %arg2: i32) -> (i32, i32) {
    %c0_i32 = arith.constant 0 : i32
    return %arg2, %arg1 : i32, i32
  }
  func.func @transform_2(%arg0: i32, %arg1: i32, %arg2: i32) -> (i32, i32) {
    %c0_i32 = arith.constant 0 : i32
    %c0_i32_0 = arith.constant 0 : i32
    return %c0_i32, %arg1 : i32, i32
  }
  func.func @transform_3(%arg0: i32, %arg1: i32, %arg2: i32) -> (i32, i32) {
    %c0_i32 = arith.constant 0 : i32
    return %arg0, %arg1 : i32, i32
  }
}

</mosaic_0001>

<bundles_post_ra>
// kernel: _lambda_.10
= control target key start
LH: loop header
LB: loop body
LE: loop exit
PB: predicated region body
PF: predicated region fallthrough
CT: control target
= control target key end

     0   :  { %s956_s12 = smov 0   ;;  %s958_s13 = smov 0   ;;  %s1043_s0 = inlined_call_operand.vmem [shape: bf16[512,128], index: 0, kind: input, shape index: {}]   ;;  %s1044_s1 = inlined_call_operand.vmem [shape: bf16[128,128], index: 1, kind: input, shape index: {}]   ;;  %s1045_s2 = inlined_call_operand.vmem [shape: f32[1,128], index: 2, kind: input, shape index: {}]   ;;  %s1046_s3 = inlined_call_operand.vmem [shape: bf16[512,128], index: 3, kind: output, shape index: {}]  }
   0x1   :  { %s960_s14 = smov 0  }
   0x2 LB: > { %s32_s15 = sadd.s32 1, %s930_s13  ;;  %p705_p0 = scmp.ge.s32.totalorder %s934_s14, 1  ;;  %s934_s14 = sphi %s960_s14, %s13_s14   ;;  %s930_s13 = sphi %s958_s13, %s1048_s13   ;;  %s926_s12 = sphi %s956_s12, %s1047_s12  }
   0x3   : > { %p34_p1 = scmp.ge.s32.totalorder %s32_s15, 4  ;;  %p188_p2 = scmp.lt.s32.totalorder %s934_s14, 5 }
   0x5   : > { %s1050_s15 = smov (%p34_p1, %s32_s15), 0  ;;  %p189_p3 = pnand %p705_p0, %p188_p2 }
   0x6   : > { %v896_v0 = vld [vmem:[%s1044_s1] sm:$0xff] (!%p189_p3)   ;;  %s706_s18 = sshll.u32 (!%p189_p3), %s926_s12, 4  ;;  %v897_v1 = vld [vmem:[%s1044_s1 + $0x8] sm:$0xff] (!%p189_p3)   ;;  %v898_v2 = vld [vmem:[%s1044_s1 + $0x10] sm:$0xff] (!%p189_p3)  }
   0x7   : > { %192 = sbr.rel (%p189_p3) target bundleno = 269 (0x10d), region = 32  ;;  %p230_p4 = scmp.lt.s32.totalorder (!%p189_p3), %s706_s18, 63  ;;  %824 = vmatprep.subr.bf16.mxu0 (!%p189_p3), %v896_v0  ;;  %856 = vmatprep.subr.bf16.mxu1 (!%p189_p3), %v896_v0  ;;  %v899_v3 = vld [vmem:[%s1044_s1 + $0x18] sm:$0xff] (!%p189_p3)   ;;  %v900_v6 = vld [vmem:[%s1044_s1 + $0x20] sm:$0xff] (!%p189_p3)   ;;  %v901_v7 = vld [vmem:[%s1044_s1 + $0x28] sm:$0xff] (!%p189_p3)  }
   0x8   : > { %825 = vmatpush3.bf16.msra.mxu0 (!%p189_p3), %v896_v0  ;;  %864 = vmatpush3.bf16.msra.mxu1 (!%p189_p3), %v896_v0  ;;  %v902_v8 = vld [vmem:[%s1044_s1 + $0x30] sm:$0xff] (!%p189_p3)   ;;  %v903_v9 = vld [vmem:[%s1044_s1 + $0x38] sm:$0xff] (!%p189_p3)   ;;  %v710_v16 = vld [vmem:[%s1045_s2] ss:$0 sm:$0xff] (!%p189_p3) }
   0x9   : > { %826 = vmatprep.subr.bf16.mxu0 (!%p189_p3), %v897_v1  ;;  %857 = vmatprep.subr.bf16.mxu1 (!%p189_p3), %v897_v1 }
   0xc   : > { %827 = vmatpush3.bf16.msra.mxu0 (!%p189_p3), %v897_v1  ;;  %865 = vmatpush3.bf16.msra.mxu1 (!%p189_p3), %v897_v1 }
   0xd   : > { %828 = vmatprep.subr.bf16.mxu0 (!%p189_p3), %v898_v2  ;;  %858 = vmatprep.subr.bf16.mxu1 (!%p189_p3), %v898_v2 }
   0xe   : > { %s1052_s18 = smov (!%p230_p4, %s706_s18), 63 }
   0xf   : > { %s707_s23 = sshll.u32 %s1052_s18, 2 }
  0x10   : > { %s991_s26 = scalar_lea.vmem %s1043_s0, %s707_s23  ;;  %829 = vmatpush3.bf16.msra.mxu0 %v898_v2  ;;  %866 = vmatpush3.bf16.msra.mxu1 %v898_v2  ;;  %s1024_s17 = scalar_lea.vmem %s1046_s3, %s707_s23 }
  0x11   : > { %v904_v4 = vld [vmem:[%s991_s26] sm:$0xff]   ;;  %830 = vmatprep.subr.bf16.mxu0 %v899_v3  ;;  %859 = vmatprep.subr.bf16.mxu1 %v899_v3  ;;  %v906_v10 = vld [vmem:[%s991_s26 + $0x8] sm:$0xff]   ;;  %v908_v12 = vld [vmem:[%s991_s26 + $0x10] sm:$0xff]  }
  0x12   : > { %v905_v5 = vld [vmem:[%s991_s26 + $0x20] sm:$0xff]   ;;  %840 = vmatprep.mubr.bf16.mxu0 %v904_v4  ;;  %v907_v11 = vld [vmem:[%s991_s26 + $0x28] sm:$0xff]   ;;  %v909_v13 = vld [vmem:[%s991_s26 + $0x30] sm:$0xff]  }
  0x13   : > { %848 = vmatprep.mubr.bf16.mxu1 %v905_v5  ;;  %v910_v14 = vld [vmem:[%s991_s26 + $0x18] sm:$0xff]  }
  0x14   : > { %831 = vmatpush3.bf16.msra.mxu0 %v899_v3  ;;  %867 = vmatpush3.bf16.msra.mxu1 %v899_v3  ;;  %v911_v15 = vld [vmem:[%s991_s26 + $0x38] sm:$0xff]  }
  0x15   : > { %832 = vmatprep.subr.bf16.mxu0 %v900_v6  ;;  %860 = vmatprep.subr.bf16.mxu1 %v900_v6 }
  0x18   : > { %833 = vmatpush3.bf16.msra.mxu0 %v900_v6  ;;  %868 = vmatpush3.bf16.msra.mxu1 %v900_v6 }
  0x19   : > { %834 = vmatprep.subr.bf16.mxu0 %v901_v7  ;;  %861 = vmatprep.subr.bf16.mxu1 %v901_v7 }
  0x1c   : > { %835 = vmatpush3.bf16.msra.mxu0 %v901_v7  ;;  %869 = vmatpush3.bf16.msra.mxu1 %v901_v7 }
  0x1d   : > { %836 = vmatprep.subr.bf16.mxu0 %v902_v8  ;;  %862 = vmatprep.subr.bf16.mxu1 %v902_v8 }
  0x20   : > { %837 = vmatpush3.bf16.msra.mxu0 %v902_v8  ;;  %870 = vmatpush3.bf16.msra.mxu1 %v902_v8 }
  0x21   : > { %838 = vmatprep.subr.bf16.mxu0 %v903_v9  ;;  %863 = vmatprep.subr.bf16.mxu1 %v903_v9 }
  0x24   : > { %839 = vmatpush3.bf16.msra.mxu0 %v903_v9  ;;  %871 = vmatpush3.bf16.msra.mxu1 %v903_v9 }
  0x27   : > { %841 = vmatmul.mubr.bf16.vlgmr.msra.gmra.mrb[0].mxu0 %v906_v10  ;;  %849 = vmatmul.mubr.bf16.vlgmr.msra.gmra.mrb[0].mxu1 %v907_v11 }
  0x28   : > { %844 = vmatprep.mubr.bf16.mxu0 %v908_v12  ;;  %852 = vmatprep.mubr.bf16.mxu1 %v909_v13 }
  0x2f   : > { %845 = vmatmul.mubr.bf16.gmra.mrb[4].mxu0 %v910_v14  ;;  %853 = vmatmul.mubr.bf16.gmra.mrb[4].mxu1 %v911_v15 }
  0xfa   : > { %v842_v17 = vpop.f32.mrb[0].mxu0  ;;  %v850_v18 = vpop.f32.mrb[0].mxu1 }
  0xfb   : > { %v438_v19 = vadd.f32 %v842_v17, %v710_v16  ;;  %v470_v20 = vadd.f32 %v850_v18, %v710_v16  ;;  %v429_v21 = vpop.f32.mrb[1].mxu0  ;;  %v461_v22 = vpop.f32.mrb[1].mxu1 }
  0xfc   : > { %v430_v23 = vadd.f32 %v710_v16, %v429_v21  ;;  %v462_v24 = vadd.f32 %v710_v16, %v461_v22  ;;  %v843_v25 = vpop.f32.mrb[2].mxu0  ;;  %v851_v26 = vpop.f32.mrb[2].mxu1 }
  0xfd   : > { %v441_v27 = vadd.f32 %v843_v25, %v710_v16  ;;  %v473_v28 = vadd.f32 %v851_v26, %v710_v16  ;;  %v432_v29 = vpop.f32.mrb[3].mxu0  ;;  %v464_v30 = vpop.f32.mrb[3].mxu1  ;;  %v494_v33 = vmax.f32 %v438_v19, 0.0  ;;  %v502_v34 = vmax.f32 %v470_v20, 0.0 }
  0xfe   : > { %v433_v31 = vadd.f32 %v710_v16, %v432_v29  ;;  %v465_v32 = vadd.f32 %v710_v16, %v464_v30  ;;  %v492_v37 = vmax.f32 %v430_v23, 0.0  ;;  %v500_v38 = vmax.f32 %v462_v24, 0.0 }
  0xff   : > { %v495_v35 = vmax.f32 %v441_v27, 0.0  ;;  %v503_v36 = vmax.f32 %v473_v28, 0.0 }
 0x100   : > { %v493_v39 = vmax.f32 %v433_v31, 0.0  ;;  %v501_v40 = vmax.f32 %v465_v32, 0.0 }
 0x101   : > { %v769_v41 = vpack.c.bf16 %v495_v35, %v494_v33  ;;  %v789_v42 = vpack.c.bf16 %v503_v36, %v502_v34 }
 0x102   : > { %v764_v43 = vpack.c.bf16 %v493_v39, %v492_v37  ;;  %v784_v44 = vpack.c.bf16 %v501_v40, %v500_v38  ;;  %v846_v45 = vpop.f32.mrb[4].mxu0  ;;  %v854_v46 = vpop.f32.mrb[4].mxu1 }
 0x103   : > { %801 = vst [vmem:[%s1024_s17 + $0x8] sm:$0xff] %v769_v41   ;;  %805 = vst [vmem:[%s1024_s17 + $0x28] sm:$0xff] %v789_v42   ;;  %v454_v47 = vadd.f32 %v846_v45, %v710_v16  ;;  %v486_v48 = vadd.f32 %v854_v46, %v710_v16  ;;  %v445_v49 = vpop.f32.mrb[5].mxu0  ;;  %v477_v50 = vpop.f32.mrb[5].mxu1 }
 0x104   : > { %765 = vst [vmem:[%s1024_s17] sm:$0xff] %v764_v43   ;;  %804 = vst [vmem:[%s1024_s17 + $0x20] sm:$0xff] %v784_v44   ;;  %v446_v51 = vadd.f32 %v710_v16, %v445_v49  ;;  %v478_v52 = vadd.f32 %v710_v16, %v477_v50  ;;  %v847_v53 = vpop.f32.mrb[6].mxu0  ;;  %v855_v54 = vpop.f32.mrb[6].mxu1 }
 0x105   : > { %v457_v55 = vadd.f32 %v847_v53, %v710_v16  ;;  %v489_v56 = vadd.f32 %v855_v54, %v710_v16  ;;  %v448_v57 = vpop.f32.mrb[7].mxu0  ;;  %v480_v58 = vpop.f32.mrb[7].mxu1  ;;  %v498_v61 = vmax.f32 %v454_v47, 0.0  ;;  %v506_v62 = vmax.f32 %v486_v48, 0.0 }
 0x106   : > { %v449_v59 = vadd.f32 %v710_v16, %v448_v57  ;;  %v481_v60 = vadd.f32 %v710_v16, %v480_v58  ;;  %v496_v1 = vmax.f32 %v446_v51, 0.0  ;;  %v504_v2 = vmax.f32 %v478_v52, 0.0 }
 0x107   : > { %v499_v63 = vmax.f32 %v457_v55, 0.0  ;;  %v507_v0 = vmax.f32 %v489_v56, 0.0 }
 0x108   : > { %v497_v3 = vmax.f32 %v449_v59, 0.0  ;;  %v505_v4 = vmax.f32 %v481_v60, 0.0 }
 0x109   : > { %v779_v5 = vpack.c.bf16 %v499_v63, %v498_v61  ;;  %v799_v6 = vpack.c.bf16 %v507_v0, %v506_v62 }
 0x10a   : > { %v774_v7 = vpack.c.bf16 %v497_v3, %v496_v1  ;;  %v794_v8 = vpack.c.bf16 %v505_v4, %v504_v2 }
 0x10b   : > { %803 = vst [vmem:[%s1024_s17 + $0x18] sm:$0xff] %v779_v5   ;;  %807 = vst [vmem:[%s1024_s17 + $0x38] sm:$0xff] %v799_v6  }
 0x10c   : > { %802 = vst [vmem:[%s1024_s17 + $0x10] sm:$0xff] %v774_v7   ;;  %806 = vst [vmem:[%s1024_s17 + $0x30] sm:$0xff] %v794_v8  }
 0x10d PF: > { %s13_s14 = sadd.s32 1, %s934_s14   ;;  %s1047_s12 = smov %s930_s13 }
 0x10e   : > { %p10_p5 = scmp.ge.s32.totalorder %s13_s14, 6   ;;  %s1048_s13 = smov %s1050_s15 }
 0x110   :  { %12 = sbr.rel (!%p10_p5) target bundleno = 2 (0x2), region = 68 }

// kernel: _lambda_.11
= control target key start
LH: loop header
LB: loop body
LE: loop exit
PB: predicated region body
PF: predicated region fallthrough
CT: control target
= control target key end

     0   :  { %s2926_s1 = inlined_call_operand.vmem [shape: bf16[1152,128], index: 1, kind: input, shape index: {}]   ;;  %s2927_s0 = inlined_call_operand.vmem [shape: bf16[128,1152], index: 0, kind: input, shape index: {}]   ;;  %s2928_s2 = inlined_call_operand.vmem [shape: f32[1,128], index: 2, kind: input, shape index: {}]   ;;  %s2929_s3 = inlined_call_operand.vmem [shape: bf16[128,128], index: 3, kind: output, shape index: {}]  }
   0x1   :  { %v2175_v0 = vld [vmem:[%s2926_s1 + $0x40] sm:$0xff]   ;;  %v2179_v4 = vld [vmem:[%s2926_s1 + $0x48] sm:$0xff]   ;;  %v2183_v8 = vld [vmem:[%s2926_s1 + $0x50] sm:$0xff]  }
   0x2   :  { %v2176_v1 = vld [vmem:[%s2926_s1 + $0xc0] sm:$0xff]   ;;  %1855 = vmatprep.subr.bf16.mxu0 %v2175_v0  ;;  %v2180_v5 = vld [vmem:[%s2926_s1 + $0xc8] sm:$0xff]   ;;  %v2184_v9 = vld [vmem:[%s2926_s1 + $0xd0] sm:$0xff]  }
   0x3   :  { %v2177_v2 = vld [vmem:[%s2926_s1] sm:$0xff]   ;;  %1919 = vmatprep.subr.bf16.mxu1 %v2176_v1  ;;  %v2181_v6 = vld [vmem:[%s2926_s1 + $0x8] sm:$0xff]   ;;  %v2185_v10 = vld [vmem:[%s2926_s1 + $0x10] sm:$0xff]  }
   0x4   :  { %v2178_v3 = vld [vmem:[%s2926_s1 + $0x80] sm:$0xff]   ;;  %1856 = vmatpush3.bf16.msra.mxu0 %v2177_v2  ;;  %v2182_v7 = vld [vmem:[%s2926_s1 + $0x88] sm:$0xff]   ;;  %v2186_v11 = vld [vmem:[%s2926_s1 + $0x90] sm:$0xff]  }
   0x5   :  { %1920 = vmatpush3.bf16.msra.mxu1 %v2178_v3  ;;  %1857 = vmatprep.subr.bf16.mxu0 %v2179_v4  ;;  %v2187_v12 = vld [vmem:[%s2926_s1 + $0x58] sm:$0xff]   ;;  %v2191_v16 = vld [vmem:[%s2926_s1 + $0x60] sm:$0xff]   ;;  %v2195_v20 = vld [vmem:[%s2926_s1 + $0x68] sm:$0xff]  }
   0x6   :  { %1921 = vmatprep.subr.bf16.mxu1 %v2180_v5  ;;  %v2188_v13 = vld [vmem:[%s2926_s1 + $0xd8] sm:$0xff]   ;;  %v2192_v17 = vld [vmem:[%s2926_s1 + $0xe0] sm:$0xff]   ;;  %v2196_v21 = vld [vmem:[%s2926_s1 + $0xe8] sm:$0xff]  }
   0x7   :  { %v2189_v14 = vld [vmem:[%s2926_s1 + $0x18] sm:$0xff]   ;;  %v2193_v18 = vld [vmem:[%s2926_s1 + $0x20] sm:$0xff]   ;;  %v2197_v22 = vld [vmem:[%s2926_s1 + $0x28] sm:$0xff]  }
   0x8   :  { %1858 = vmatpush3.bf16.msra.mxu0 %v2181_v6  ;;  %v2190_v15 = vld [vmem:[%s2926_s1 + $0x98] sm:$0xff]   ;;  %v2194_v19 = vld [vmem:[%s2926_s1 + $0xa0] sm:$0xff]   ;;  %v2198_v23 = vld [vmem:[%s2926_s1 + $0xa8] sm:$0xff]  }
   0x9   :  { %1922 = vmatpush3.bf16.msra.mxu1 %v2182_v7  ;;  %1859 = vmatprep.subr.bf16.mxu0 %v2183_v8  ;;  %v2199_v24 = vld [vmem:[%s2926_s1 + $0x70] sm:$0xff]   ;;  %v2203_v28 = vld [vmem:[%s2926_s1 + $0x78] sm:$0xff]   ;;  %v2207_v32 = vld [vmem:[%s2927_s0] ss:$36 sps:$4 sm:$0xff]  }
   0xa   :  { %1923 = vmatprep.subr.bf16.mxu1 %v2184_v9  ;;  %v2200_v25 = vld [vmem:[%s2926_s1 + $0xf0] sm:$0xff]   ;;  %v2204_v29 = vld [vmem:[%s2926_s1 + $0xf8] sm:$0xff]   ;;  %v2209_v33 = vld [vmem:[%s2927_s0 + $0x4] ss:$36 sps:$4 sm:$0xff]  }
   0xb   :  { %v2201_v26 = vld [vmem:[%s2926_s1 + $0x30] sm:$0xff]   ;;  %v2205_v30 = vld [vmem:[%s2926_s1 + $0x38] sm:$0xff]   ;;  %v2210_v34 = vld [vmem:[%s2927_s0 + $0x8] ss:$36 sps:$4 sm:$0xff]   ;;  %1078 = vmatprep.mubr.bf16.mxu0 %v2209_v33 }
   0xc   :  { %1860 = vmatpush3.bf16.msra.mxu0 %v2185_v10  ;;  %v2202_v27 = vld [vmem:[%s2926_s1 + $0xb0] sm:$0xff]   ;;  %v2206_v31 = vld [vmem:[%s2926_s1 + $0xb8] sm:$0xff]   ;;  %v2213_v36 = vld [vmem:[%s2926_s1 + $0x140] sm:$0xff]  }
   0xd   :  { %1924 = vmatpush3.bf16.msra.mxu1 %v2186_v11  ;;  %1861 = vmatprep.subr.bf16.mxu0 %v2187_v12  ;;  %v2212_v35 = vld [vmem:[%s2927_s0 + $0xc] ss:$36 sps:$4 sm:$0xff]   ;;  %v2214_v37 = vld [vmem:[%s2926_s1 + $0x1c0] sm:$0xff]   ;;  %v2219_v41 = vld [vmem:[%s2927_s0 + $0x54] ss:$36 sps:$4 sm:$0xff]  }
   0xe   :  { %1925 = vmatprep.subr.bf16.mxu1 %v2188_v13  ;;  %1175 = vmatprep.mubr.bf16.mxu1 %v2212_v35  ;;  %v2215_v38 = vld [vmem:[%s2926_s1 + $0x100] sm:$0xff]   ;;  %v2217_v40 = vld [vmem:[%s2927_s0 + $0x4c] ss:$36 sps:$4 sm:$0xff]   ;;  %v2227_v48 = vld [vmem:[%s2927_s0 + $0x94] ss:$36 sps:$4 sm:$0xff]  }
   0xf   :  { %v2216_v39 = vld [vmem:[%s2926_s1 + $0x180] sm:$0xff]   ;;  %v2221_v42 = vld [vmem:[%s2927_s0 + $0x48] ss:$36 sps:$4 sm:$0xff]   ;;  %v2222_v43 = vld [vmem:[%s2927_s0 + $0x50] ss:$36 sps:$4 sm:$0xff]  }
  0x10   :  { %1862 = vmatpush3.bf16.msra.mxu0 %v2189_v14  ;;  %v2223_v44 = vld [vmem:[%s2926_s1 + $0x148] sm:$0xff]   ;;  %v2229_v49 = vld [vmem:[%s2927_s0 + $0x9c] ss:$36 sps:$4 sm:$0xff]   ;;  %v2231_v50 = vld [vmem:[%s2927_s0 + $0x90] ss:$36 sps:$4 sm:$0xff]  }
  0x11   :  { %1926 = vmatpush3.bf16.msra.mxu1 %v2190_v15  ;;  %1863 = vmatprep.subr.bf16.mxu0 %v2191_v16  ;;  %v2224_v45 = vld [vmem:[%s2926_s1 + $0x1c8] sm:$0xff]   ;;  %v2232_v51 = vld [vmem:[%s2927_s0 + $0x98] ss:$36 sps:$4 sm:$0xff]   ;;  %v2233_v52 = vld [vmem:[%s2926_s1 + $0x150] sm:$0xff]  }
  0x12   :  { %1927 = vmatprep.subr.bf16.mxu1 %v2192_v17  ;;  %v2225_v46 = vld [vmem:[%s2926_s1 + $0x108] sm:$0xff]   ;;  %v2234_v53 = vld [vmem:[%s2926_s1 + $0x1d0] sm:$0xff]   ;;  %v2237_v56 = vld [vmem:[%s2927_s0 + $0xdc] ss:$36 sps:$4 sm:$0xff]  }
  0x13   :  { %v2226_v47 = vld [vmem:[%s2926_s1 + $0x188] sm:$0xff]   ;;  %v2235_v54 = vld [vmem:[%s2926_s1 + $0x110] sm:$0xff]   ;;  %v2241_v58 = vld [vmem:[%s2927_s0 + $0xd8] ss:$36 sps:$4 sm:$0xff]  }
  0x14   :  { %1864 = vmatpush3.bf16.msra.mxu0 %v2193_v18  ;;  %v2236_v55 = vld [vmem:[%s2926_s1 + $0x190] sm:$0xff]   ;;  %v2239_v57 = vld [vmem:[%s2927_s0 + $0xe4] ss:$36 sps:$4 sm:$0xff]   ;;  %v2243_v60 = vld [vmem:[%s2926_s1 + $0x158] sm:$0xff]  }
  0x15   :  { %1928 = vmatpush3.bf16.msra.mxu1 %v2194_v19  ;;  %1865 = vmatprep.subr.bf16.mxu0 %v2195_v20  ;;  %v2242_v59 = vld [vmem:[%s2927_s0 + $0xe0] ss:$36 sps:$4 sm:$0xff]   ;;  %v2244_v61 = vld [vmem:[%s2926_s1 + $0x1d8] sm:$0xff]   ;;  %v2249_v1 = vld [vmem:[%s2927_s0 + $0x12c] ss:$36 sps:$4 sm:$0xff]  }
  0x16   :  { %1929 = vmatprep.subr.bf16.mxu1 %v2196_v21  ;;  %v2245_v62 = vld [vmem:[%s2926_s1 + $0x118] sm:$0xff]   ;;  %v2247_v0 = vld [vmem:[%s2927_s0 + $0x124] ss:$36 sps:$4 sm:$0xff]   ;;  %v2257_v8 = vld [vmem:[%s2927_s0 + $0x16c] ss:$36 sps:$4 sm:$0xff]  }
  0x17   :  { %v2246_v63 = vld [vmem:[%s2926_s1 + $0x198] sm:$0xff]   ;;  %v2251_v2 = vld [vmem:[%s2927_s0 + $0x120] ss:$36 sps:$4 sm:$0xff]   ;;  %v2252_v4 = vld [vmem:[%s2927_s0 + $0x128] ss:$36 sps:$4 sm:$0xff]  }
  0x18   :  { %1866 = vmatpush3.bf16.msra.mxu0 %v2197_v22  ;;  %v2253_v3 = vld [vmem:[%s2926_s1 + $0x160] sm:$0xff]   ;;  %v2259_v9 = vld [vmem:[%s2927_s0 + $0x174] ss:$36 sps:$4 sm:$0xff]   ;;  %v2263_v10 = vld [vmem:[%s2926_s1 + $0x168] sm:$0xff]  }
  0x19   :  { %1930 = vmatpush3.bf16.msra.mxu1 %v2198_v23  ;;  %1867 = vmatprep.subr.bf16.mxu0 %v2199_v24  ;;  %v2254_v5 = vld [vmem:[%s2926_s1 + $0x1e0] sm:$0xff]   ;;  %v2264_v11 = vld [vmem:[%s2926_s1 + $0x1e8] sm:$0xff]   ;;  %v2262_v15 = vld [vmem:[%s2927_s0 + $0x170] ss:$36 sps:$4 sm:$0xff]  }
  0x1a   :  { %1931 = vmatprep.subr.bf16.mxu1 %v2200_v25  ;;  %v2255_v6 = vld [vmem:[%s2926_s1 + $0x120] sm:$0xff]   ;;  %v2261_v12 = vld [vmem:[%s2927_s0 + $0x168] ss:$36 sps:$4 sm:$0xff]   ;;  %v2267_v16 = vld [vmem:[%s2927_s0 + $0x1b4] ss:$36 sps:$4 sm:$0xff]  }
  0x1b   :  { %v2256_v7 = vld [vmem:[%s2926_s1 + $0x1a0] sm:$0xff]   ;;  %v2265_v13 = vld [vmem:[%s2926_s1 + $0x128] sm:$0xff]   ;;  %v2273_v18 = vld [vmem:[%s2926_s1 + $0x170] sm:$0xff]  }
  0x1c   :  { %1868 = vmatpush3.bf16.msra.mxu0 %v2201_v26  ;;  %v2266_v14 = vld [vmem:[%s2926_s1 + $0x1a8] sm:$0xff]   ;;  %v2269_v17 = vld [vmem:[%s2927_s0 + $0x1bc] ss:$36 sps:$4 sm:$0xff]   ;;  %v2274_v19 = vld [vmem:[%s2926_s1 + $0x1f0] sm:$0xff]  }
  0x1d   :  { %1932 = vmatpush3.bf16.msra.mxu1 %v2202_v27  ;;  %1869 = vmatprep.subr.bf16.mxu0 %v2203_v28  ;;  %v2275_v20 = vld [vmem:[%s2926_s1 + $0x130] sm:$0xff]   ;;  %v2272_v23 = vld [vmem:[%s2927_s0 + $0x1b8] ss:$36 sps:$4 sm:$0xff]   ;;  %v2279_v25 = vld [vmem:[%s2927_s0 + $0x204] ss:$36 sps:$4 sm:$0xff]  }
  0x1e   :  { %1933 = vmatprep.subr.bf16.mxu1 %v2204_v29  ;;  %v2276_v21 = vld [vmem:[%s2926_s1 + $0x1b0] sm:$0xff]   ;;  %v2277_v24 = vld [vmem:[%s2927_s0 + $0x1fc] ss:$36 sps:$4 sm:$0xff]  }
  0x1f   :  { %v2271_v22 = vld [vmem:[%s2927_s0 + $0x1b0] ss:$36 sps:$4 sm:$0xff]   ;;  %v2283_v26 = vld [vmem:[%s2926_s1 + $0x178] sm:$0xff]  }
  0x20   :  { %1870 = vmatpush3.bf16.msra.mxu0 %v2205_v30  ;;  %v2284_v27 = vld [vmem:[%s2926_s1 + $0x1f8] sm:$0xff]   ;;  %v2287_v35 = vld [vmem:[%s2927_s0 + $0x10] ss:$36 sps:$4 sm:$0xff]  }
  0x21   :  { %1934 = vmatpush3.bf16.msra.mxu1 %v2206_v31  ;;  %1983 = vmatprep.subr.bf16.mxu0 %v2213_v36  ;;  %v2285_v28 = vld [vmem:[%s2926_s1 + $0x138] sm:$0xff]   ;;  %v2282_v31 = vld [vmem:[%s2927_s0 + $0x200] ss:$36 sps:$4 sm:$0xff]  }
  0x22   :  { %2047 = vmatprep.subr.bf16.mxu1 %v2214_v37  ;;  %v2286_v29 = vld [vmem:[%s2926_s1 + $0x1b8] sm:$0xff]  }
  0x23   :  { %1079 = vmatmul.mubr.bf16.vlgmr.msra.gmra.mrb[0].mxu0 %v2207_v32  ;;  %v2281_v30 = vld [vmem:[%s2927_s0 + $0x1f8] ss:$36 sps:$4 sm:$0xff]   ;;  %v2293_v32 = vld [vmem:[%s2926_s1 + $0x200] sm:$0xff]  }
  0x24   :  { %1176 = vmatmul.mubr.bf16.vlgmr.msra.gmra.mrb[0].mxu1 %v2210_v34  ;;  %1984 = vmatpush3.bf16.msra.mxu0 %v2215_v38  ;;  %v2289_v33 = vld [vmem:[%s2927_s0 + $0x14] ss:$36 sps:$4 sm:$0xff]   ;;  %v2292_v34 = vld [vmem:[%s2927_s0 + $0x1c] ss:$36 sps:$4 sm:$0xff]   ;;  %v2296_v38 = vld [vmem:[%s2927_s0 + $0x64] ss:$36 sps:$4 sm:$0xff]  }
  0x25   :  { %2048 = vmatpush3.bf16.msra.mxu1 %v2216_v39  ;;  %1086 = vmatprep.mubr.bf16.mxu0 %v2217_v40  ;;  %v2290_v36 = vld [vmem:[%s2927_s0 + $0x18] ss:$36 sps:$4 sm:$0xff]   ;;  %v2300_v39 = vld [vmem:[%s2926_s1 + $0x208] sm:$0xff]   ;;  %v2307_v40 = vld [vmem:[%s2926_s1 + $0x210] sm:$0xff]  }
  0x26   :  { %1183 = vmatprep.mubr.bf16.mxu1 %v2219_v41  ;;  %1985 = vmatprep.subr.bf16.mxu0 %v2223_v44  ;;  %v2294_v37 = vld [vmem:[%s2927_s0 + $0x5c] ss:$36 sps:$4 sm:$0xff]   ;;  %v2303_v44 = vld [vmem:[%s2927_s0 + $0xac] ss:$36 sps:$4 sm:$0xff]  }
  0x27   :  { %2049 = vmatprep.subr.bf16.mxu1 %v2224_v45  ;;  %v2298_v41 = vld [vmem:[%s2927_s0 + $0x58] ss:$36 sps:$4 sm:$0xff]  }
  0x28   :  { %1986 = vmatpush3.bf16.msra.mxu0 %v2225_v46  ;;  %v2314_v45 = vld [vmem:[%s2926_s1 + $0x218] sm:$0xff]   ;;  %v2321_v46 = vld [vmem:[%s2926_s1 + $0x220] sm:$0xff]  }
  0x29   :  { %2050 = vmatpush3.bf16.msra.mxu1 %v2226_v47  ;;  %1987 = vmatprep.subr.bf16.mxu0 %v2233_v52  ;;  %v2305_v47 = vld [vmem:[%s2927_s0 + $0xa0] ss:$36 sps:$4 sm:$0xff]   ;;  %v2312_v52 = vld [vmem:[%s2927_s0 + $0xe8] ss:$36 sps:$4 sm:$0xff]  }
  0x2a   :  { %2051 = vmatprep.subr.bf16.mxu1 %v2234_v53  ;;  %v2335_v53 = vld [vmem:[%s2926_s1 + $0x230] sm:$0xff]  }
  0x2b   :  { %1087 = vmatmul.mubr.bf16.gmra.mrb[4].mxu0 %v2221_v42  ;;  %v2299_v42 = vld [vmem:[%s2927_s0 + $0x60] ss:$36 sps:$4 sm:$0xff]  }
  0x2c   :  { %1184 = vmatmul.mubr.bf16.gmra.mrb[4].mxu1 %v2222_v43  ;;  %1094 = vmatprep.mubr.bf16.mxu0 %v2227_v48  ;;  %v2301_v43 = vld [vmem:[%s2927_s0 + $0xa4] ss:$36 sps:$4 sm:$0xff]  }
  0x2d   :  { %1191 = vmatprep.mubr.bf16.mxu1 %v2229_v49  ;;  %1988 = vmatpush3.bf16.msra.mxu0 %v2235_v54  ;;  %v2306_v48 = vld [vmem:[%s2927_s0 + $0xa8] ss:$36 sps:$4 sm:$0xff]   ;;  %v2313_v54 = vld [vmem:[%s2927_s0 + $0xf0] ss:$36 sps:$4 sm:$0xff]  }
  0x2e   :  { %2052 = vmatpush3.bf16.msra.mxu1 %v2236_v55  ;;  %1989 = vmatprep.subr.bf16.mxu0 %v2243_v60  ;;  %v2308_v49 = vld [vmem:[%s2927_s0 + $0xec] ss:$36 sps:$4 sm:$0xff]   ;;  %v2315_v55 = vld [vmem:[%s2927_s0 + $0x134] ss:$36 sps:$4 sm:$0xff]   ;;  %v2322_v60 = vld [vmem:[%s2927_s0 + $0x17c] ss:$36 sps:$4 sm:$0xff]  }
  0x2f   :  { %2053 = vmatprep.subr.bf16.mxu1 %v2244_v61  ;;  %v2324_v61 = vld [vmem:[%s2927_s0 + $0x184] ss:$36 sps:$4 sm:$0xff]  }
  0x31   :  { %1990 = vmatpush3.bf16.msra.mxu0 %v2245_v62  ;;  %v2326_v62 = vld [vmem:[%s2927_s0 + $0x178] ss:$36 sps:$4 sm:$0xff]  }
  0x32   :  { %2054 = vmatpush3.bf16.msra.mxu1 %v2246_v63  ;;  %1991 = vmatprep.subr.bf16.mxu0 %v2253_v3  ;;  %v2327_v63 = vld [vmem:[%s2927_s0 + $0x180] ss:$36 sps:$4 sm:$0xff]   ;;  %v2334_v3 = vld [vmem:[%s2927_s0 + $0x1c8] ss:$36 sps:$4 sm:$0xff]  }
  0x33   :  { %1095 = vmatmul.mubr.bf16.gmra.mrb[8].mxu0 %v2231_v50  ;;  %2055 = vmatprep.subr.bf16.mxu1 %v2254_v5  ;;  %v2310_v50 = vld [vmem:[%s2927_s0 + $0xf4] ss:$36 sps:$4 sm:$0xff]  }
  0x34   :  { %1192 = vmatmul.mubr.bf16.gmra.mrb[8].mxu1 %v2232_v51  ;;  %1102 = vmatprep.mubr.bf16.mxu0 %v2237_v56  ;;  %v2328_v51 = vld [vmem:[%s2926_s1 + $0x228] sm:$0xff]   ;;  %v2317_v56 = vld [vmem:[%s2927_s0 + $0x13c] ss:$36 sps:$4 sm:$0xff]   ;;  %v2338_v5 = vld [vmem:[%s2927_s0 + $0x214] ss:$36 sps:$4 sm:$0xff]  }
  0x35   :  { %1199 = vmatprep.mubr.bf16.mxu1 %v2239_v57  ;;  %1992 = vmatpush3.bf16.msra.mxu0 %v2255_v6  ;;  %v2342_v57 = vld [vmem:[%s2926_s1 + $0x238] sm:$0xff]   ;;  %v2340_v6 = vld [vmem:[%s2927_s0 + $0x208] ss:$36 sps:$4 sm:$0xff]  }
  0x36   :  { %2056 = vmatpush3.bf16.msra.mxu1 %v2256_v7  ;;  %1993 = vmatprep.subr.bf16.mxu0 %v2263_v10  ;;  %v2341_v7 = vld [vmem:[%s2927_s0 + $0x210] ss:$36 sps:$4 sm:$0xff]   ;;  %v2345_v10 = vld [vmem:[%s2927_s0 + $0x68] ss:$36 sps:$4 sm:$0xff]  }
  0x37   :  { %2057 = vmatprep.subr.bf16.mxu1 %v2264_v11  ;;  %v2346_v11 = vld [vmem:[%s2927_s0 + $0x188] ss:$36 sps:$4 sm:$0xff]  }
  0x39   :  { %1994 = vmatpush3.bf16.msra.mxu0 %v2265_v13  ;;  %v2348_v13 = vld [vmem:[%s2927_s0 + $0x1d0] ss:$36 sps:$4 sm:$0xff]  }
  0x3a   :  { %2058 = vmatpush3.bf16.msra.mxu1 %v2266_v14  ;;  %1995 = vmatprep.subr.bf16.mxu0 %v2273_v18  ;;  %v2349_v14 = vld [vmem:[%s2927_s0 + $0xf8] ss:$36 sps:$4 sm:$0xff]   ;;  %v2806_v18 = vld [vmem:[%s2928_s2] ss:$0 sm:$0xff] }
  0x3b   :  { %1103 = vmatmul.mubr.bf16.gmra.mrb[12].mxu0 %v2241_v58  ;;  %2059 = vmatprep.subr.bf16.mxu1 %v2274_v19  ;;  %v2319_v58 = vld [vmem:[%s2927_s0 + $0x130] ss:$36 sps:$4 sm:$0xff]  }
  0x3c   :  { %1200 = vmatmul.mubr.bf16.gmra.mrb[12].mxu1 %v2242_v59  ;;  %1110 = vmatprep.mubr.bf16.mxu0 %v2247_v0  ;;  %v2320_v59 = vld [vmem:[%s2927_s0 + $0x138] ss:$36 sps:$4 sm:$0xff]   ;;  %v2329_v0 = vld [vmem:[%s2927_s0 + $0x1c4] ss:$36 sps:$4 sm:$0xff]  }
  0x3d   :  { %1207 = vmatprep.mubr.bf16.mxu1 %v2249_v1  ;;  %1996 = vmatpush3.bf16.msra.mxu0 %v2275_v20  ;;  %v2331_v1 = vld [vmem:[%s2927_s0 + $0x1cc] ss:$36 sps:$4 sm:$0xff]  }
  0x3e   :  { %2060 = vmatpush3.bf16.msra.mxu1 %v2276_v21  ;;  %1997 = vmatprep.subr.bf16.mxu0 %v2283_v26 }
  0x3f   :  { %2061 = vmatprep.subr.bf16.mxu1 %v2284_v27 }
  0x41   :  { %1998 = vmatpush3.bf16.msra.mxu0 %v2285_v28 }
  0x42   :  { %2062 = vmatpush3.bf16.msra.mxu1 %v2286_v29  ;;  %2127 = vmatprep.subr.bf16.mxu0 %v2293_v32 }
  0x43   :  { %1111 = vmatmul.mubr.bf16.gmra.mrb[16].mxu0 %v2251_v2  ;;  %2159 = vmatprep.subr.bf16.mxu1 %v2293_v32  ;;  %v2333_v2 = vld [vmem:[%s2927_s0 + $0x1c0] ss:$36 sps:$4 sm:$0xff]  }
  0x44   :  { %1208 = vmatmul.mubr.bf16.gmra.mrb[16].mxu1 %v2252_v4  ;;  %1118 = vmatprep.mubr.bf16.mxu0 %v2257_v8  ;;  %v2336_v4 = vld [vmem:[%s2927_s0 + $0x20c] ss:$36 sps:$4 sm:$0xff]   ;;  %v2343_v8 = vld [vmem:[%s2927_s0 + $0x20] ss:$36 sps:$4 sm:$0xff]  }
  0x45   :  { %1215 = vmatprep.mubr.bf16.mxu1 %v2259_v9  ;;  %v2344_v9 = vld [vmem:[%s2927_s0 + $0x140] ss:$36 sps:$4 sm:$0xff]  }
  0x4b   :  { %1119 = vmatmul.mubr.bf16.gmra.mrb[20].mxu0 %v2261_v12  ;;  %v2347_v12 = vld [vmem:[%s2927_s0 + $0xb0] ss:$36 sps:$4 sm:$0xff]  }
  0x4c   :  { %1216 = vmatmul.mubr.bf16.gmra.mrb[20].mxu1 %v2262_v15  ;;  %1126 = vmatprep.mubr.bf16.mxu0 %v2267_v16  ;;  %v2350_v15 = vld [vmem:[%s2927_s0 + $0x218] ss:$36 sps:$4 sm:$0xff]  }
  0x4d   :  { %1223 = vmatprep.mubr.bf16.mxu1 %v2269_v17 }
  0x53   :  { %1127 = vmatmul.mubr.bf16.gmra.mrb[24].mxu0 %v2271_v22 }
  0x54   :  { %1224 = vmatmul.mubr.bf16.gmra.mrb[24].mxu1 %v2272_v23  ;;  %1134 = vmatprep.mubr.bf16.mxu0 %v2277_v24 }
  0x55   :  { %1231 = vmatprep.mubr.bf16.mxu1 %v2279_v25 }
  0x5b   :  { %1135 = vmatmul.mubr.bf16.gmra.mrb[28].mxu0 %v2281_v30 }
  0x5c   :  { %1232 = vmatmul.mubr.bf16.gmra.mrb[28].mxu1 %v2282_v31  ;;  %1272 = vmatprep.mubr.bf16.mxu0 %v2289_v33 }
  0x5d   :  { %1369 = vmatprep.mubr.bf16.mxu1 %v2292_v34 }
  0x63   :  { %1273 = vmatmul.mubr.bf16.vlgmr.msra.gmra.mrb[32].mxu0 %v2287_v35 }
  0x64   :  { %1370 = vmatmul.mubr.bf16.vlgmr.msra.gmra.mrb[32].mxu1 %v2290_v36  ;;  %2128 = vmatpush3.bf16.msra.mxu0 %v2293_v32 }
  0x65   :  { %2167 = vmatpush3.bf16.msra.mxu1 %v2293_v32  ;;  %1280 = vmatprep.mubr.bf16.mxu0 %v2294_v37 }
  0x66   :  { %1377 = vmatprep.mubr.bf16.mxu1 %v2296_v38  ;;  %2129 = vmatprep.subr.bf16.mxu0 %v2300_v39 }
  0x67   :  { %2160 = vmatprep.subr.bf16.mxu1 %v2300_v39 }
  0x68   :  { %2130 = vmatpush3.bf16.msra.mxu0 %v2300_v39 }
  0x69   :  { %2168 = vmatpush3.bf16.msra.mxu1 %v2300_v39  ;;  %2131 = vmatprep.subr.bf16.mxu0 %v2307_v40 }
  0x6a   :  { %2161 = vmatprep.subr.bf16.mxu1 %v2307_v40 }
  0x6b   :  { %1281 = vmatmul.mubr.bf16.gmra.mrb[36].mxu0 %v2298_v41 }
  0x6c   :  { %1378 = vmatmul.mubr.bf16.gmra.mrb[36].mxu1 %v2299_v42  ;;  %1288 = vmatprep.mubr.bf16.mxu0 %v2301_v43 }
  0x6d   :  { %1385 = vmatprep.mubr.bf16.mxu1 %v2303_v44  ;;  %2132 = vmatpush3.bf16.msra.mxu0 %v2307_v40 }
  0x6e   :  { %2169 = vmatpush3.bf16.msra.mxu1 %v2307_v40  ;;  %2133 = vmatprep.subr.bf16.mxu0 %v2314_v45 }
  0x6f   :  { %2162 = vmatprep.subr.bf16.mxu1 %v2314_v45 }
  0x71   :  { %2134 = vmatpush3.bf16.msra.mxu0 %v2314_v45 }
  0x72   :  { %2170 = vmatpush3.bf16.msra.mxu1 %v2314_v45  ;;  %2135 = vmatprep.subr.bf16.mxu0 %v2321_v46 }
  0x73   :  { %1289 = vmatmul.mubr.bf16.gmra.mrb[40].mxu0 %v2305_v47  ;;  %2163 = vmatprep.subr.bf16.mxu1 %v2321_v46 }
  0x74   :  { %1386 = vmatmul.mubr.bf16.gmra.mrb[40].mxu1 %v2306_v48  ;;  %1296 = vmatprep.mubr.bf16.mxu0 %v2308_v49 }
  0x75   :  { %1393 = vmatprep.mubr.bf16.mxu1 %v2310_v50  ;;  %2136 = vmatpush3.bf16.msra.mxu0 %v2321_v46 }
  0x76   :  { %2171 = vmatpush3.bf16.msra.mxu1 %v2321_v46  ;;  %2137 = vmatprep.subr.bf16.mxu0 %v2328_v51 }
  0x77   :  { %2164 = vmatprep.subr.bf16.mxu1 %v2328_v51 }
  0x79   :  { %2138 = vmatpush3.bf16.msra.mxu0 %v2328_v51 }
  0x7a   :  { %2172 = vmatpush3.bf16.msra.mxu1 %v2328_v51  ;;  %2139 = vmatprep.subr.bf16.mxu0 %v2335_v53 }
  0x7b   :  { %1297 = vmatmul.mubr.bf16.gmra.mrb[44].mxu0 %v2312_v52  ;;  %2165 = vmatprep.subr.bf16.mxu1 %v2335_v53 }
  0x7c   :  { %1394 = vmatmul.mubr.bf16.gmra.mrb[44].mxu1 %v2313_v54  ;;  %1304 = vmatprep.mubr.bf16.mxu0 %v2315_v55 }
  0x7d   :  { %1401 = vmatprep.mubr.bf16.mxu1 %v2317_v56  ;;  %2140 = vmatpush3.bf16.msra.mxu0 %v2335_v53 }
  0x7e   :  { %2173 = vmatpush3.bf16.msra.mxu1 %v2335_v53  ;;  %2141 = vmatprep.subr.bf16.mxu0 %v2342_v57 }
  0x7f   :  { %2166 = vmatprep.subr.bf16.mxu1 %v2342_v57 }
  0x81   :  { %2142 = vmatpush3.bf16.msra.mxu0 %v2342_v57 }
  0x82   :  { %2174 = vmatpush3.bf16.msra.mxu1 %v2342_v57 }
  0x83   :  { %1305 = vmatmul.mubr.bf16.gmra.mrb[48].mxu0 %v2319_v58 }
  0x84   :  { %1402 = vmatmul.mubr.bf16.gmra.mrb[48].mxu1 %v2320_v59  ;;  %1312 = vmatprep.mubr.bf16.mxu0 %v2322_v60 }
  0x85   :  { %1409 = vmatprep.mubr.bf16.mxu1 %v2324_v61 }
  0x8b   :  { %1313 = vmatmul.mubr.bf16.gmra.mrb[52].mxu0 %v2326_v62 }
  0x8c   :  { %1410 = vmatmul.mubr.bf16.gmra.mrb[52].mxu1 %v2327_v63  ;;  %1320 = vmatprep.mubr.bf16.mxu0 %v2329_v0 }
  0x8d   :  { %1417 = vmatprep.mubr.bf16.mxu1 %v2331_v1 }
  0x93   :  { %1321 = vmatmul.mubr.bf16.gmra.mrb[56].mxu0 %v2333_v2 }
  0x94   :  { %1418 = vmatmul.mubr.bf16.gmra.mrb[56].mxu1 %v2334_v3  ;;  %1328 = vmatprep.mubr.bf16.mxu0 %v2336_v4 }
  0x95   :  { %1425 = vmatprep.mubr.bf16.mxu1 %v2338_v5 }
  0x9b   :  { %1329 = vmatmul.mubr.bf16.gmra.mrb[60].mxu0 %v2340_v6 }
  0x9c   :  { %1426 = vmatmul.mubr.bf16.gmra.mrb[60].mxu1 %v2341_v7  ;;  %2143 = vmatprep.mubr.bf16.mxu0 %v2343_v8 }
  0x9d   :  { %2151 = vmatprep.mubr.bf16.mxu1 %v2344_v9 }
  0xa3   :  { %2144 = vmatmul.mubr.bf16.vlgmr.msra.gmra.mrb[64].mxu0 %v2345_v10 }
  0xa4   :  { %2152 = vmatmul.mubr.bf16.vlgmr.msra.gmra.mrb[64].mxu1 %v2346_v11  ;;  %2147 = vmatprep.mubr.bf16.mxu0 %v2347_v12 }
  0xa5   :  { %2155 = vmatprep.mubr.bf16.mxu1 %v2348_v13 }
  0xab   :  { %2148 = vmatmul.mubr.bf16.gmra.mrb[68].mxu0 %v2349_v14 }
  0xac   :  { %2156 = vmatmul.mubr.bf16.gmra.mrb[68].mxu1 %v2350_v15 }
  0xf6   :  { %v1871_v16 = vpop.f32.mrb[0].mxu0 }
  0xf7   :  { %v1935_v17 = vpop.f32.mrb[0].mxu1  ;;  %v1872_v19 = vpop.f32.mrb[1].mxu0 }
  0xf8   :  { %v1873_v20 = vadd.f32 %v1872_v19, %v1871_v16  ;;  %v1936_v21 = vpop.f32.mrb[1].mxu1  ;;  %v1874_v22 = vpop.f32.mrb[2].mxu0 }
  0xf9   :  { %v1937_v23 = vadd.f32 %v1936_v21, %v1935_v17  ;;  %v1938_v24 = vpop.f32.mrb[2].mxu1  ;;  %v1875_v25 = vpop.f32.mrb[3].mxu0 }
  0xfa   :  { %v1081_v26 = vadd.f32 %v1873_v20, %v2806_v18  ;;  %v1876_v27 = vadd.f32 %v1875_v25, %v1874_v22  ;;  %v1939_v28 = vpop.f32.mrb[3].mxu1 }
  0xfb   :  { %v1940_v29 = vadd.f32 %v1939_v28, %v1938_v24 }
  0xfc   :  { %v2809_v30 = vadd.f32 %v1937_v23, %v1081_v26  ;;  %v1084_v31 = vadd.f32 %v1876_v27, %v2806_v18 }
  0xfe   :  { %v2812_v32 = vadd.f32 %v1940_v29, %v1084_v31  ;;  %v1877_v33 = vpop.f32.mrb[4].mxu0 }
  0xff   :  { %v1941_v34 = vpop.f32.mrb[4].mxu1  ;;  %v1878_v35 = vpop.f32.mrb[5].mxu0 }
 0x100   :  { %v1879_v36 = vadd.f32 %v1878_v35, %v1877_v33  ;;  %v1942_v37 = vpop.f32.mrb[5].mxu1  ;;  %v1880_v38 = vpop.f32.mrb[6].mxu0 }
 0x101   :  { %v1943_v39 = vadd.f32 %v1942_v37, %v1941_v34  ;;  %v1944_v40 = vpop.f32.mrb[6].mxu1  ;;  %v1881_v41 = vpop.f32.mrb[7].mxu0 }
 0x102   :  { %v1089_v42 = vadd.f32 %v1879_v36, %v2806_v18  ;;  %v1882_v43 = vadd.f32 %v1881_v41, %v1880_v38  ;;  %v1945_v44 = vpop.f32.mrb[7].mxu1 }
 0x103   :  { %v1946_v45 = vadd.f32 %v1945_v44, %v1944_v40 }
 0x104   :  { %v2815_v46 = vadd.f32 %v1943_v39, %v1089_v42  ;;  %v1092_v47 = vadd.f32 %v1882_v43, %v2806_v18 }
 0x106   :  { %v2818_v48 = vadd.f32 %v1946_v45, %v1092_v47  ;;  %v1883_v49 = vpop.f32.mrb[8].mxu0 }
 0x107   :  { %v1947_v50 = vpop.f32.mrb[8].mxu1  ;;  %v1884_v51 = vpop.f32.mrb[9].mxu0 }
 0x108   :  { %v1885_v52 = vadd.f32 %v1884_v51, %v1883_v49  ;;  %v1948_v53 = vpop.f32.mrb[9].mxu1  ;;  %v1886_v54 = vpop.f32.mrb[10].mxu0 }
 0x109   :  { %v1949_v55 = vadd.f32 %v1948_v53, %v1947_v50  ;;  %v1950_v56 = vpop.f32.mrb[10].mxu1  ;;  %v1887_v57 = vpop.f32.mrb[11].mxu0 }
 0x10a   :  { %v1097_v58 = vadd.f32 %v1885_v52, %v2806_v18  ;;  %v1888_v59 = vadd.f32 %v1887_v57, %v1886_v54  ;;  %v1951_v60 = vpop.f32.mrb[11].mxu1 }
 0x10b   :  { %v1952_v61 = vadd.f32 %v1951_v60, %v1950_v56 }
 0x10c   :  { %v2821_v62 = vadd.f32 %v1949_v55, %v1097_v58  ;;  %v1100_v63 = vadd.f32 %v1888_v59, %v2806_v18 }
 0x10e   :  { %v2824_v0 = vadd.f32 %v1952_v61, %v1100_v63  ;;  %v1889_v1 = vpop.f32.mrb[12].mxu0 }
 0x10f   :  { %v1953_v2 = vpop.f32.mrb[12].mxu1  ;;  %v1890_v3 = vpop.f32.mrb[13].mxu0 }
 0x110   :  { %v1891_v4 = vadd.f32 %v1890_v3, %v1889_v1  ;;  %v1954_v5 = vpop.f32.mrb[13].mxu1  ;;  %v1892_v6 = vpop.f32.mrb[14].mxu0 }
 0x111   :  { %v1955_v7 = vadd.f32 %v1954_v5, %v1953_v2  ;;  %v1956_v8 = vpop.f32.mrb[14].mxu1  ;;  %v1893_v9 = vpop.f32.mrb[15].mxu0 }
 0x112   :  { %v1105_v10 = vadd.f32 %v1891_v4, %v2806_v18  ;;  %v1894_v11 = vadd.f32 %v1893_v9, %v1892_v6  ;;  %v1957_v12 = vpop.f32.mrb[15].mxu1 }
 0x113   :  { %v1958_v13 = vadd.f32 %v1957_v12, %v1956_v8 }
 0x114   :  { %v2827_v14 = vadd.f32 %v1955_v7, %v1105_v10  ;;  %v1108_v15 = vadd.f32 %v1894_v11, %v2806_v18 }
 0x116   :  { %v2830_v16 = vadd.f32 %v1958_v13, %v1108_v15  ;;  %v1895_v17 = vpop.f32.mrb[16].mxu0 }
 0x117   :  { %v1959_v19 = vpop.f32.mrb[16].mxu1  ;;  %v1896_v20 = vpop.f32.mrb[17].mxu0 }
 0x118   :  { %v1897_v21 = vadd.f32 %v1896_v20, %v1895_v17  ;;  %v1960_v22 = vpop.f32.mrb[17].mxu1  ;;  %v1898_v23 = vpop.f32.mrb[18].mxu0 }
 0x119   :  { %v1961_v24 = vadd.f32 %v1960_v22, %v1959_v19  ;;  %v1962_v25 = vpop.f32.mrb[18].mxu1  ;;  %v1899_v26 = vpop.f32.mrb[19].mxu0 }
 0x11a   :  { %v1113_v27 = vadd.f32 %v1897_v21, %v2806_v18  ;;  %v1900_v28 = vadd.f32 %v1899_v26, %v1898_v23  ;;  %v1963_v29 = vpop.f32.mrb[19].mxu1 }
 0x11b   :  { %v1964_v31 = vadd.f32 %v1963_v29, %v1962_v25 }
 0x11c   :  { %v2833_v33 = vadd.f32 %v1961_v24, %v1113_v27  ;;  %v1116_v34 = vadd.f32 %v1900_v28, %v2806_v18 }
 0x11e   :  { %v2836_v35 = vadd.f32 %v1964_v31, %v1116_v34  ;;  %v1901_v36 = vpop.f32.mrb[20].mxu0 }
 0x11f   :  { %v1965_v37 = vpop.f32.mrb[20].mxu1  ;;  %v1902_v38 = vpop.f32.mrb[21].mxu0 }
 0x120   :  { %v1903_v39 = vadd.f32 %v1902_v38, %v1901_v36  ;;  %v1966_v40 = vpop.f32.mrb[21].mxu1  ;;  %v1904_v41 = vpop.f32.mrb[22].mxu0 }
 0x121   :  { %v1967_v42 = vadd.f32 %v1966_v40, %v1965_v37  ;;  %v1968_v43 = vpop.f32.mrb[22].mxu1  ;;  %v1905_v44 = vpop.f32.mrb[23].mxu0 }
 0x122   :  { %v1121_v45 = vadd.f32 %v1903_v39, %v2806_v18  ;;  %v1906_v47 = vadd.f32 %v1905_v44, %v1904_v41  ;;  %v1969_v49 = vpop.f32.mrb[23].mxu1 }
 0x123   :  { %v1970_v50 = vadd.f32 %v1969_v49, %v1968_v43 }
 0x124   :  { %v2839_v51 = vadd.f32 %v1967_v42, %v1121_v45  ;;  %v1124_v52 = vadd.f32 %v1906_v47, %v2806_v18 }
 0x126   :  { %v2842_v53 = vadd.f32 %v1970_v50, %v1124_v52  ;;  %v1907_v54 = vpop.f32.mrb[24].mxu0 }
 0x127   :  { %v1971_v55 = vpop.f32.mrb[24].mxu1  ;;  %v1908_v56 = vpop.f32.mrb[25].mxu0 }
 0x128   :  { %v1909_v57 = vadd.f32 %v1908_v56, %v1907_v54  ;;  %v1972_v58 = vpop.f32.mrb[25].mxu1  ;;  %v1910_v59 = vpop.f32.mrb[26].mxu0 }
 0x129   :  { %v1973_v60 = vadd.f32 %v1972_v58, %v1971_v55  ;;  %v1974_v61 = vpop.f32.mrb[26].mxu1  ;;  %v1911_v63 = vpop.f32.mrb[27].mxu0 }
 0x12a   :  { %v1129_v1 = vadd.f32 %v1909_v57, %v2806_v18  ;;  %v1912_v2 = vadd.f32 %v1911_v63, %v1910_v59  ;;  %v1975_v3 = vpop.f32.mrb[27].mxu1 }
 0x12b   :  { %v1976_v4 = vadd.f32 %v1975_v3, %v1974_v61 }
 0x12c   :  { %v2845_v5 = vadd.f32 %v1973_v60, %v1129_v1  ;;  %v1132_v6 = vadd.f32 %v1912_v2, %v2806_v18 }
 0x12e   :  { %v2848_v7 = vadd.f32 %v1976_v4, %v1132_v6  ;;  %v1913_v8 = vpop.f32.mrb[28].mxu0 }
 0x12f   :  { %v1977_v9 = vpop.f32.mrb[28].mxu1  ;;  %v1914_v10 = vpop.f32.mrb[29].mxu0 }
 0x130   :  { %v1915_v11 = vadd.f32 %v1914_v10, %v1913_v8  ;;  %v1978_v12 = vpop.f32.mrb[29].mxu1  ;;  %v1916_v13 = vpop.f32.mrb[30].mxu0 }
 0x131   :  { %v1979_v15 = vadd.f32 %v1978_v12, %v1977_v9  ;;  %v1980_v17 = vpop.f32.mrb[30].mxu1  ;;  %v1917_v19 = vpop.f32.mrb[31].mxu0 }
 0x132   :  { %v1137_v20 = vadd.f32 %v1915_v11, %v2806_v18  ;;  %v1918_v21 = vadd.f32 %v1917_v19, %v1916_v13  ;;  %v1981_v22 = vpop.f32.mrb[31].mxu1 }
 0x133   :  { %v1982_v23 = vadd.f32 %v1981_v22, %v1980_v17 }
 0x134   :  { %v2851_v24 = vadd.f32 %v1979_v15, %v1137_v20  ;;  %v1140_v25 = vadd.f32 %v1918_v21, %v2806_v18 }
 0x136   :  { %v2854_v26 = vadd.f32 %v1982_v23, %v1140_v25  ;;  %v1999_v27 = vpop.f32.mrb[32].mxu0 }
 0x137   :  { %v2063_v28 = vpop.f32.mrb[32].mxu1  ;;  %v2000_v29 = vpop.f32.mrb[33].mxu0 }
 0x138   :  { %v2001_v31 = vadd.f32 %v2000_v29, %v1999_v27  ;;  %v2064_v34 = vpop.f32.mrb[33].mxu1  ;;  %v2002_v36 = vpop.f32.mrb[34].mxu0 }
 0x139   :  { %v2065_v37 = vadd.f32 %v2064_v34, %v2063_v28  ;;  %v2066_v38 = vpop.f32.mrb[34].mxu1  ;;  %v2003_v39 = vpop.f32.mrb[35].mxu0 }
 0x13a   :  { %v1275_v40 = vadd.f32 %v2001_v31, %v2809_v30  ;;  %v2004_v41 = vadd.f32 %v2003_v39, %v2002_v36  ;;  %v2067_v42 = vpop.f32.mrb[35].mxu1 }
 0x13b   :  { %v2068_v43 = vadd.f32 %v2067_v42, %v2066_v38 }
 0x13c   :  { %v1278_v44 = vadd.f32 %v2004_v41, %v2812_v32  ;;  %v2858_v45 = vadd.f32 %v2065_v37, %v1275_v40 }
 0x13e   :  { %v2005_v18 = vpop.f32.mrb[36].mxu0  ;;  %v2860_v47 = vadd.f32 %v2068_v43, %v1278_v44 }
 0x13f   :  { %v2069_v49 = vpop.f32.mrb[36].mxu1  ;;  %v2006_v50 = vpop.f32.mrb[37].mxu0 }
 0x140   :  { %v2007_v52 = vadd.f32 %v2006_v50, %v2005_v18  ;;  %v2070_v54 = vpop.f32.mrb[37].mxu1  ;;  %v2008_v55 = vpop.f32.mrb[38].mxu0 }
 0x141   :  { %v2071_v56 = vadd.f32 %v2070_v54, %v2069_v49  ;;  %v2072_v57 = vpop.f32.mrb[38].mxu1  ;;  %v2009_v58 = vpop.f32.mrb[39].mxu0 }
 0x142   :  { %v1283_v30 = vadd.f32 %v2007_v52, %v2815_v46  ;;  %v2010_v59 = vadd.f32 %v2009_v58, %v2008_v55  ;;  %v2073_v60 = vpop.f32.mrb[39].mxu1 }
 0x143   :  { %v2074_v61 = vadd.f32 %v2073_v60, %v2072_v57 }
 0x144   :  { %v1286_v32 = vadd.f32 %v2010_v59, %v2818_v48  ;;  %v2864_v63 = vadd.f32 %v2071_v56, %v1283_v30 }
 0x146   :  { %v2011_v1 = vpop.f32.mrb[40].mxu0  ;;  %v2866_v2 = vadd.f32 %v2074_v61, %v1286_v32 }
 0x147   :  { %v2075_v3 = vpop.f32.mrb[40].mxu1  ;;  %v2012_v4 = vpop.f32.mrb[41].mxu0 }
 0x148   :  { %v2013_v6 = vadd.f32 %v2012_v4, %v2011_v1  ;;  %v2076_v8 = vpop.f32.mrb[41].mxu1  ;;  %v2014_v9 = vpop.f32.mrb[42].mxu0 }
 0x149   :  { %v2077_v10 = vadd.f32 %v2076_v8, %v2075_v3  ;;  %v2078_v11 = vpop.f32.mrb[42].mxu1  ;;  %v2015_v12 = vpop.f32.mrb[43].mxu0 }
 0x14a   :  { %v1291_v46 = vadd.f32 %v2013_v6, %v2821_v62  ;;  %v2016_v13 = vadd.f32 %v2015_v12, %v2014_v9  ;;  %v2079_v15 = vpop.f32.mrb[43].mxu1 }
 0x14b   :  { %v2080_v17 = vadd.f32 %v2079_v15, %v2078_v11 }
 0x14c   :  { %v1294_v48 = vadd.f32 %v2016_v13, %v2824_v0  ;;  %v2870_v19 = vadd.f32 %v2077_v10, %v1291_v46 }
 0x14e   :  { %v2017_v20 = vpop.f32.mrb[44].mxu0  ;;  %v2872_v21 = vadd.f32 %v2080_v17, %v1294_v48 }
 0x14f   :  { %v2081_v22 = vpop.f32.mrb[44].mxu1  ;;  %v2018_v23 = vpop.f32.mrb[45].mxu0 }
 0x150   :  { %v2019_v25 = vadd.f32 %v2018_v23, %v2017_v20  ;;  %v2082_v27 = vpop.f32.mrb[45].mxu1  ;;  %v2020_v28 = vpop.f32.mrb[46].mxu0 }
 0x151   :  { %v2083_v29 = vadd.f32 %v2082_v27, %v2081_v22  ;;  %v2084_v31 = vpop.f32.mrb[46].mxu1  ;;  %v2021_v34 = vpop.f32.mrb[47].mxu0 }
 0x152   :  { %v1299_v62 = vadd.f32 %v2019_v25, %v2827_v14  ;;  %v2022_v36 = vadd.f32 %v2021_v34, %v2020_v28  ;;  %v2085_v37 = vpop.f32.mrb[47].mxu1 }
 0x153   :  { %v2086_v38 = vadd.f32 %v2085_v37, %v2084_v31 }
 0x154   :  { %v1302_v0 = vadd.f32 %v2022_v36, %v2830_v16  ;;  %v2876_v39 = vadd.f32 %v2083_v29, %v1299_v62 }
 0x156   :  { %v2023_v40 = vpop.f32.mrb[48].mxu0  ;;  %v2878_v41 = vadd.f32 %v2086_v38, %v1302_v0 }
 0x157   :  { %v2087_v42 = vpop.f32.mrb[48].mxu1  ;;  %v2024_v43 = vpop.f32.mrb[49].mxu0 }
 0x158   :  { %v2025_v44 = vadd.f32 %v2024_v43, %v2023_v40  ;;  %v2088_v18 = vpop.f32.mrb[49].mxu1  ;;  %v2026_v49 = vpop.f32.mrb[50].mxu0 }
 0x159   :  { %v2089_v50 = vadd.f32 %v2088_v18, %v2087_v42  ;;  %v2090_v52 = vpop.f32.mrb[50].mxu1  ;;  %v2027_v54 = vpop.f32.mrb[51].mxu0 }
 0x15a   :  { %v1307_v14 = vadd.f32 %v2025_v44, %v2833_v33  ;;  %v2028_v55 = vadd.f32 %v2027_v54, %v2026_v49  ;;  %v2091_v56 = vpop.f32.mrb[51].mxu1 }
 0x15b   :  { %v2092_v57 = vadd.f32 %v2091_v56, %v2090_v52 }
 0x15c   :  { %v1310_v16 = vadd.f32 %v2028_v55, %v2836_v35  ;;  %v1404_v58 = vadd.f32 %v2089_v50, %v1307_v14 }
 0x15e   :  { %v2029_v30 = vpop.f32.mrb[52].mxu0  ;;  %v2882_v59 = vadd.f32 %v2092_v57, %v1310_v16 }
 0x15f   :  { %v2093_v60 = vpop.f32.mrb[52].mxu1  ;;  %v2030_v61 = vpop.f32.mrb[53].mxu0 }
 0x160   :  { %v2031_v32 = vadd.f32 %v2030_v61, %v2029_v30  ;;  %v2094_v1 = vpop.f32.mrb[53].mxu1  ;;  %v2032_v3 = vpop.f32.mrb[54].mxu0 }
 0x161   :  { %v2095_v4 = vadd.f32 %v2094_v1, %v2093_v60  ;;  %v2096_v6 = vpop.f32.mrb[54].mxu1  ;;  %v2033_v8 = vpop.f32.mrb[55].mxu0 }
 0x162   :  { %v1315_v9 = vadd.f32 %v2031_v32, %v2839_v51  ;;  %v2034_v33 = vadd.f32 %v2033_v8, %v2032_v3  ;;  %v2097_v10 = vpop.f32.mrb[55].mxu1 }
 0x163   :  { %v2098_v11 = vadd.f32 %v2097_v10, %v2096_v6 }
 0x164   :  { %v1318_v12 = vadd.f32 %v2034_v33, %v2842_v53  ;;  %v1412_v35 = vadd.f32 %v2095_v4, %v1315_v9 }
 0x166   :  { %v2035_v46 = vpop.f32.mrb[56].mxu0  ;;  %v1415_v13 = vadd.f32 %v2098_v11, %v1318_v12 }
 0x167   :  { %v2099_v15 = vpop.f32.mrb[56].mxu1  ;;  %v2036_v17 = vpop.f32.mrb[57].mxu0 }
 0x168   :  { %v2037_v48 = vadd.f32 %v2036_v17, %v2035_v46  ;;  %v2100_v20 = vpop.f32.mrb[57].mxu1  ;;  %v2038_v22 = vpop.f32.mrb[58].mxu0 }
 0x169   :  { %v2101_v23 = vadd.f32 %v2100_v20, %v2099_v15  ;;  %v2102_v25 = vpop.f32.mrb[58].mxu1  ;;  %v2039_v27 = vpop.f32.mrb[59].mxu0 }
 0x16a   :  { %v1323_v28 = vadd.f32 %v2037_v48, %v2845_v5  ;;  %v2040_v29 = vadd.f32 %v2039_v27, %v2038_v22  ;;  %v2103_v51 = vpop.f32.mrb[59].mxu1 }
 0x16b   :  { %v2104_v31 = vadd.f32 %v2103_v51, %v2102_v25 }
 0x16c   :  { %v1326_v34 = vadd.f32 %v2040_v29, %v2848_v7  ;;  %v1420_v62 = vadd.f32 %v2101_v23, %v1323_v28 }
 0x16e   :  { %v2041_v53 = vpop.f32.mrb[60].mxu0  ;;  %v2888_v36 = vadd.f32 %v2104_v31, %v1326_v34 }
 0x16f   :  { %v2105_v37 = vpop.f32.mrb[60].mxu1  ;;  %v2042_v38 = vpop.f32.mrb[61].mxu0 }
 0x170   :  { %v2043_v0 = vadd.f32 %v2042_v38, %v2041_v53  ;;  %v2106_v40 = vpop.f32.mrb[61].mxu1  ;;  %v2044_v42 = vpop.f32.mrb[62].mxu0 }
 0x171   :  { %v2107_v43 = vadd.f32 %v2106_v40, %v2105_v37  ;;  %v2108_v44 = vpop.f32.mrb[62].mxu1  ;;  %v2045_v18 = vpop.f32.mrb[63].mxu0 }
 0x172   :  { %v1331_v49 = vadd.f32 %v2043_v0, %v2851_v24  ;;  %v2046_v5 = vadd.f32 %v2045_v18, %v2044_v42  ;;  %v2109_v50 = vpop.f32.mrb[63].mxu1 }
 0x173   :  { %v2110_v52 = vadd.f32 %v2109_v50, %v2108_v44 }
 0x174   :  { %v1334_v54 = vadd.f32 %v2046_v5, %v2854_v26  ;;  %v1428_v7 = vadd.f32 %v2107_v43, %v1331_v49 }
 0x176   :  { %v2145_v14 = vpop.f32.mrb[64].mxu0  ;;  %v1431_v55 = vadd.f32 %v2110_v52, %v1334_v54 }
 0x177   :  { %v1477_v56 = vadd.f32 %v2145_v14, %v2864_v63  ;;  %v2153_v57 = vpop.f32.mrb[64].mxu1  ;;  %v1468_v16 = vpop.f32.mrb[65].mxu0 }
 0x178   :  { %v1509_v30 = vadd.f32 %v2153_v57, %v1412_v35  ;;  %v1469_v60 = vadd.f32 %v1468_v16, %v2858_v45  ;;  %v1500_v61 = vpop.f32.mrb[65].mxu1  ;;  %v2146_v32 = vpop.f32.mrb[66].mxu0 }
 0x179   :  { %v1501_v1 = vadd.f32 %v1500_v61, %v1404_v58  ;;  %v1480_v24 = vadd.f32 %v2146_v32, %v2866_v2  ;;  %v2154_v3 = vpop.f32.mrb[66].mxu1  ;;  %v1471_v4 = vpop.f32.mrb[67].mxu0  ;;  %v1533_v9 = vmax.f32 %v1477_v56, 0.0 }
 0x17a   :  { %v1512_v6 = vadd.f32 %v2154_v3, %v1415_v13  ;;  %v1472_v26 = vadd.f32 %v1471_v4, %v2860_v47  ;;  %v1503_v8 = vpop.f32.mrb[67].mxu1  ;;  %v1541_v10 = vmax.f32 %v1509_v30, 0.0  ;;  %v1531_v11 = vmax.f32 %v1469_v60, 0.0 }
 0x17b   :  { %v1534_v33 = vmax.f32 %v1480_v24, 0.0  ;;  %v1504_v63 = vadd.f32 %v1503_v8, %v2882_v59  ;;  %v1539_v45 = vmax.f32 %v1501_v1, 0.0 }
 0x17c   :  { %v1542_v12 = vmax.f32 %v1512_v6, 0.0  ;;  %v1532_v35 = vmax.f32 %v1472_v26, 0.0 }
 0x17d   :  { %v1816_v46 = vpack.c.bf16 %v1534_v33, %v1533_v9  ;;  %v1540_v15 = vmax.f32 %v1504_v63, 0.0 }
 0x17e   :  { %v1836_v58 = vpack.c.bf16 %v1542_v12, %v1541_v10  ;;  %v1811_v17 = vpack.c.bf16 %v1532_v35, %v1531_v11  ;;  %v2149_v2 = vpop.f32.mrb[68].mxu0 }
 0x17f   :  { %1848 = vst [vmem:[%s2929_s3 + $0x8] sm:$0xff] %v1816_v46   ;;  %v1831_v47 = vpack.c.bf16 %v1540_v15, %v1539_v45  ;;  %v1493_v13 = vadd.f32 %v2149_v2, %v2876_v39  ;;  %v2157_v48 = vpop.f32.mrb[68].mxu1  ;;  %v1484_v20 = vpop.f32.mrb[69].mxu0 }
 0x180   :  { %1852 = vst [vmem:[%s2929_s3 + $0x28] sm:$0xff] %v1836_v58   ;;  %1812 = vst [vmem:[%s2929_s3] sm:$0xff] %v1811_v17   ;;  %v1525_v59 = vadd.f32 %v2157_v48, %v1428_v7  ;;  %v1485_v22 = vadd.f32 %v1484_v20, %v2870_v19  ;;  %v1516_v23 = vpop.f32.mrb[69].mxu1  ;;  %v2150_v25 = vpop.f32.mrb[70].mxu0 }
 0x181   :  { %1851 = vst [vmem:[%s2929_s3 + $0x20] sm:$0xff] %v1831_v47   ;;  %v1517_v39 = vadd.f32 %v1516_v23, %v1420_v62  ;;  %v1496_v27 = vadd.f32 %v2150_v25, %v2878_v41  ;;  %v2158_v28 = vpop.f32.mrb[70].mxu1  ;;  %v1487_v29 = vpop.f32.mrb[71].mxu0  ;;  %v1537_v53 = vmax.f32 %v1493_v13, 0.0 }
 0x182   :  { %v1528_v51 = vadd.f32 %v2158_v28, %v1431_v55  ;;  %v1488_v31 = vadd.f32 %v1487_v29, %v2872_v21  ;;  %v1519_v34 = vpop.f32.mrb[71].mxu1  ;;  %v1545_v19 = vmax.f32 %v1525_v59, 0.0  ;;  %v1535_v0 = vmax.f32 %v1485_v22, 0.0 }
 0x183   :  { %v1538_v37 = vmax.f32 %v1496_v27, 0.0  ;;  %v1520_v38 = vadd.f32 %v1519_v34, %v2888_v36  ;;  %v1543_v43 = vmax.f32 %v1517_v39, 0.0 }
 0x184   :  { %v1546_v40 = vmax.f32 %v1528_v51, 0.0  ;;  %v1536_v42 = vmax.f32 %v1488_v31, 0.0 }
 0x185   :  { %v1826_v44 = vpack.c.bf16 %v1538_v37, %v1537_v53  ;;  %v1544_v18 = vmax.f32 %v1520_v38, 0.0 }
 0x186   :  { %v1846_v62 = vpack.c.bf16 %v1546_v40, %v1545_v19  ;;  %v1821_v49 = vpack.c.bf16 %v1536_v42, %v1535_v0 }
 0x187   :  { %1850 = vst [vmem:[%s2929_s3 + $0x18] sm:$0xff] %v1826_v44   ;;  %v1841_v41 = vpack.c.bf16 %v1544_v18, %v1543_v43 }
 0x188   :  { %1854 = vst [vmem:[%s2929_s3 + $0x38] sm:$0xff] %v1846_v62   ;;  %1849 = vst [vmem:[%s2929_s3 + $0x10] sm:$0xff] %v1821_v49  }
 0x189   :  { %1853 = vst [vmem:[%s2929_s3 + $0x30] sm:$0xff] %v1841_v41  }

// kernel: _lambda_.12
= control target key start
LH: loop header
LB: loop body
LE: loop exit
PB: predicated region body
PF: predicated region fallthrough
CT: control target
= control target key end

     0   :  { %s3073_s1 = inlined_call_operand.vmem [shape: bf16[1152,128], index: 1, kind: input, shape index: {}]   ;;  %s3074_s0 = inlined_call_operand.vmem [shape: bf16[128,1152], index: 0, kind: input, shape index: {}]   ;;  %s3075_s2 = inlined_call_operand.vmem [shape: f32[1,128], index: 2, kind: input, shape index: {}]   ;;  %s3076_s3 = inlined_call_operand.vmem [shape: bf16[128,128], index: 3, kind: input, shape index: {}]   ;;  %s3077_s4 = inlined_call_operand.vmem [shape: bf16[128,128], index: 4, kind: output, shape index: {}]  }
   0x1   :  { %v2265_v0 = vld [vmem:[%s3073_s1 + $0x40] sm:$0xff]   ;;  %v2269_v4 = vld [vmem:[%s3073_s1 + $0x48] sm:$0xff]   ;;  %v2273_v8 = vld [vmem:[%s3073_s1 + $0x50] sm:$0xff]  }
   0x2   :  { %v2266_v1 = vld [vmem:[%s3073_s1 + $0xc0] sm:$0xff]   ;;  %1945 = vmatprep.subr.bf16.mxu0 %v2265_v0  ;;  %v2270_v5 = vld [vmem:[%s3073_s1 + $0xc8] sm:$0xff]   ;;  %v2274_v9 = vld [vmem:[%s3073_s1 + $0xd0] sm:$0xff]  }
   0x3   :  { %v2267_v2 = vld [vmem:[%s3073_s1] sm:$0xff]   ;;  %2009 = vmatprep.subr.bf16.mxu1 %v2266_v1  ;;  %v2271_v6 = vld [vmem:[%s3073_s1 + $0x8] sm:$0xff]   ;;  %v2275_v10 = vld [vmem:[%s3073_s1 + $0x10] sm:$0xff]  }
   0x4   :  { %v2268_v3 = vld [vmem:[%s3073_s1 + $0x80] sm:$0xff]   ;;  %1946 = vmatpush3.bf16.msra.mxu0 %v2267_v2  ;;  %v2272_v7 = vld [vmem:[%s3073_s1 + $0x88] sm:$0xff]   ;;  %v2276_v11 = vld [vmem:[%s3073_s1 + $0x90] sm:$0xff]  }
   0x5   :  { %2010 = vmatpush3.bf16.msra.mxu1 %v2268_v3  ;;  %1947 = vmatprep.subr.bf16.mxu0 %v2269_v4  ;;  %v2277_v12 = vld [vmem:[%s3073_s1 + $0x58] sm:$0xff]   ;;  %v2281_v16 = vld [vmem:[%s3073_s1 + $0x60] sm:$0xff]   ;;  %v2285_v20 = vld [vmem:[%s3073_s1 + $0x68] sm:$0xff]  }
   0x6   :  { %2011 = vmatprep.subr.bf16.mxu1 %v2270_v5  ;;  %v2278_v13 = vld [vmem:[%s3073_s1 + $0xd8] sm:$0xff]   ;;  %v2282_v17 = vld [vmem:[%s3073_s1 + $0xe0] sm:$0xff]   ;;  %v2286_v21 = vld [vmem:[%s3073_s1 + $0xe8] sm:$0xff]  }
   0x7   :  { %v2279_v14 = vld [vmem:[%s3073_s1 + $0x18] sm:$0xff]   ;;  %v2283_v18 = vld [vmem:[%s3073_s1 + $0x20] sm:$0xff]   ;;  %v2287_v22 = vld [vmem:[%s3073_s1 + $0x28] sm:$0xff]  }
   0x8   :  { %1948 = vmatpush3.bf16.msra.mxu0 %v2271_v6  ;;  %v2280_v15 = vld [vmem:[%s3073_s1 + $0x98] sm:$0xff]   ;;  %v2284_v19 = vld [vmem:[%s3073_s1 + $0xa0] sm:$0xff]   ;;  %v2288_v23 = vld [vmem:[%s3073_s1 + $0xa8] sm:$0xff]  }
   0x9   :  { %2012 = vmatpush3.bf16.msra.mxu1 %v2272_v7  ;;  %1949 = vmatprep.subr.bf16.mxu0 %v2273_v8  ;;  %v2289_v24 = vld [vmem:[%s3073_s1 + $0x70] sm:$0xff]   ;;  %v2293_v28 = vld [vmem:[%s3073_s1 + $0x78] sm:$0xff]   ;;  %v2297_v32 = vld [vmem:[%s3074_s0] ss:$36 sps:$4 sm:$0xff]  }
   0xa   :  { %2013 = vmatprep.subr.bf16.mxu1 %v2274_v9  ;;  %v2290_v25 = vld [vmem:[%s3073_s1 + $0xf0] sm:$0xff]   ;;  %v2294_v29 = vld [vmem:[%s3073_s1 + $0xf8] sm:$0xff]   ;;  %v2299_v33 = vld [vmem:[%s3074_s0 + $0x4] ss:$36 sps:$4 sm:$0xff]  }
   0xb   :  { %v2291_v26 = vld [vmem:[%s3073_s1 + $0x30] sm:$0xff]   ;;  %v2295_v30 = vld [vmem:[%s3073_s1 + $0x38] sm:$0xff]   ;;  %v2300_v34 = vld [vmem:[%s3074_s0 + $0x8] ss:$36 sps:$4 sm:$0xff]   ;;  %1081 = vmatprep.mubr.bf16.mxu0 %v2299_v33 }
   0xc   :  { %1950 = vmatpush3.bf16.msra.mxu0 %v2275_v10  ;;  %v2292_v27 = vld [vmem:[%s3073_s1 + $0xb0] sm:$0xff]   ;;  %v2296_v31 = vld [vmem:[%s3073_s1 + $0xb8] sm:$0xff]   ;;  %v2303_v36 = vld [vmem:[%s3073_s1 + $0x140] sm:$0xff]  }
   0xd   :  { %2014 = vmatpush3.bf16.msra.mxu1 %v2276_v11  ;;  %1951 = vmatprep.subr.bf16.mxu0 %v2277_v12  ;;  %v2302_v35 = vld [vmem:[%s3074_s0 + $0xc] ss:$36 sps:$4 sm:$0xff]   ;;  %v2304_v37 = vld [vmem:[%s3073_s1 + $0x1c0] sm:$0xff]   ;;  %v2309_v41 = vld [vmem:[%s3074_s0 + $0x54] ss:$36 sps:$4 sm:$0xff]  }
   0xe   :  { %2015 = vmatprep.subr.bf16.mxu1 %v2278_v13  ;;  %1178 = vmatprep.mubr.bf16.mxu1 %v2302_v35  ;;  %v2305_v38 = vld [vmem:[%s3073_s1 + $0x100] sm:$0xff]   ;;  %v2307_v40 = vld [vmem:[%s3074_s0 + $0x4c] ss:$36 sps:$4 sm:$0xff]   ;;  %v2317_v48 = vld [vmem:[%s3074_s0 + $0x94] ss:$36 sps:$4 sm:$0xff]  }
   0xf   :  { %v2306_v39 = vld [vmem:[%s3073_s1 + $0x180] sm:$0xff]   ;;  %v2311_v42 = vld [vmem:[%s3074_s0 + $0x48] ss:$36 sps:$4 sm:$0xff]   ;;  %v2312_v43 = vld [vmem:[%s3074_s0 + $0x50] ss:$36 sps:$4 sm:$0xff]  }
  0x10   :  { %1952 = vmatpush3.bf16.msra.mxu0 %v2279_v14  ;;  %v2313_v44 = vld [vmem:[%s3073_s1 + $0x148] sm:$0xff]   ;;  %v2319_v49 = vld [vmem:[%s3074_s0 + $0x9c] ss:$36 sps:$4 sm:$0xff]   ;;  %v2321_v50 = vld [vmem:[%s3074_s0 + $0x90] ss:$36 sps:$4 sm:$0xff]  }
  0x11   :  { %2016 = vmatpush3.bf16.msra.mxu1 %v2280_v15  ;;  %1953 = vmatprep.subr.bf16.mxu0 %v2281_v16  ;;  %v2314_v45 = vld [vmem:[%s3073_s1 + $0x1c8] sm:$0xff]   ;;  %v2322_v51 = vld [vmem:[%s3074_s0 + $0x98] ss:$36 sps:$4 sm:$0xff]   ;;  %v2323_v52 = vld [vmem:[%s3073_s1 + $0x150] sm:$0xff]  }
  0x12   :  { %2017 = vmatprep.subr.bf16.mxu1 %v2282_v17  ;;  %v2315_v46 = vld [vmem:[%s3073_s1 + $0x108] sm:$0xff]   ;;  %v2324_v53 = vld [vmem:[%s3073_s1 + $0x1d0] sm:$0xff]   ;;  %v2327_v56 = vld [vmem:[%s3074_s0 + $0xdc] ss:$36 sps:$4 sm:$0xff]  }
  0x13   :  { %v2316_v47 = vld [vmem:[%s3073_s1 + $0x188] sm:$0xff]   ;;  %v2325_v54 = vld [vmem:[%s3073_s1 + $0x110] sm:$0xff]   ;;  %v2331_v58 = vld [vmem:[%s3074_s0 + $0xd8] ss:$36 sps:$4 sm:$0xff]  }
  0x14   :  { %1954 = vmatpush3.bf16.msra.mxu0 %v2283_v18  ;;  %v2326_v55 = vld [vmem:[%s3073_s1 + $0x190] sm:$0xff]   ;;  %v2329_v57 = vld [vmem:[%s3074_s0 + $0xe4] ss:$36 sps:$4 sm:$0xff]   ;;  %v2333_v60 = vld [vmem:[%s3073_s1 + $0x158] sm:$0xff]  }
  0x15   :  { %2018 = vmatpush3.bf16.msra.mxu1 %v2284_v19  ;;  %1955 = vmatprep.subr.bf16.mxu0 %v2285_v20  ;;  %v2332_v59 = vld [vmem:[%s3074_s0 + $0xe0] ss:$36 sps:$4 sm:$0xff]   ;;  %v2334_v61 = vld [vmem:[%s3073_s1 + $0x1d8] sm:$0xff]   ;;  %v2339_v1 = vld [vmem:[%s3074_s0 + $0x12c] ss:$36 sps:$4 sm:$0xff]  }
  0x16   :  { %2019 = vmatprep.subr.bf16.mxu1 %v2286_v21  ;;  %v2335_v62 = vld [vmem:[%s3073_s1 + $0x118] sm:$0xff]   ;;  %v2337_v0 = vld [vmem:[%s3074_s0 + $0x124] ss:$36 sps:$4 sm:$0xff]   ;;  %v2347_v8 = vld [vmem:[%s3074_s0 + $0x16c] ss:$36 sps:$4 sm:$0xff]  }
  0x17   :  { %v2336_v63 = vld [vmem:[%s3073_s1 + $0x198] sm:$0xff]   ;;  %v2341_v2 = vld [vmem:[%s3074_s0 + $0x120] ss:$36 sps:$4 sm:$0xff]   ;;  %v2342_v4 = vld [vmem:[%s3074_s0 + $0x128] ss:$36 sps:$4 sm:$0xff]  }
  0x18   :  { %1956 = vmatpush3.bf16.msra.mxu0 %v2287_v22  ;;  %v2343_v3 = vld [vmem:[%s3073_s1 + $0x160] sm:$0xff]   ;;  %v2349_v9 = vld [vmem:[%s3074_s0 + $0x174] ss:$36 sps:$4 sm:$0xff]   ;;  %v2353_v10 = vld [vmem:[%s3073_s1 + $0x168] sm:$0xff]  }
  0x19   :  { %2020 = vmatpush3.bf16.msra.mxu1 %v2288_v23  ;;  %1957 = vmatprep.subr.bf16.mxu0 %v2289_v24  ;;  %v2344_v5 = vld [vmem:[%s3073_s1 + $0x1e0] sm:$0xff]   ;;  %v2354_v11 = vld [vmem:[%s3073_s1 + $0x1e8] sm:$0xff]   ;;  %v2352_v15 = vld [vmem:[%s3074_s0 + $0x170] ss:$36 sps:$4 sm:$0xff]  }
  0x1a   :  { %2021 = vmatprep.subr.bf16.mxu1 %v2290_v25  ;;  %v2345_v6 = vld [vmem:[%s3073_s1 + $0x120] sm:$0xff]   ;;  %v2351_v12 = vld [vmem:[%s3074_s0 + $0x168] ss:$36 sps:$4 sm:$0xff]   ;;  %v2357_v16 = vld [vmem:[%s3074_s0 + $0x1b4] ss:$36 sps:$4 sm:$0xff]  }
  0x1b   :  { %v2346_v7 = vld [vmem:[%s3073_s1 + $0x1a0] sm:$0xff]   ;;  %v2355_v13 = vld [vmem:[%s3073_s1 + $0x128] sm:$0xff]   ;;  %v2363_v18 = vld [vmem:[%s3073_s1 + $0x170] sm:$0xff]  }
  0x1c   :  { %1958 = vmatpush3.bf16.msra.mxu0 %v2291_v26  ;;  %v2356_v14 = vld [vmem:[%s3073_s1 + $0x1a8] sm:$0xff]   ;;  %v2359_v17 = vld [vmem:[%s3074_s0 + $0x1bc] ss:$36 sps:$4 sm:$0xff]   ;;  %v2364_v19 = vld [vmem:[%s3073_s1 + $0x1f0] sm:$0xff]  }
  0x1d   :  { %2022 = vmatpush3.bf16.msra.mxu1 %v2292_v27  ;;  %1959 = vmatprep.subr.bf16.mxu0 %v2293_v28  ;;  %v2365_v20 = vld [vmem:[%s3073_s1 + $0x130] sm:$0xff]   ;;  %v2362_v23 = vld [vmem:[%s3074_s0 + $0x1b8] ss:$36 sps:$4 sm:$0xff]   ;;  %v2369_v25 = vld [vmem:[%s3074_s0 + $0x204] ss:$36 sps:$4 sm:$0xff]  }
  0x1e   :  { %2023 = vmatprep.subr.bf16.mxu1 %v2294_v29  ;;  %v2366_v21 = vld [vmem:[%s3073_s1 + $0x1b0] sm:$0xff]   ;;  %v2367_v24 = vld [vmem:[%s3074_s0 + $0x1fc] ss:$36 sps:$4 sm:$0xff]  }
  0x1f   :  { %v2361_v22 = vld [vmem:[%s3074_s0 + $0x1b0] ss:$36 sps:$4 sm:$0xff]   ;;  %v2373_v26 = vld [vmem:[%s3073_s1 + $0x178] sm:$0xff]  }
  0x20   :  { %1960 = vmatpush3.bf16.msra.mxu0 %v2295_v30  ;;  %v2374_v27 = vld [vmem:[%s3073_s1 + $0x1f8] sm:$0xff]   ;;  %v2377_v35 = vld [vmem:[%s3074_s0 + $0x10] ss:$36 sps:$4 sm:$0xff]  }
  0x21   :  { %2024 = vmatpush3.bf16.msra.mxu1 %v2296_v31  ;;  %2073 = vmatprep.subr.bf16.mxu0 %v2303_v36  ;;  %v2375_v28 = vld [vmem:[%s3073_s1 + $0x138] sm:$0xff]   ;;  %v2372_v31 = vld [vmem:[%s3074_s0 + $0x200] ss:$36 sps:$4 sm:$0xff]  }
  0x22   :  { %2137 = vmatprep.subr.bf16.mxu1 %v2304_v37  ;;  %v2376_v29 = vld [vmem:[%s3073_s1 + $0x1b8] sm:$0xff]  }
  0x23   :  { %1082 = vmatmul.mubr.bf16.vlgmr.msra.gmra.mrb[0].mxu0 %v2297_v32  ;;  %v2371_v30 = vld [vmem:[%s3074_s0 + $0x1f8] ss:$36 sps:$4 sm:$0xff]   ;;  %v2383_v32 = vld [vmem:[%s3073_s1 + $0x200] sm:$0xff]  }
  0x24   :  { %1179 = vmatmul.mubr.bf16.vlgmr.msra.gmra.mrb[0].mxu1 %v2300_v34  ;;  %2074 = vmatpush3.bf16.msra.mxu0 %v2305_v38  ;;  %v2379_v33 = vld [vmem:[%s3074_s0 + $0x14] ss:$36 sps:$4 sm:$0xff]   ;;  %v2382_v34 = vld [vmem:[%s3074_s0 + $0x1c] ss:$36 sps:$4 sm:$0xff]   ;;  %v2386_v38 = vld [vmem:[%s3074_s0 + $0x64] ss:$36 sps:$4 sm:$0xff]  }
  0x25   :  { %2138 = vmatpush3.bf16.msra.mxu1 %v2306_v39  ;;  %1089 = vmatprep.mubr.bf16.mxu0 %v2307_v40  ;;  %v2380_v36 = vld [vmem:[%s3074_s0 + $0x18] ss:$36 sps:$4 sm:$0xff]   ;;  %v2390_v39 = vld [vmem:[%s3073_s1 + $0x208] sm:$0xff]   ;;  %v2397_v40 = vld [vmem:[%s3073_s1 + $0x210] sm:$0xff]  }
  0x26   :  { %1186 = vmatprep.mubr.bf16.mxu1 %v2309_v41  ;;  %2075 = vmatprep.subr.bf16.mxu0 %v2313_v44  ;;  %v2384_v37 = vld [vmem:[%s3074_s0 + $0x5c] ss:$36 sps:$4 sm:$0xff]   ;;  %v2393_v44 = vld [vmem:[%s3074_s0 + $0xac] ss:$36 sps:$4 sm:$0xff]  }
  0x27   :  { %2139 = vmatprep.subr.bf16.mxu1 %v2314_v45  ;;  %v2388_v41 = vld [vmem:[%s3074_s0 + $0x58] ss:$36 sps:$4 sm:$0xff]  }
  0x28   :  { %2076 = vmatpush3.bf16.msra.mxu0 %v2315_v46  ;;  %v2404_v45 = vld [vmem:[%s3073_s1 + $0x218] sm:$0xff]   ;;  %v2411_v46 = vld [vmem:[%s3073_s1 + $0x220] sm:$0xff]  }
  0x29   :  { %2140 = vmatpush3.bf16.msra.mxu1 %v2316_v47  ;;  %2077 = vmatprep.subr.bf16.mxu0 %v2323_v52  ;;  %v2395_v47 = vld [vmem:[%s3074_s0 + $0xa0] ss:$36 sps:$4 sm:$0xff]   ;;  %v2402_v52 = vld [vmem:[%s3074_s0 + $0xe8] ss:$36 sps:$4 sm:$0xff]  }
  0x2a   :  { %2141 = vmatprep.subr.bf16.mxu1 %v2324_v53  ;;  %v2425_v53 = vld [vmem:[%s3073_s1 + $0x230] sm:$0xff]  }
  0x2b   :  { %1090 = vmatmul.mubr.bf16.gmra.mrb[4].mxu0 %v2311_v42  ;;  %v2389_v42 = vld [vmem:[%s3074_s0 + $0x60] ss:$36 sps:$4 sm:$0xff]  }
  0x2c   :  { %1187 = vmatmul.mubr.bf16.gmra.mrb[4].mxu1 %v2312_v43  ;;  %1097 = vmatprep.mubr.bf16.mxu0 %v2317_v48  ;;  %v2391_v43 = vld [vmem:[%s3074_s0 + $0xa4] ss:$36 sps:$4 sm:$0xff]  }
  0x2d   :  { %1194 = vmatprep.mubr.bf16.mxu1 %v2319_v49  ;;  %2078 = vmatpush3.bf16.msra.mxu0 %v2325_v54  ;;  %v2396_v48 = vld [vmem:[%s3074_s0 + $0xa8] ss:$36 sps:$4 sm:$0xff]   ;;  %v2403_v54 = vld [vmem:[%s3074_s0 + $0xf0] ss:$36 sps:$4 sm:$0xff]  }
  0x2e   :  { %2142 = vmatpush3.bf16.msra.mxu1 %v2326_v55  ;;  %2079 = vmatprep.subr.bf16.mxu0 %v2333_v60  ;;  %v2398_v49 = vld [vmem:[%s3074_s0 + $0xec] ss:$36 sps:$4 sm:$0xff]   ;;  %v2405_v55 = vld [vmem:[%s3074_s0 + $0x134] ss:$36 sps:$4 sm:$0xff]   ;;  %v2412_v60 = vld [vmem:[%s3074_s0 + $0x17c] ss:$36 sps:$4 sm:$0xff]  }
  0x2f   :  { %2143 = vmatprep.subr.bf16.mxu1 %v2334_v61  ;;  %v2414_v61 = vld [vmem:[%s3074_s0 + $0x184] ss:$36 sps:$4 sm:$0xff]  }
  0x31   :  { %2080 = vmatpush3.bf16.msra.mxu0 %v2335_v62  ;;  %v2416_v62 = vld [vmem:[%s3074_s0 + $0x178] ss:$36 sps:$4 sm:$0xff]  }
  0x32   :  { %2144 = vmatpush3.bf16.msra.mxu1 %v2336_v63  ;;  %2081 = vmatprep.subr.bf16.mxu0 %v2343_v3  ;;  %v2417_v63 = vld [vmem:[%s3074_s0 + $0x180] ss:$36 sps:$4 sm:$0xff]   ;;  %v2424_v3 = vld [vmem:[%s3074_s0 + $0x1c8] ss:$36 sps:$4 sm:$0xff]  }
  0x33   :  { %1098 = vmatmul.mubr.bf16.gmra.mrb[8].mxu0 %v2321_v50  ;;  %2145 = vmatprep.subr.bf16.mxu1 %v2344_v5  ;;  %v2400_v50 = vld [vmem:[%s3074_s0 + $0xf4] ss:$36 sps:$4 sm:$0xff]  }
  0x34   :  { %1195 = vmatmul.mubr.bf16.gmra.mrb[8].mxu1 %v2322_v51  ;;  %1105 = vmatprep.mubr.bf16.mxu0 %v2327_v56  ;;  %v2418_v51 = vld [vmem:[%s3073_s1 + $0x228] sm:$0xff]   ;;  %v2407_v56 = vld [vmem:[%s3074_s0 + $0x13c] ss:$36 sps:$4 sm:$0xff]   ;;  %v2428_v5 = vld [vmem:[%s3074_s0 + $0x214] ss:$36 sps:$4 sm:$0xff]  }
  0x35   :  { %1202 = vmatprep.mubr.bf16.mxu1 %v2329_v57  ;;  %2082 = vmatpush3.bf16.msra.mxu0 %v2345_v6  ;;  %v2432_v57 = vld [vmem:[%s3073_s1 + $0x238] sm:$0xff]   ;;  %v2430_v6 = vld [vmem:[%s3074_s0 + $0x208] ss:$36 sps:$4 sm:$0xff]  }
  0x36   :  { %2146 = vmatpush3.bf16.msra.mxu1 %v2346_v7  ;;  %2083 = vmatprep.subr.bf16.mxu0 %v2353_v10  ;;  %v2431_v7 = vld [vmem:[%s3074_s0 + $0x210] ss:$36 sps:$4 sm:$0xff]   ;;  %v2435_v10 = vld [vmem:[%s3074_s0 + $0x68] ss:$36 sps:$4 sm:$0xff]  }
  0x37   :  { %2147 = vmatprep.subr.bf16.mxu1 %v2354_v11  ;;  %v2436_v11 = vld [vmem:[%s3074_s0 + $0x188] ss:$36 sps:$4 sm:$0xff]  }
  0x39   :  { %2084 = vmatpush3.bf16.msra.mxu0 %v2355_v13  ;;  %v2438_v13 = vld [vmem:[%s3074_s0 + $0x1d0] ss:$36 sps:$4 sm:$0xff]  }
  0x3a   :  { %2148 = vmatpush3.bf16.msra.mxu1 %v2356_v14  ;;  %2085 = vmatprep.subr.bf16.mxu0 %v2363_v18  ;;  %v2439_v14 = vld [vmem:[%s3074_s0 + $0xf8] ss:$36 sps:$4 sm:$0xff]   ;;  %v2901_v18 = vld [vmem:[%s3075_s2] ss:$0 sm:$0xff] }
  0x3b   :  { %1106 = vmatmul.mubr.bf16.gmra.mrb[12].mxu0 %v2331_v58  ;;  %2149 = vmatprep.subr.bf16.mxu1 %v2364_v19  ;;  %v2409_v58 = vld [vmem:[%s3074_s0 + $0x130] ss:$36 sps:$4 sm:$0xff]  }
  0x3c   :  { %1203 = vmatmul.mubr.bf16.gmra.mrb[12].mxu1 %v2332_v59  ;;  %1113 = vmatprep.mubr.bf16.mxu0 %v2337_v0  ;;  %v2410_v59 = vld [vmem:[%s3074_s0 + $0x138] ss:$36 sps:$4 sm:$0xff]   ;;  %v2419_v0 = vld [vmem:[%s3074_s0 + $0x1c4] ss:$36 sps:$4 sm:$0xff]  }
  0x3d   :  { %1210 = vmatprep.mubr.bf16.mxu1 %v2339_v1  ;;  %2086 = vmatpush3.bf16.msra.mxu0 %v2365_v20  ;;  %v2421_v1 = vld [vmem:[%s3074_s0 + $0x1cc] ss:$36 sps:$4 sm:$0xff]  }
  0x3e   :  { %2150 = vmatpush3.bf16.msra.mxu1 %v2366_v21  ;;  %2087 = vmatprep.subr.bf16.mxu0 %v2373_v26 }
  0x3f   :  { %2151 = vmatprep.subr.bf16.mxu1 %v2374_v27 }
  0x41   :  { %2088 = vmatpush3.bf16.msra.mxu0 %v2375_v28 }
  0x42   :  { %2152 = vmatpush3.bf16.msra.mxu1 %v2376_v29  ;;  %2217 = vmatprep.subr.bf16.mxu0 %v2383_v32 }
  0x43   :  { %1114 = vmatmul.mubr.bf16.gmra.mrb[16].mxu0 %v2341_v2  ;;  %2249 = vmatprep.subr.bf16.mxu1 %v2383_v32  ;;  %v2423_v2 = vld [vmem:[%s3074_s0 + $0x1c0] ss:$36 sps:$4 sm:$0xff]  }
  0x44   :  { %1211 = vmatmul.mubr.bf16.gmra.mrb[16].mxu1 %v2342_v4  ;;  %1121 = vmatprep.mubr.bf16.mxu0 %v2347_v8  ;;  %v2426_v4 = vld [vmem:[%s3074_s0 + $0x20c] ss:$36 sps:$4 sm:$0xff]   ;;  %v2433_v8 = vld [vmem:[%s3074_s0 + $0x20] ss:$36 sps:$4 sm:$0xff]  }
  0x45   :  { %1218 = vmatprep.mubr.bf16.mxu1 %v2349_v9  ;;  %v2434_v9 = vld [vmem:[%s3074_s0 + $0x140] ss:$36 sps:$4 sm:$0xff]  }
  0x4b   :  { %1122 = vmatmul.mubr.bf16.gmra.mrb[20].mxu0 %v2351_v12  ;;  %v2437_v12 = vld [vmem:[%s3074_s0 + $0xb0] ss:$36 sps:$4 sm:$0xff]  }
  0x4c   :  { %1219 = vmatmul.mubr.bf16.gmra.mrb[20].mxu1 %v2352_v15  ;;  %1129 = vmatprep.mubr.bf16.mxu0 %v2357_v16  ;;  %v2440_v15 = vld [vmem:[%s3074_s0 + $0x218] ss:$36 sps:$4 sm:$0xff]  }
  0x4d   :  { %1226 = vmatprep.mubr.bf16.mxu1 %v2359_v17 }
  0x53   :  { %1130 = vmatmul.mubr.bf16.gmra.mrb[24].mxu0 %v2361_v22 }
  0x54   :  { %1227 = vmatmul.mubr.bf16.gmra.mrb[24].mxu1 %v2362_v23  ;;  %1137 = vmatprep.mubr.bf16.mxu0 %v2367_v24 }
  0x55   :  { %1234 = vmatprep.mubr.bf16.mxu1 %v2369_v25 }
  0x5b   :  { %1138 = vmatmul.mubr.bf16.gmra.mrb[28].mxu0 %v2371_v30 }
  0x5c   :  { %1235 = vmatmul.mubr.bf16.gmra.mrb[28].mxu1 %v2372_v31  ;;  %1275 = vmatprep.mubr.bf16.mxu0 %v2379_v33 }
  0x5d   :  { %1372 = vmatprep.mubr.bf16.mxu1 %v2382_v34 }
  0x63   :  { %1276 = vmatmul.mubr.bf16.vlgmr.msra.gmra.mrb[32].mxu0 %v2377_v35 }
  0x64   :  { %1373 = vmatmul.mubr.bf16.vlgmr.msra.gmra.mrb[32].mxu1 %v2380_v36  ;;  %2218 = vmatpush3.bf16.msra.mxu0 %v2383_v32 }
  0x65   :  { %2257 = vmatpush3.bf16.msra.mxu1 %v2383_v32  ;;  %1283 = vmatprep.mubr.bf16.mxu0 %v2384_v37 }
  0x66   :  { %1380 = vmatprep.mubr.bf16.mxu1 %v2386_v38  ;;  %2219 = vmatprep.subr.bf16.mxu0 %v2390_v39 }
  0x67   :  { %2250 = vmatprep.subr.bf16.mxu1 %v2390_v39 }
  0x68   :  { %2220 = vmatpush3.bf16.msra.mxu0 %v2390_v39 }
  0x69   :  { %2258 = vmatpush3.bf16.msra.mxu1 %v2390_v39  ;;  %2221 = vmatprep.subr.bf16.mxu0 %v2397_v40 }
  0x6a   :  { %2251 = vmatprep.subr.bf16.mxu1 %v2397_v40 }
  0x6b   :  { %1284 = vmatmul.mubr.bf16.gmra.mrb[36].mxu0 %v2388_v41 }
  0x6c   :  { %1381 = vmatmul.mubr.bf16.gmra.mrb[36].mxu1 %v2389_v42  ;;  %1291 = vmatprep.mubr.bf16.mxu0 %v2391_v43 }
  0x6d   :  { %1388 = vmatprep.mubr.bf16.mxu1 %v2393_v44  ;;  %2222 = vmatpush3.bf16.msra.mxu0 %v2397_v40 }
  0x6e   :  { %2259 = vmatpush3.bf16.msra.mxu1 %v2397_v40  ;;  %2223 = vmatprep.subr.bf16.mxu0 %v2404_v45 }
  0x6f   :  { %2252 = vmatprep.subr.bf16.mxu1 %v2404_v45 }
  0x71   :  { %2224 = vmatpush3.bf16.msra.mxu0 %v2404_v45 }
  0x72   :  { %2260 = vmatpush3.bf16.msra.mxu1 %v2404_v45  ;;  %2225 = vmatprep.subr.bf16.mxu0 %v2411_v46 }
  0x73   :  { %1292 = vmatmul.mubr.bf16.gmra.mrb[40].mxu0 %v2395_v47  ;;  %2253 = vmatprep.subr.bf16.mxu1 %v2411_v46 }
  0x74   :  { %1389 = vmatmul.mubr.bf16.gmra.mrb[40].mxu1 %v2396_v48  ;;  %1299 = vmatprep.mubr.bf16.mxu0 %v2398_v49 }
  0x75   :  { %1396 = vmatprep.mubr.bf16.mxu1 %v2400_v50  ;;  %2226 = vmatpush3.bf16.msra.mxu0 %v2411_v46 }
  0x76   :  { %2261 = vmatpush3.bf16.msra.mxu1 %v2411_v46  ;;  %2227 = vmatprep.subr.bf16.mxu0 %v2418_v51 }
  0x77   :  { %2254 = vmatprep.subr.bf16.mxu1 %v2418_v51 }
  0x79   :  { %2228 = vmatpush3.bf16.msra.mxu0 %v2418_v51 }
  0x7a   :  { %2262 = vmatpush3.bf16.msra.mxu1 %v2418_v51  ;;  %2229 = vmatprep.subr.bf16.mxu0 %v2425_v53 }
  0x7b   :  { %1300 = vmatmul.mubr.bf16.gmra.mrb[44].mxu0 %v2402_v52  ;;  %2255 = vmatprep.subr.bf16.mxu1 %v2425_v53 }
  0x7c   :  { %1397 = vmatmul.mubr.bf16.gmra.mrb[44].mxu1 %v2403_v54  ;;  %1307 = vmatprep.mubr.bf16.mxu0 %v2405_v55 }
  0x7d   :  { %1404 = vmatprep.mubr.bf16.mxu1 %v2407_v56  ;;  %2230 = vmatpush3.bf16.msra.mxu0 %v2425_v53 }
  0x7e   :  { %2263 = vmatpush3.bf16.msra.mxu1 %v2425_v53  ;;  %2231 = vmatprep.subr.bf16.mxu0 %v2432_v57 }
  0x7f   :  { %2256 = vmatprep.subr.bf16.mxu1 %v2432_v57 }
  0x81   :  { %2232 = vmatpush3.bf16.msra.mxu0 %v2432_v57 }
  0x82   :  { %2264 = vmatpush3.bf16.msra.mxu1 %v2432_v57 }
  0x83   :  { %1308 = vmatmul.mubr.bf16.gmra.mrb[48].mxu0 %v2409_v58 }
  0x84   :  { %1405 = vmatmul.mubr.bf16.gmra.mrb[48].mxu1 %v2410_v59  ;;  %1315 = vmatprep.mubr.bf16.mxu0 %v2412_v60 }
  0x85   :  { %1412 = vmatprep.mubr.bf16.mxu1 %v2414_v61 }
  0x8b   :  { %1316 = vmatmul.mubr.bf16.gmra.mrb[52].mxu0 %v2416_v62 }
  0x8c   :  { %1413 = vmatmul.mubr.bf16.gmra.mrb[52].mxu1 %v2417_v63  ;;  %1323 = vmatprep.mubr.bf16.mxu0 %v2419_v0 }
  0x8d   :  { %1420 = vmatprep.mubr.bf16.mxu1 %v2421_v1 }
  0x93   :  { %1324 = vmatmul.mubr.bf16.gmra.mrb[56].mxu0 %v2423_v2 }
  0x94   :  { %1421 = vmatmul.mubr.bf16.gmra.mrb[56].mxu1 %v2424_v3  ;;  %1331 = vmatprep.mubr.bf16.mxu0 %v2426_v4 }
  0x95   :  { %1428 = vmatprep.mubr.bf16.mxu1 %v2428_v5 }
  0x9b   :  { %1332 = vmatmul.mubr.bf16.gmra.mrb[60].mxu0 %v2430_v6 }
  0x9c   :  { %1429 = vmatmul.mubr.bf16.gmra.mrb[60].mxu1 %v2431_v7  ;;  %2233 = vmatprep.mubr.bf16.mxu0 %v2433_v8 }
  0x9d   :  { %2241 = vmatprep.mubr.bf16.mxu1 %v2434_v9 }
  0xa3   :  { %2234 = vmatmul.mubr.bf16.vlgmr.msra.gmra.mrb[64].mxu0 %v2435_v10 }
  0xa4   :  { %2242 = vmatmul.mubr.bf16.vlgmr.msra.gmra.mrb[64].mxu1 %v2436_v11  ;;  %2237 = vmatprep.mubr.bf16.mxu0 %v2437_v12 }
  0xa5   :  { %2245 = vmatprep.mubr.bf16.mxu1 %v2438_v13 }
  0xab   :  { %2238 = vmatmul.mubr.bf16.gmra.mrb[68].mxu0 %v2439_v14 }
  0xac   :  { %2246 = vmatmul.mubr.bf16.gmra.mrb[68].mxu1 %v2440_v15 }
  0xf6   :  { %v1961_v16 = vpop.f32.mrb[0].mxu0 }
  0xf7   :  { %v2025_v17 = vpop.f32.mrb[0].mxu1  ;;  %v1962_v19 = vpop.f32.mrb[1].mxu0 }
  0xf8   :  { %v1963_v20 = vadd.f32 %v1962_v19, %v1961_v16  ;;  %v2026_v21 = vpop.f32.mrb[1].mxu1  ;;  %v1964_v22 = vpop.f32.mrb[2].mxu0 }
  0xf9   :  { %v2027_v23 = vadd.f32 %v2026_v21, %v2025_v17  ;;  %v2028_v24 = vpop.f32.mrb[2].mxu1  ;;  %v1965_v25 = vpop.f32.mrb[3].mxu0 }
  0xfa   :  { %v1084_v26 = vadd.f32 %v1963_v20, %v2901_v18  ;;  %v1966_v27 = vadd.f32 %v1965_v25, %v1964_v22  ;;  %v2029_v28 = vpop.f32.mrb[3].mxu1 }
  0xfb   :  { %v2030_v29 = vadd.f32 %v2029_v28, %v2028_v24 }
  0xfc   :  { %v2904_v30 = vadd.f32 %v2027_v23, %v1084_v26  ;;  %v1087_v31 = vadd.f32 %v1966_v27, %v2901_v18 }
  0xfe   :  { %v2907_v32 = vadd.f32 %v2030_v29, %v1087_v31  ;;  %v1967_v33 = vpop.f32.mrb[4].mxu0 }
  0xff   :  { %v2031_v34 = vpop.f32.mrb[4].mxu1  ;;  %v1968_v35 = vpop.f32.mrb[5].mxu0 }
 0x100   :  { %v1969_v36 = vadd.f32 %v1968_v35, %v1967_v33  ;;  %v2032_v37 = vpop.f32.mrb[5].mxu1  ;;  %v1970_v38 = vpop.f32.mrb[6].mxu0 }
 0x101   :  { %v2033_v39 = vadd.f32 %v2032_v37, %v2031_v34  ;;  %v2034_v40 = vpop.f32.mrb[6].mxu1  ;;  %v1971_v41 = vpop.f32.mrb[7].mxu0 }
 0x102   :  { %v1092_v42 = vadd.f32 %v1969_v36, %v2901_v18  ;;  %v1972_v43 = vadd.f32 %v1971_v41, %v1970_v38  ;;  %v2035_v44 = vpop.f32.mrb[7].mxu1 }
 0x103   :  { %v2036_v45 = vadd.f32 %v2035_v44, %v2034_v40 }
 0x104   :  { %v2910_v46 = vadd.f32 %v2033_v39, %v1092_v42  ;;  %v1095_v47 = vadd.f32 %v1972_v43, %v2901_v18 }
 0x106   :  { %v2913_v48 = vadd.f32 %v2036_v45, %v1095_v47  ;;  %v1973_v49 = vpop.f32.mrb[8].mxu0 }
 0x107   :  { %v2037_v50 = vpop.f32.mrb[8].mxu1  ;;  %v1974_v51 = vpop.f32.mrb[9].mxu0 }
 0x108   :  { %v1975_v52 = vadd.f32 %v1974_v51, %v1973_v49  ;;  %v2038_v53 = vpop.f32.mrb[9].mxu1  ;;  %v1976_v54 = vpop.f32.mrb[10].mxu0 }
 0x109   :  { %v2039_v55 = vadd.f32 %v2038_v53, %v2037_v50  ;;  %v2040_v56 = vpop.f32.mrb[10].mxu1  ;;  %v1977_v57 = vpop.f32.mrb[11].mxu0 }
 0x10a   :  { %v1100_v58 = vadd.f32 %v1975_v52, %v2901_v18  ;;  %v1978_v59 = vadd.f32 %v1977_v57, %v1976_v54  ;;  %v2041_v60 = vpop.f32.mrb[11].mxu1 }
 0x10b   :  { %v2042_v61 = vadd.f32 %v2041_v60, %v2040_v56 }
 0x10c   :  { %v2916_v62 = vadd.f32 %v2039_v55, %v1100_v58  ;;  %v1103_v63 = vadd.f32 %v1978_v59, %v2901_v18 }
 0x10e   :  { %v2919_v0 = vadd.f32 %v2042_v61, %v1103_v63  ;;  %v1979_v1 = vpop.f32.mrb[12].mxu0 }
 0x10f   :  { %v2043_v2 = vpop.f32.mrb[12].mxu1  ;;  %v1980_v3 = vpop.f32.mrb[13].mxu0 }
 0x110   :  { %v1981_v4 = vadd.f32 %v1980_v3, %v1979_v1  ;;  %v2044_v5 = vpop.f32.mrb[13].mxu1  ;;  %v1982_v6 = vpop.f32.mrb[14].mxu0 }
 0x111   :  { %v2045_v7 = vadd.f32 %v2044_v5, %v2043_v2  ;;  %v2046_v8 = vpop.f32.mrb[14].mxu1  ;;  %v1983_v9 = vpop.f32.mrb[15].mxu0 }
 0x112   :  { %v1108_v10 = vadd.f32 %v1981_v4, %v2901_v18  ;;  %v1984_v11 = vadd.f32 %v1983_v9, %v1982_v6  ;;  %v2047_v12 = vpop.f32.mrb[15].mxu1 }
 0x113   :  { %v2048_v13 = vadd.f32 %v2047_v12, %v2046_v8 }
 0x114   :  { %v2922_v14 = vadd.f32 %v2045_v7, %v1108_v10  ;;  %v1111_v15 = vadd.f32 %v1984_v11, %v2901_v18 }
 0x116   :  { %v2925_v16 = vadd.f32 %v2048_v13, %v1111_v15  ;;  %v1985_v17 = vpop.f32.mrb[16].mxu0 }
 0x117   :  { %v2049_v19 = vpop.f32.mrb[16].mxu1  ;;  %v1986_v20 = vpop.f32.mrb[17].mxu0 }
 0x118   :  { %v1987_v21 = vadd.f32 %v1986_v20, %v1985_v17  ;;  %v2050_v22 = vpop.f32.mrb[17].mxu1  ;;  %v1988_v23 = vpop.f32.mrb[18].mxu0 }
 0x119   :  { %v2051_v24 = vadd.f32 %v2050_v22, %v2049_v19  ;;  %v2052_v25 = vpop.f32.mrb[18].mxu1  ;;  %v1989_v26 = vpop.f32.mrb[19].mxu0 }
 0x11a   :  { %v1116_v27 = vadd.f32 %v1987_v21, %v2901_v18  ;;  %v1990_v28 = vadd.f32 %v1989_v26, %v1988_v23  ;;  %v2053_v29 = vpop.f32.mrb[19].mxu1 }
 0x11b   :  { %v2054_v31 = vadd.f32 %v2053_v29, %v2052_v25 }
 0x11c   :  { %v2928_v33 = vadd.f32 %v2051_v24, %v1116_v27  ;;  %v1119_v34 = vadd.f32 %v1990_v28, %v2901_v18 }
 0x11e   :  { %v2931_v35 = vadd.f32 %v2054_v31, %v1119_v34  ;;  %v1991_v36 = vpop.f32.mrb[20].mxu0 }
 0x11f   :  { %v2055_v37 = vpop.f32.mrb[20].mxu1  ;;  %v1992_v38 = vpop.f32.mrb[21].mxu0 }
 0x120   :  { %v1993_v39 = vadd.f32 %v1992_v38, %v1991_v36  ;;  %v2056_v40 = vpop.f32.mrb[21].mxu1  ;;  %v1994_v41 = vpop.f32.mrb[22].mxu0 }
 0x121   :  { %v2057_v42 = vadd.f32 %v2056_v40, %v2055_v37  ;;  %v2058_v43 = vpop.f32.mrb[22].mxu1  ;;  %v1995_v44 = vpop.f32.mrb[23].mxu0 }
 0x122   :  { %v1124_v45 = vadd.f32 %v1993_v39, %v2901_v18  ;;  %v1996_v47 = vadd.f32 %v1995_v44, %v1994_v41  ;;  %v2059_v49 = vpop.f32.mrb[23].mxu1 }
 0x123   :  { %v2060_v50 = vadd.f32 %v2059_v49, %v2058_v43 }
 0x124   :  { %v2934_v51 = vadd.f32 %v2057_v42, %v1124_v45  ;;  %v1127_v52 = vadd.f32 %v1996_v47, %v2901_v18 }
 0x126   :  { %v2937_v53 = vadd.f32 %v2060_v50, %v1127_v52  ;;  %v1997_v54 = vpop.f32.mrb[24].mxu0 }
 0x127   :  { %v2061_v55 = vpop.f32.mrb[24].mxu1  ;;  %v1998_v56 = vpop.f32.mrb[25].mxu0 }
 0x128   :  { %v1999_v57 = vadd.f32 %v1998_v56, %v1997_v54  ;;  %v2062_v58 = vpop.f32.mrb[25].mxu1  ;;  %v2000_v59 = vpop.f32.mrb[26].mxu0 }
 0x129   :  { %v2063_v60 = vadd.f32 %v2062_v58, %v2061_v55  ;;  %v2064_v61 = vpop.f32.mrb[26].mxu1  ;;  %v2001_v63 = vpop.f32.mrb[27].mxu0 }
 0x12a   :  { %v1132_v1 = vadd.f32 %v1999_v57, %v2901_v18  ;;  %v2002_v2 = vadd.f32 %v2001_v63, %v2000_v59  ;;  %v2065_v3 = vpop.f32.mrb[27].mxu1 }
 0x12b   :  { %v2066_v4 = vadd.f32 %v2065_v3, %v2064_v61 }
 0x12c   :  { %v2940_v5 = vadd.f32 %v2063_v60, %v1132_v1  ;;  %v1135_v6 = vadd.f32 %v2002_v2, %v2901_v18 }
 0x12e   :  { %v2943_v7 = vadd.f32 %v2066_v4, %v1135_v6  ;;  %v2003_v8 = vpop.f32.mrb[28].mxu0 }
 0x12f   :  { %v2067_v9 = vpop.f32.mrb[28].mxu1  ;;  %v2004_v10 = vpop.f32.mrb[29].mxu0 }
 0x130   :  { %v2005_v11 = vadd.f32 %v2004_v10, %v2003_v8  ;;  %v2068_v12 = vpop.f32.mrb[29].mxu1  ;;  %v2006_v13 = vpop.f32.mrb[30].mxu0 }
 0x131   :  { %v2069_v15 = vadd.f32 %v2068_v12, %v2067_v9  ;;  %v2070_v17 = vpop.f32.mrb[30].mxu1  ;;  %v2007_v19 = vpop.f32.mrb[31].mxu0 }
 0x132   :  { %v1140_v20 = vadd.f32 %v2005_v11, %v2901_v18  ;;  %v2008_v21 = vadd.f32 %v2007_v19, %v2006_v13  ;;  %v2071_v22 = vpop.f32.mrb[31].mxu1 }
 0x133   :  { %v2072_v23 = vadd.f32 %v2071_v22, %v2070_v17 }
 0x134   :  { %v2946_v24 = vadd.f32 %v2069_v15, %v1140_v20  ;;  %v1143_v25 = vadd.f32 %v2008_v21, %v2901_v18 }
 0x136   :  { %v2949_v26 = vadd.f32 %v2072_v23, %v1143_v25  ;;  %v2089_v27 = vpop.f32.mrb[32].mxu0 }
 0x137   :  { %v2153_v28 = vpop.f32.mrb[32].mxu1  ;;  %v2090_v29 = vpop.f32.mrb[33].mxu0 }
 0x138   :  { %v2091_v31 = vadd.f32 %v2090_v29, %v2089_v27  ;;  %v2154_v34 = vpop.f32.mrb[33].mxu1  ;;  %v2092_v36 = vpop.f32.mrb[34].mxu0 }
 0x139   :  { %v2155_v37 = vadd.f32 %v2154_v34, %v2153_v28  ;;  %v2156_v38 = vpop.f32.mrb[34].mxu1  ;;  %v2093_v39 = vpop.f32.mrb[35].mxu0 }
 0x13a   :  { %v1278_v40 = vadd.f32 %v2091_v31, %v2904_v30  ;;  %v2094_v41 = vadd.f32 %v2093_v39, %v2092_v36  ;;  %v2157_v42 = vpop.f32.mrb[35].mxu1 }
 0x13b   :  { %v2158_v43 = vadd.f32 %v2157_v42, %v2156_v38 }
 0x13c   :  { %v1281_v44 = vadd.f32 %v2094_v41, %v2907_v32  ;;  %v2953_v45 = vadd.f32 %v2155_v37, %v1278_v40 }
 0x13e   :  { %v2095_v18 = vpop.f32.mrb[36].mxu0  ;;  %v2955_v47 = vadd.f32 %v2158_v43, %v1281_v44 }
 0x13f   :  { %v2159_v49 = vpop.f32.mrb[36].mxu1  ;;  %v2096_v50 = vpop.f32.mrb[37].mxu0 }
 0x140   :  { %v2097_v52 = vadd.f32 %v2096_v50, %v2095_v18  ;;  %v2160_v54 = vpop.f32.mrb[37].mxu1  ;;  %v2098_v55 = vpop.f32.mrb[38].mxu0 }
 0x141   :  { %v2161_v56 = vadd.f32 %v2160_v54, %v2159_v49  ;;  %v2162_v57 = vpop.f32.mrb[38].mxu1  ;;  %v2099_v58 = vpop.f32.mrb[39].mxu0 }
 0x142   :  { %v1286_v30 = vadd.f32 %v2097_v52, %v2910_v46  ;;  %v2100_v59 = vadd.f32 %v2099_v58, %v2098_v55  ;;  %v2163_v60 = vpop.f32.mrb[39].mxu1 }
 0x143   :  { %v2164_v61 = vadd.f32 %v2163_v60, %v2162_v57 }
 0x144   :  { %v1289_v32 = vadd.f32 %v2100_v59, %v2913_v48  ;;  %v2959_v63 = vadd.f32 %v2161_v56, %v1286_v30 }
 0x146   :  { %v2101_v1 = vpop.f32.mrb[40].mxu0  ;;  %v2961_v2 = vadd.f32 %v2164_v61, %v1289_v32 }
 0x147   :  { %v2165_v3 = vpop.f32.mrb[40].mxu1  ;;  %v2102_v4 = vpop.f32.mrb[41].mxu0 }
 0x148   :  { %v2103_v6 = vadd.f32 %v2102_v4, %v2101_v1  ;;  %v2166_v8 = vpop.f32.mrb[41].mxu1  ;;  %v2104_v9 = vpop.f32.mrb[42].mxu0 }
 0x149   :  { %v2167_v10 = vadd.f32 %v2166_v8, %v2165_v3  ;;  %v2168_v11 = vpop.f32.mrb[42].mxu1  ;;  %v2105_v12 = vpop.f32.mrb[43].mxu0 }
 0x14a   :  { %v1294_v46 = vadd.f32 %v2103_v6, %v2916_v62  ;;  %v2106_v13 = vadd.f32 %v2105_v12, %v2104_v9  ;;  %v2169_v15 = vpop.f32.mrb[43].mxu1 }
 0x14b   :  { %v2170_v17 = vadd.f32 %v2169_v15, %v2168_v11 }
 0x14c   :  { %v1297_v48 = vadd.f32 %v2106_v13, %v2919_v0  ;;  %v2965_v19 = vadd.f32 %v2167_v10, %v1294_v46 }
 0x14e   :  { %v2107_v20 = vpop.f32.mrb[44].mxu0  ;;  %v2967_v21 = vadd.f32 %v2170_v17, %v1297_v48 }
 0x14f   :  { %v2171_v22 = vpop.f32.mrb[44].mxu1  ;;  %v2108_v23 = vpop.f32.mrb[45].mxu0 }
 0x150   :  { %v2109_v25 = vadd.f32 %v2108_v23, %v2107_v20  ;;  %v2172_v27 = vpop.f32.mrb[45].mxu1  ;;  %v2110_v28 = vpop.f32.mrb[46].mxu0 }
 0x151   :  { %v2173_v29 = vadd.f32 %v2172_v27, %v2171_v22  ;;  %v2174_v31 = vpop.f32.mrb[46].mxu1  ;;  %v2111_v34 = vpop.f32.mrb[47].mxu0 }
 0x152   :  { %v1302_v62 = vadd.f32 %v2109_v25, %v2922_v14  ;;  %v2112_v36 = vadd.f32 %v2111_v34, %v2110_v28  ;;  %v2175_v37 = vpop.f32.mrb[47].mxu1 }
 0x153   :  { %v2176_v38 = vadd.f32 %v2175_v37, %v2174_v31 }
 0x154   :  { %v1305_v0 = vadd.f32 %v2112_v36, %v2925_v16  ;;  %v2971_v39 = vadd.f32 %v2173_v29, %v1302_v62 }
 0x156   :  { %v2113_v40 = vpop.f32.mrb[48].mxu0  ;;  %v2973_v41 = vadd.f32 %v2176_v38, %v1305_v0 }
 0x157   :  { %v2177_v42 = vpop.f32.mrb[48].mxu1  ;;  %v2114_v43 = vpop.f32.mrb[49].mxu0 }
 0x158   :  { %v2115_v44 = vadd.f32 %v2114_v43, %v2113_v40  ;;  %v2178_v18 = vpop.f32.mrb[49].mxu1  ;;  %v2116_v49 = vpop.f32.mrb[50].mxu0 }
 0x159   :  { %v2179_v50 = vadd.f32 %v2178_v18, %v2177_v42  ;;  %v2180_v52 = vpop.f32.mrb[50].mxu1  ;;  %v2117_v54 = vpop.f32.mrb[51].mxu0 }
 0x15a   :  { %v1310_v14 = vadd.f32 %v2115_v44, %v2928_v33  ;;  %v2118_v55 = vadd.f32 %v2117_v54, %v2116_v49  ;;  %v2181_v56 = vpop.f32.mrb[51].mxu1  ;;  %v1860_v54 = vld [vmem:[%s3076_s3] sm:$0xff]  }
 0x15b   :  { %v2182_v57 = vadd.f32 %v2181_v56, %v2180_v52  ;;  %v1935_v52 = vld [vmem:[%s3076_s3 + $0x28] sm:$0xff]   ;;  %v3008_v56 = vld [vmem:[%s3076_s3 + $0x18] sm:$0xff]  }
 0x15c   :  { %v1313_v16 = vadd.f32 %v2118_v55, %v2931_v35  ;;  %v2977_v58 = vadd.f32 %v2179_v50, %v1310_v14  ;;  %v1934_v55 = vld [vmem:[%s3076_s3 + $0x20] sm:$0xff]  }
 0x15e   :  { %v2119_v30 = vpop.f32.mrb[52].mxu0  ;;  %v2979_v59 = vadd.f32 %v2182_v57, %v1313_v16 }
 0x15f   :  { %v2183_v60 = vpop.f32.mrb[52].mxu1  ;;  %v2120_v61 = vpop.f32.mrb[53].mxu0 }
 0x160   :  { %v2121_v32 = vadd.f32 %v2120_v61, %v2119_v30  ;;  %v2184_v1 = vpop.f32.mrb[53].mxu1  ;;  %v2122_v3 = vpop.f32.mrb[54].mxu0  ;;  %v1881_v30 = vunpack.c.l.bf16 %v1935_v52  ;;  %v3013_v61 = vld [vmem:[%s3076_s3 + $0x38] sm:$0xff]  }
 0x161   :  { %v2185_v4 = vadd.f32 %v2184_v1, %v2183_v60  ;;  %v2186_v6 = vpop.f32.mrb[54].mxu1  ;;  %v2123_v8 = vpop.f32.mrb[55].mxu0  ;;  %v1861_v60 = vunpack.c.l.bf16 %v1860_v54  ;;  %v1877_v1 = vunpack.c.l.bf16 %v1934_v55 }
 0x162   :  { %v1318_v33 = vadd.f32 %v2121_v32, %v2934_v51  ;;  %v2124_v9 = vadd.f32 %v2123_v8, %v2122_v3  ;;  %v2187_v10 = vpop.f32.mrb[55].mxu1  ;;  %v3018_v32 = vld [vmem:[%s3076_s3 + $0x10] sm:$0xff]  }
 0x163   :  { %v2188_v11 = vadd.f32 %v2187_v10, %v2186_v6  ;;  %v3023_v6 = vld [vmem:[%s3076_s3 + $0x30] sm:$0xff]  }
 0x164   :  { %v1321_v35 = vadd.f32 %v2124_v9, %v2937_v53  ;;  %v1415_v12 = vadd.f32 %v2185_v4, %v1318_v33  ;;  %v1882_v4 = vunpack.c.h.bf16 %v1935_v52 }
 0x166   :  { %v2125_v46 = vpop.f32.mrb[56].mxu0  ;;  %v2983_v13 = vadd.f32 %v2188_v11, %v1321_v35  ;;  %v1862_v11 = vunpack.c.h.bf16 %v1860_v54  ;;  %v1878_v35 = vunpack.c.h.bf16 %v1934_v55 }
 0x167   :  { %v2189_v15 = vpop.f32.mrb[56].mxu1  ;;  %v2126_v17 = vpop.f32.mrb[57].mxu0 }
 0x168   :  { %v2127_v48 = vadd.f32 %v2126_v17, %v2125_v46  ;;  %v2190_v20 = vpop.f32.mrb[57].mxu1  ;;  %v2128_v22 = vpop.f32.mrb[58].mxu0  ;;  %v1873_v46 = vunpack.c.l.bf16 %v3008_v56 }
 0x169   :  { %v2191_v23 = vadd.f32 %v2190_v20, %v2189_v15  ;;  %v2192_v25 = vpop.f32.mrb[58].mxu1  ;;  %v2129_v27 = vpop.f32.mrb[59].mxu0 }
 0x16a   :  { %v1326_v28 = vadd.f32 %v2127_v48, %v2940_v5  ;;  %v2130_v51 = vadd.f32 %v2129_v27, %v2128_v22  ;;  %v2193_v29 = vpop.f32.mrb[59].mxu1  ;;  %v1889_v22 = vunpack.c.l.bf16 %v3013_v61 }
 0x16b   :  { %v2194_v31 = vadd.f32 %v2193_v29, %v2192_v25  ;;  %v1885_v29 = vunpack.c.l.bf16 %v3023_v6 }
 0x16c   :  { %v1329_v34 = vadd.f32 %v2130_v51, %v2943_v7  ;;  %v2987_v53 = vadd.f32 %v2191_v23, %v1326_v28  ;;  %v1931_v7 = vld [vmem:[%s3076_s3 + $0x8] sm:$0xff]   ;;  %v1869_v23 = vunpack.c.l.bf16 %v3018_v32 }
 0x16d   :  { %v1865_v16 = vunpack.c.l.bf16 %v1931_v7  ;;  %v1866_v3 = vunpack.c.h.bf16 %v1931_v7 }
 0x16e   :  { %v2131_v62 = vpop.f32.mrb[60].mxu0  ;;  %v2989_v36 = vadd.f32 %v2194_v31, %v1329_v34 }
 0x16f   :  { %v2195_v37 = vpop.f32.mrb[60].mxu1  ;;  %v2132_v38 = vpop.f32.mrb[61].mxu0 }
 0x170   :  { %v2133_v0 = vadd.f32 %v2132_v38, %v2131_v62  ;;  %v2196_v40 = vpop.f32.mrb[61].mxu1  ;;  %v2134_v42 = vpop.f32.mrb[62].mxu0 }
 0x171   :  { %v2197_v43 = vadd.f32 %v2196_v40, %v2195_v37  ;;  %v2198_v44 = vpop.f32.mrb[62].mxu1  ;;  %v2135_v18 = vpop.f32.mrb[63].mxu0  ;;  %v1874_v40 = vunpack.c.h.bf16 %v3008_v56 }
 0x172   :  { %v1334_v5 = vadd.f32 %v2133_v0, %v2946_v24  ;;  %v2136_v49 = vadd.f32 %v2135_v18, %v2134_v42  ;;  %v2199_v50 = vpop.f32.mrb[63].mxu1 }
 0x173   :  { %v2200_v14 = vadd.f32 %v2199_v50, %v2198_v44 }
 0x174   :  { %v1337_v24 = vadd.f32 %v2136_v49, %v2949_v26  ;;  %v1431_v57 = vadd.f32 %v2197_v43, %v1334_v5  ;;  %v1870_v43 = vunpack.c.h.bf16 %v3018_v32 }
 0x176   :  { %v2235_v26 = vpop.f32.mrb[64].mxu0  ;;  %v3025_v8 = vadd.f32 %v2200_v14, %v1337_v24 }
 0x177   :  { %v1480_v33 = vadd.f32 %v2235_v26, %v2959_v63  ;;  %v2243_v9 = vpop.f32.mrb[64].mxu1  ;;  %v1471_v10 = vpop.f32.mrb[65].mxu0 }
 0x178   :  { %v1512_v15 = vadd.f32 %v2243_v9, %v1415_v12  ;;  %v1472_v17 = vadd.f32 %v1471_v10, %v2953_v45  ;;  %v1503_v48 = vpop.f32.mrb[65].mxu1  ;;  %v2236_v20 = vpop.f32.mrb[66].mxu0 }
 0x179   :  { %v1568_v25 = vadd.f32 %v1865_v16, %v1480_v33  ;;  %v1504_v27 = vadd.f32 %v1503_v48, %v2977_v58  ;;  %v1483_v63 = vadd.f32 %v2236_v20, %v2961_v2  ;;  %v2244_v28 = vpop.f32.mrb[66].mxu1  ;;  %v1474_v51 = vpop.f32.mrb[67].mxu0  ;;  %v1890_v2 = vunpack.c.h.bf16 %v3013_v61 }
 0x17a   :  { %v1576_v31 = vadd.f32 %v1881_v30, %v1512_v15  ;;  %v1566_v34 = vadd.f32 %v1861_v60, %v1472_v17  ;;  %v1515_v12 = vadd.f32 %v2244_v28, %v2983_v13  ;;  %v1475_v45 = vadd.f32 %v1474_v51, %v2955_v47  ;;  %v1506_v62 = vpop.f32.mrb[67].mxu1 }
 0x17b   :  { %v1574_v37 = vadd.f32 %v1877_v1, %v1504_v27  ;;  %v1569_v38 = vadd.f32 %v1866_v3, %v1483_v63  ;;  %v1507_v0 = vadd.f32 %v1506_v62, %v2979_v59  ;;  %v1584_v44 = vmax.f32 %v1568_v25, 0.0 }
 0x17c   :  { %v1577_v58 = vadd.f32 %v1882_v4, %v1515_v12  ;;  %v1567_v42 = vadd.f32 %v1862_v11, %v1475_v45  ;;  %v1886_v13 = vunpack.c.h.bf16 %v3023_v6  ;;  %v1592_v49 = vmax.f32 %v1576_v31, 0.0 }
 0x17d   :  { %v1585_v18 = vmax.f32 %v1569_v38, 0.0  ;;  %v1575_v5 = vadd.f32 %v1878_v35, %v1507_v0  ;;  %v1582_v47 = vmax.f32 %v1566_v34, 0.0  ;;  %v1590_v54 = vmax.f32 %v1574_v37, 0.0 }
 0x17e   :  { %v1593_v50 = vmax.f32 %v1577_v58, 0.0  ;;  %v1583_v7 = vmax.f32 %v1567_v42, 0.0  ;;  %v2239_v52 = vpop.f32.mrb[68].mxu0 }
 0x17f   :  { %v1899_v59 = vpack.c.bf16 %v1585_v18, %v1584_v44  ;;  %v1591_v14 = vmax.f32 %v1575_v5, 0.0  ;;  %v1496_v55 = vadd.f32 %v2239_v52, %v2971_v39  ;;  %v2247_v24 = vpop.f32.mrb[68].mxu1  ;;  %v1487_v56 = vpop.f32.mrb[69].mxu0 }
 0x180   :  { %v1919_v16 = vpack.c.bf16 %v1593_v50, %v1592_v49  ;;  %v1894_v30 = vpack.c.bf16 %v1583_v7, %v1582_v47  ;;  %v1528_v60 = vadd.f32 %v2247_v24, %v1431_v57  ;;  %v1488_v61 = vadd.f32 %v1487_v56, %v2965_v19  ;;  %v1519_v32 = vpop.f32.mrb[69].mxu1  ;;  %v2240_v26 = vpop.f32.mrb[70].mxu0 }
 0x181   :  { %1938 = vst [vmem:[%s3077_s4 + $0x8] sm:$0xff] %v1899_v59   ;;  %v1914_v1 = vpack.c.bf16 %v1591_v14, %v1590_v54  ;;  %v1572_v3 = vadd.f32 %v1873_v46, %v1496_v55  ;;  %v1520_v4 = vadd.f32 %v1519_v32, %v2987_v53  ;;  %v1499_v6 = vadd.f32 %v2240_v26, %v2973_v41  ;;  %v2248_v39 = vpop.f32.mrb[70].mxu1  ;;  %v1490_v33 = vpop.f32.mrb[71].mxu0 }
 0x182   :  { %1942 = vst [vmem:[%s3077_s4 + $0x28] sm:$0xff] %v1919_v16   ;;  %1895 = vst [vmem:[%s3077_s4] sm:$0xff] %v1894_v30   ;;  %v1580_v19 = vadd.f32 %v1889_v22, %v1528_v60  ;;  %v1570_v57 = vadd.f32 %v1869_v23, %v1488_v61  ;;  %v1531_v9 = vadd.f32 %v2248_v39, %v3025_v8  ;;  %v1522_v11 = vpop.f32.mrb[71].mxu1 }
 0x183   :  { %v1491_v10 = vadd.f32 %v1490_v33, %v2967_v21  ;;  %1941 = vst [vmem:[%s3077_s4 + $0x20] sm:$0xff] %v1914_v1   ;;  %v1578_v41 = vadd.f32 %v1885_v29, %v1520_v4  ;;  %v1573_v53 = vadd.f32 %v1874_v40, %v1499_v6  ;;  %v1523_v35 = vadd.f32 %v1522_v11, %v2989_v36 }
 0x184   :  { %v1581_v46 = vadd.f32 %v1890_v2, %v1531_v9  ;;  %v1588_v17 = vmax.f32 %v1572_v3, 0.0  ;;  %v1596_v22 = vmax.f32 %v1580_v19, 0.0  ;;  %v1586_v23 = vmax.f32 %v1570_v57, 0.0 }
 0x185   :  { %v1571_v15 = vadd.f32 %v1870_v43, %v1491_v10  ;;  %v1589_v48 = vmax.f32 %v1573_v53, 0.0  ;;  %v1579_v20 = vadd.f32 %v1886_v13, %v1523_v35  ;;  %v1594_v27 = vmax.f32 %v1578_v41, 0.0 }
 0x186   :  { %v1597_v25 = vmax.f32 %v1581_v46, 0.0 }
 0x187   :  { %v1587_v8 = vmax.f32 %v1571_v15, 0.0  ;;  %v1909_v21 = vpack.c.bf16 %v1589_v48, %v1588_v17  ;;  %v1595_v63 = vmax.f32 %v1579_v20, 0.0 }
 0x188   :  { %v1929_v28 = vpack.c.bf16 %v1597_v25, %v1596_v22 }
 0x189   :  { %v1904_v51 = vpack.c.bf16 %v1587_v8, %v1586_v23  ;;  %1940 = vst [vmem:[%s3077_s4 + $0x18] sm:$0xff] %v1909_v21   ;;  %v1924_v29 = vpack.c.bf16 %v1595_v63, %v1594_v27 }
 0x18a   :  { %1944 = vst [vmem:[%s3077_s4 + $0x38] sm:$0xff] %v1929_v28  }
 0x18b   :  { %1939 = vst [vmem:[%s3077_s4 + $0x10] sm:$0xff] %v1904_v51   ;;  %1943 = vst [vmem:[%s3077_s4 + $0x30] sm:$0xff] %v1924_v29  }

// kernel: _lambda_.13
= control target key start
LH: loop header
LB: loop body
LE: loop exit
PB: predicated region body
PF: predicated region fallthrough
CT: control target
= control target key end

     0   :  { %s1632_s1 = inlined_call_operand.vmem [shape: bf16[1152,128], index: 1, kind: input, shape index: {}]   ;;  %s1633_s0 = inlined_call_operand.vmem [shape: bf16[32,1152], index: 0, kind: input, shape index: {}]   ;;  %s1634_s2 = inlined_call_operand.vmem [shape: f32[1,128], index: 2, kind: input, shape index: {}]   ;;  %s1635_s3 = inlined_call_operand.vmem [shape: bf16[32,128], index: 3, kind: output, shape index: {}]  }
   0x1   :  { %v1235_v0 = vld [vmem:[%s1632_s1 + $0x40] sm:$0xff]   ;;  %v1239_v4 = vld [vmem:[%s1632_s1 + $0x48] sm:$0xff]   ;;  %v1243_v8 = vld [vmem:[%s1632_s1 + $0x50] sm:$0xff]  }
   0x2   :  { %v1236_v1 = vld [vmem:[%s1632_s1] sm:$0xff]   ;;  %1093 = vmatprep.subr.bf16.mxu0 %v1235_v0  ;;  %v1240_v5 = vld [vmem:[%s1632_s1 + $0x8] sm:$0xff]   ;;  %v1244_v9 = vld [vmem:[%s1632_s1 + $0x10] sm:$0xff]  }
   0x3   :  { %v1237_v2 = vld [vmem:[%s1632_s1 + $0xc0] sm:$0xff]   ;;  %1094 = vmatpush3.bf16.msra.mxu0 %v1236_v1  ;;  %v1241_v6 = vld [vmem:[%s1632_s1 + $0xc8] sm:$0xff]   ;;  %v1245_v10 = vld [vmem:[%s1632_s1 + $0xd0] sm:$0xff]  }
   0x4   :  { %v1238_v3 = vld [vmem:[%s1632_s1 + $0x80] sm:$0xff]   ;;  %1121 = vmatprep.subr.bf16.mxu1 %v1237_v2  ;;  %1095 = vmatprep.subr.bf16.mxu0 %v1239_v4  ;;  %v1242_v7 = vld [vmem:[%s1632_s1 + $0x88] sm:$0xff]   ;;  %v1246_v11 = vld [vmem:[%s1632_s1 + $0x90] sm:$0xff]  }
   0x5   :  { %1122 = vmatpush3.bf16.msra.mxu1 %v1238_v3  ;;  %v1247_v12 = vld [vmem:[%s1632_s1 + $0x58] sm:$0xff]   ;;  %v1251_v16 = vld [vmem:[%s1632_s1 + $0x60] sm:$0xff]   ;;  %v1255_v20 = vld [vmem:[%s1632_s1 + $0x68] sm:$0xff]  }
   0x6   :  { %1123 = vmatprep.subr.bf16.mxu1 %v1241_v6  ;;  %v1248_v13 = vld [vmem:[%s1632_s1 + $0x18] sm:$0xff]   ;;  %v1252_v17 = vld [vmem:[%s1632_s1 + $0x20] sm:$0xff]   ;;  %v1256_v21 = vld [vmem:[%s1632_s1 + $0x28] sm:$0xff]  }
   0x7   :  { %1096 = vmatpush3.bf16.msra.mxu0 %v1240_v5  ;;  %v1249_v14 = vld [vmem:[%s1632_s1 + $0xd8] sm:$0xff]   ;;  %v1253_v18 = vld [vmem:[%s1632_s1 + $0xe0] sm:$0xff]   ;;  %v1257_v22 = vld [vmem:[%s1632_s1 + $0xe8] sm:$0xff]  }
   0x8   :  { %1097 = vmatprep.subr.bf16.mxu0 %v1243_v8  ;;  %v1250_v15 = vld [vmem:[%s1632_s1 + $0x98] sm:$0xff]   ;;  %v1254_v19 = vld [vmem:[%s1632_s1 + $0xa0] sm:$0xff]   ;;  %v1258_v23 = vld [vmem:[%s1632_s1 + $0xa8] sm:$0xff]  }
   0x9   :  { %1124 = vmatpush3.bf16.msra.mxu1 %v1242_v7  ;;  %v1259_v24 = vld [vmem:[%s1632_s1 + $0x70] sm:$0xff]   ;;  %v1263_v28 = vld [vmem:[%s1632_s1 + $0x78] sm:$0xff]   ;;  %v1266_v31 = vld [vmem:[%s1633_s0] ss:$36 sps:$4 sm:$0xff]  }
   0xa   :  { %1125 = vmatprep.subr.bf16.mxu1 %v1245_v10  ;;  %v1260_v25 = vld [vmem:[%s1632_s1 + $0x30] sm:$0xff]   ;;  %v1264_v29 = vld [vmem:[%s1632_s1 + $0x38] sm:$0xff]   ;;  %v1268_v32 = vld [vmem:[%s1633_s0 + $0x4] ss:$36 sps:$4 sm:$0xff]  }
   0xb   :  { %1098 = vmatpush3.bf16.msra.mxu0 %v1244_v9  ;;  %v1261_v26 = vld [vmem:[%s1632_s1 + $0xf0] sm:$0xff]   ;;  %v1265_v30 = vld [vmem:[%s1632_s1 + $0xf8] sm:$0xff]   ;;  %742 = vmatprep.mubr.bf16.mxu0 %v1268_v32  ;;  %v1270_v34 = vld [vmem:[%s1632_s1 + $0x140] sm:$0xff]  }
   0xc   :  { %1099 = vmatprep.subr.bf16.mxu0 %v1247_v12  ;;  %v1262_v27 = vld [vmem:[%s1632_s1 + $0xb0] sm:$0xff]   ;;  %v1269_v33 = vld [vmem:[%s1632_s1 + $0xb8] sm:$0xff]   ;;  %v1271_v35 = vld [vmem:[%s1633_s0 + $0x8] ss:$36 sps:$4 sm:$0xff]  }
   0xd   :  { %1126 = vmatpush3.bf16.msra.mxu1 %v1246_v11  ;;  %v1273_v36 = vld [vmem:[%s1633_s0 + $0xc] ss:$36 sps:$4 sm:$0xff]   ;;  %v1274_v37 = vld [vmem:[%s1632_s1 + $0x100] sm:$0xff]   ;;  %v1285_v48 = vld [vmem:[%s1632_s1 + $0x158] sm:$0xff]  }
   0xe   :  { %1127 = vmatprep.subr.bf16.mxu1 %v1249_v14  ;;  %791 = vmatprep.mubr.bf16.mxu1 %v1273_v36  ;;  %v1275_v38 = vld [vmem:[%s1632_s1 + $0x1c0] sm:$0xff]   ;;  %v1277_v40 = vld [vmem:[%s1632_s1 + $0x148] sm:$0xff]   ;;  %v1281_v44 = vld [vmem:[%s1632_s1 + $0x150] sm:$0xff]  }
   0xf   :  { %1100 = vmatpush3.bf16.msra.mxu0 %v1248_v13  ;;  %v1276_v39 = vld [vmem:[%s1632_s1 + $0x180] sm:$0xff]   ;;  %v1278_v41 = vld [vmem:[%s1632_s1 + $0x108] sm:$0xff]   ;;  %v1282_v45 = vld [vmem:[%s1632_s1 + $0x110] sm:$0xff]  }
  0x10   :  { %1101 = vmatprep.subr.bf16.mxu0 %v1251_v16  ;;  %v1279_v42 = vld [vmem:[%s1632_s1 + $0x1c8] sm:$0xff]   ;;  %v1283_v46 = vld [vmem:[%s1632_s1 + $0x1d0] sm:$0xff]   ;;  %v1286_v49 = vld [vmem:[%s1632_s1 + $0x118] sm:$0xff]  }
  0x11   :  { %1128 = vmatpush3.bf16.msra.mxu1 %v1250_v15  ;;  %v1280_v43 = vld [vmem:[%s1632_s1 + $0x188] sm:$0xff]   ;;  %v1284_v47 = vld [vmem:[%s1632_s1 + $0x190] sm:$0xff]   ;;  %v1287_v50 = vld [vmem:[%s1632_s1 + $0x1d8] sm:$0xff]  }
  0x12   :  { %1129 = vmatprep.subr.bf16.mxu1 %v1253_v18  ;;  %v1288_v51 = vld [vmem:[%s1632_s1 + $0x198] sm:$0xff]   ;;  %v1289_v52 = vld [vmem:[%s1632_s1 + $0x160] sm:$0xff]   ;;  %v1293_v56 = vld [vmem:[%s1632_s1 + $0x168] sm:$0xff]  }
  0x13   :  { %1102 = vmatpush3.bf16.msra.mxu0 %v1252_v17  ;;  %v1290_v53 = vld [vmem:[%s1632_s1 + $0x120] sm:$0xff]   ;;  %v1294_v57 = vld [vmem:[%s1633_s0 + $0x4c] ss:$36 sps:$4 sm:$0xff]   ;;  %v1299_v61 = vld [vmem:[%s1633_s0 + $0x54] ss:$36 sps:$4 sm:$0xff]  }
  0x14   :  { %1103 = vmatprep.subr.bf16.mxu0 %v1255_v20  ;;  %v1291_v54 = vld [vmem:[%s1632_s1 + $0x1e0] sm:$0xff]   ;;  %v1296_v58 = vld [vmem:[%s1632_s1 + $0x128] sm:$0xff]   ;;  %v1302_v63 = vld [vmem:[%s1633_s0 + $0x50] ss:$36 sps:$4 sm:$0xff]  }
  0x15   :  { %1130 = vmatpush3.bf16.msra.mxu1 %v1254_v19  ;;  %v1292_v55 = vld [vmem:[%s1632_s1 + $0x1a0] sm:$0xff]   ;;  %v1297_v59 = vld [vmem:[%s1633_s0 + $0x48] ss:$36 sps:$4 sm:$0xff]   ;;  %v1303_v0 = vld [vmem:[%s1632_s1 + $0x170] sm:$0xff]  }
  0x16   :  { %1131 = vmatprep.subr.bf16.mxu1 %v1257_v22  ;;  %v1298_v60 = vld [vmem:[%s1632_s1 + $0x1e8] sm:$0xff]   ;;  %v1304_v1 = vld [vmem:[%s1632_s1 + $0x130] sm:$0xff]   ;;  %v1307_v4 = vld [vmem:[%s1632_s1 + $0x178] sm:$0xff]  }
  0x17   :  { %1104 = vmatpush3.bf16.msra.mxu0 %v1256_v21  ;;  %v1301_v62 = vld [vmem:[%s1632_s1 + $0x1a8] sm:$0xff]   ;;  %v1305_v2 = vld [vmem:[%s1632_s1 + $0x1f0] sm:$0xff]   ;;  %v1308_v5 = vld [vmem:[%s1632_s1 + $0x138] sm:$0xff]  }
  0x18   :  { %1105 = vmatprep.subr.bf16.mxu0 %v1259_v24  ;;  %v1306_v3 = vld [vmem:[%s1632_s1 + $0x1b0] sm:$0xff]   ;;  %v1309_v6 = vld [vmem:[%s1632_s1 + $0x1f8] sm:$0xff]   ;;  %v1314_v10 = vld [vmem:[%s1632_s1 + $0x200] sm:$0xff]  }
  0x19   :  { %1132 = vmatpush3.bf16.msra.mxu1 %v1258_v23  ;;  %v1310_v7 = vld [vmem:[%s1633_s0 + $0x10] ss:$36 sps:$4 sm:$0xff]   ;;  %v1313_v9 = vld [vmem:[%s1632_s1 + $0x1b8] sm:$0xff]   ;;  %v1318_v13 = vld [vmem:[%s1632_s1 + $0x208] sm:$0xff]  }
  0x1a   :  { %1133 = vmatprep.subr.bf16.mxu1 %v1261_v26  ;;  %v1312_v8 = vld [vmem:[%s1633_s0 + $0x14] ss:$36 sps:$4 sm:$0xff]   ;;  %v1317_v12 = vld [vmem:[%s1633_s0 + $0x1c] ss:$36 sps:$4 sm:$0xff]   ;;  %v1323_v17 = vld [vmem:[%s1633_s0 + $0x64] ss:$36 sps:$4 sm:$0xff]  }
  0x1b   :  { %1106 = vmatpush3.bf16.msra.mxu0 %v1260_v25  ;;  %v1315_v11 = vld [vmem:[%s1633_s0 + $0x18] ss:$36 sps:$4 sm:$0xff]   ;;  %v1322_v16 = vld [vmem:[%s1632_s1 + $0x210] sm:$0xff]   ;;  %v1325_v18 = vld [vmem:[%s1633_s0 + $0x60] ss:$36 sps:$4 sm:$0xff]  }
  0x1c   :  { %1107 = vmatprep.subr.bf16.mxu0 %v1263_v28  ;;  %v1319_v14 = vld [vmem:[%s1633_s0 + $0x5c] ss:$36 sps:$4 sm:$0xff]   ;;  %v1328_v22 = vld [vmem:[%s1632_s1 + $0x228] sm:$0xff]   ;;  %v1329_v23 = vld [vmem:[%s1632_s1 + $0x230] sm:$0xff]  }
  0x1d   :  { %1134 = vmatpush3.bf16.msra.mxu1 %v1262_v27  ;;  %v1321_v15 = vld [vmem:[%s1633_s0 + $0x58] ss:$36 sps:$4 sm:$0xff]   ;;  %v1327_v20 = vld [vmem:[%s1632_s1 + $0x220] sm:$0xff]   ;;  %v1332_v25 = vld [vmem:[%s1633_s0 + $0x68] ss:$36 sps:$4 sm:$0xff]  }
  0x1e   :  { %1135 = vmatprep.subr.bf16.mxu1 %v1265_v30  ;;  %v1326_v19 = vld [vmem:[%s1632_s1 + $0x218] sm:$0xff]   ;;  %v1331_v21 = vld [vmem:[%s1633_s0 + $0x20] ss:$36 sps:$4 sm:$0xff]  }
  0x1f   :  { %1108 = vmatpush3.bf16.msra.mxu0 %v1264_v29  ;;  %v1330_v24 = vld [vmem:[%s1632_s1 + $0x238] sm:$0xff]   ;;  %v983_v27 = vld [vmem:[%s1634_s2] ss:$0 sm:$0xff] }
  0x20   :  { %1149 = vmatprep.subr.bf16.mxu0 %v1270_v34 }
  0x21   :  { %1136 = vmatpush3.bf16.msra.mxu1 %v1269_v33 }
  0x22   :  { %743 = vmatmul.mubr.bf16.vlgmr.msra.gmra.mrb[0].mxu0 %v1266_v31  ;;  %1177 = vmatprep.subr.bf16.mxu1 %v1275_v38 }
  0x23   :  { %1150 = vmatpush3.bf16.msra.mxu0 %v1274_v37  ;;  %750 = vmatprep.mubr.bf16.mxu0 %v1294_v57 }
  0x24   :  { %792 = vmatmul.mubr.bf16.vlgmr.msra.gmra.mrb[0].mxu1 %v1271_v35  ;;  %1151 = vmatprep.subr.bf16.mxu0 %v1277_v40 }
  0x25   :  { %1178 = vmatpush3.bf16.msra.mxu1 %v1276_v39  ;;  %799 = vmatprep.mubr.bf16.mxu1 %v1299_v61 }
  0x26   :  { %1179 = vmatprep.subr.bf16.mxu1 %v1279_v42 }
  0x27   :  { %1152 = vmatpush3.bf16.msra.mxu0 %v1278_v41 }
  0x28   :  { %1153 = vmatprep.subr.bf16.mxu0 %v1281_v44 }
  0x29   :  { %1180 = vmatpush3.bf16.msra.mxu1 %v1280_v43 }
  0x2a   :  { %1181 = vmatprep.subr.bf16.mxu1 %v1283_v46  ;;  %751 = vmatmul.mubr.bf16.gmra.mrb[4].mxu0 %v1297_v59 }
  0x2b   :  { %1154 = vmatpush3.bf16.msra.mxu0 %v1282_v45  ;;  %840 = vmatprep.mubr.bf16.mxu0 %v1312_v8 }
  0x2c   :  { %1155 = vmatprep.subr.bf16.mxu0 %v1285_v48  ;;  %800 = vmatmul.mubr.bf16.gmra.mrb[4].mxu1 %v1302_v63 }
  0x2d   :  { %1182 = vmatpush3.bf16.msra.mxu1 %v1284_v47  ;;  %889 = vmatprep.mubr.bf16.mxu1 %v1317_v12 }
  0x2e   :  { %1183 = vmatprep.subr.bf16.mxu1 %v1287_v50 }
  0x2f   :  { %1156 = vmatpush3.bf16.msra.mxu0 %v1286_v49 }
  0x30   :  { %1157 = vmatprep.subr.bf16.mxu0 %v1289_v52 }
  0x31   :  { %1184 = vmatpush3.bf16.msra.mxu1 %v1288_v51 }
  0x32   :  { %1185 = vmatprep.subr.bf16.mxu1 %v1291_v54 }
  0x33   :  { %1158 = vmatpush3.bf16.msra.mxu0 %v1290_v53 }
  0x34   :  { %1159 = vmatprep.subr.bf16.mxu0 %v1293_v56 }
  0x35   :  { %1186 = vmatpush3.bf16.msra.mxu1 %v1292_v55 }
  0x36   :  { %1187 = vmatprep.subr.bf16.mxu1 %v1298_v60 }
  0x37   :  { %1160 = vmatpush3.bf16.msra.mxu0 %v1296_v58 }
  0x38   :  { %1161 = vmatprep.subr.bf16.mxu0 %v1303_v0 }
  0x39   :  { %1188 = vmatpush3.bf16.msra.mxu1 %v1301_v62 }
  0x3a   :  { %1189 = vmatprep.subr.bf16.mxu1 %v1305_v2 }
  0x3b   :  { %1162 = vmatpush3.bf16.msra.mxu0 %v1304_v1 }
  0x3c   :  { %1163 = vmatprep.subr.bf16.mxu0 %v1307_v4 }
  0x3d   :  { %1190 = vmatpush3.bf16.msra.mxu1 %v1306_v3 }
  0x3e   :  { %1191 = vmatprep.subr.bf16.mxu1 %v1309_v6 }
  0x3f   :  { %1164 = vmatpush3.bf16.msra.mxu0 %v1308_v5 }
  0x40   :  { %1215 = vmatprep.subr.bf16.mxu0 %v1314_v10 }
  0x41   :  { %1192 = vmatpush3.bf16.msra.mxu1 %v1313_v9 }
  0x42   :  { %841 = vmatmul.mubr.bf16.vlgmr.msra.gmra.mrb[8].mxu0 %v1310_v7 }
  0x43   :  { %1216 = vmatpush3.bf16.msra.mxu0 %v1314_v10  ;;  %848 = vmatprep.mubr.bf16.mxu0 %v1319_v14 }
  0x44   :  { %890 = vmatmul.mubr.bf16.vlgmr.msra.gmra.mrb[8].mxu1 %v1315_v11  ;;  %1217 = vmatprep.subr.bf16.mxu0 %v1318_v13 }
  0x45   :  { %897 = vmatprep.mubr.bf16.mxu1 %v1323_v17 }
  0x47   :  { %1218 = vmatpush3.bf16.msra.mxu0 %v1318_v13 }
  0x48   :  { %1219 = vmatprep.subr.bf16.mxu0 %v1322_v16 }
  0x4a   :  { %849 = vmatmul.mubr.bf16.gmra.mrb[12].mxu0 %v1321_v15 }
  0x4b   :  { %1220 = vmatpush3.bf16.msra.mxu0 %v1322_v16  ;;  %1231 = vmatprep.mubr.bf16.mxu0 %v1331_v21 }
  0x4c   :  { %898 = vmatmul.mubr.bf16.gmra.mrb[12].mxu1 %v1325_v18  ;;  %1221 = vmatprep.subr.bf16.mxu0 %v1326_v19 }
  0x4f   :  { %1222 = vmatpush3.bf16.msra.mxu0 %v1326_v19 }
  0x50   :  { %1223 = vmatprep.subr.bf16.mxu0 %v1327_v20 }
  0x53   :  { %1224 = vmatpush3.bf16.msra.mxu0 %v1327_v20 }
  0x54   :  { %1225 = vmatprep.subr.bf16.mxu0 %v1328_v22 }
  0x57   :  { %1226 = vmatpush3.bf16.msra.mxu0 %v1328_v22 }
  0x58   :  { %1227 = vmatprep.subr.bf16.mxu0 %v1329_v23 }
  0x5b   :  { %1228 = vmatpush3.bf16.msra.mxu0 %v1329_v23 }
  0x5c   :  { %1229 = vmatprep.subr.bf16.mxu0 %v1330_v24 }
  0x5f   :  { %1230 = vmatpush3.bf16.msra.mxu0 %v1330_v24 }
  0x62   :  { %1232 = vmatmul.mubr.bf16.vlgmr.msra.gmra.mrb[16].mxu0 %v1332_v25 }
  0xf5   :  { %v1109_v26 = vpop.f32.mrb[0].mxu0 }
  0xf6   :  { %v1110_v28 = vpop.f32.mrb[1].mxu0 }
  0xf7   :  { %v1111_v29 = vadd.f32 %v1110_v28, %v1109_v26  ;;  %v1112_v30 = vpop.f32.mrb[2].mxu0  ;;  %v1137_v31 = vpop.f32.mrb[0].mxu1 }
  0xf8   :  { %v1113_v32 = vpop.f32.mrb[3].mxu0  ;;  %v1138_v35 = vpop.f32.mrb[1].mxu1 }
  0xf9   :  { %v745_v33 = vadd.f32 %v1111_v29, %v983_v27  ;;  %v1114_v34 = vadd.f32 %v1113_v32, %v1112_v30  ;;  %v1139_v36 = vadd.f32 %v1138_v35, %v1137_v31  ;;  %v1140_v37 = vpop.f32.mrb[2].mxu1 }
  0xfa   :  { %v1141_v39 = vpop.f32.mrb[3].mxu1 }
  0xfb   :  { %v748_v38 = vadd.f32 %v1114_v34, %v983_v27  ;;  %v794_v40 = vadd.f32 %v1139_v36, %v745_v33  ;;  %v1142_v41 = vadd.f32 %v1141_v39, %v1140_v37 }
  0xfd   :  { %v797_v42 = vadd.f32 %v1142_v41, %v748_v38  ;;  %v1115_v43 = vpop.f32.mrb[4].mxu0 }
  0xfe   :  { %v1116_v44 = vpop.f32.mrb[5].mxu0 }
  0xff   :  { %v1117_v45 = vadd.f32 %v1116_v44, %v1115_v43  ;;  %v1118_v46 = vpop.f32.mrb[6].mxu0  ;;  %v1143_v47 = vpop.f32.mrb[4].mxu1 }
 0x100   :  { %v1119_v48 = vpop.f32.mrb[7].mxu0  ;;  %v1144_v51 = vpop.f32.mrb[5].mxu1 }
 0x101   :  { %v753_v49 = vadd.f32 %v1117_v45, %v983_v27  ;;  %v1120_v50 = vadd.f32 %v1119_v48, %v1118_v46  ;;  %v1145_v52 = vadd.f32 %v1144_v51, %v1143_v47  ;;  %v1146_v53 = vpop.f32.mrb[6].mxu1 }
 0x102   :  { %v1147_v55 = vpop.f32.mrb[7].mxu1 }
 0x103   :  { %v756_v54 = vadd.f32 %v1120_v50, %v983_v27  ;;  %v802_v56 = vadd.f32 %v1145_v52, %v753_v49  ;;  %v1148_v57 = vadd.f32 %v1147_v55, %v1146_v53 }
 0x105   :  { %v805_v58 = vadd.f32 %v1148_v57, %v756_v54 }
 0x115   :  { %v1165_v59 = vpop.f32.mrb[8].mxu0 }
 0x116   :  { %v1166_v60 = vpop.f32.mrb[9].mxu0 }
 0x117   :  { %v1167_v61 = vadd.f32 %v1166_v60, %v1165_v59  ;;  %v1168_v62 = vpop.f32.mrb[10].mxu0  ;;  %v1193_v63 = vpop.f32.mrb[8].mxu1 }
 0x118   :  { %v1169_v0 = vpop.f32.mrb[11].mxu0  ;;  %v1194_v3 = vpop.f32.mrb[9].mxu1 }
 0x119   :  { %v843_v1 = vadd.f32 %v1167_v61, %v794_v40  ;;  %v1170_v2 = vadd.f32 %v1169_v0, %v1168_v62  ;;  %v1195_v4 = vadd.f32 %v1194_v3, %v1193_v63  ;;  %v1196_v5 = vpop.f32.mrb[10].mxu1 }
 0x11a   :  { %v1197_v7 = vpop.f32.mrb[11].mxu1 }
 0x11b   :  { %v846_v6 = vadd.f32 %v1170_v2, %v797_v42  ;;  %v1198_v8 = vadd.f32 %v1197_v7, %v1196_v5  ;;  %v892_v9 = vadd.f32 %v1195_v4, %v843_v1 }
 0x11d   :  { %v1171_v10 = vpop.f32.mrb[12].mxu0  ;;  %v895_v12 = vadd.f32 %v1198_v8, %v846_v6 }
 0x11e   :  { %v1172_v11 = vpop.f32.mrb[13].mxu0 }
 0x11f   :  { %v1173_v13 = vadd.f32 %v1172_v11, %v1171_v10  ;;  %v1174_v14 = vpop.f32.mrb[14].mxu0  ;;  %v1199_v15 = vpop.f32.mrb[12].mxu1 }
 0x120   :  { %v1175_v16 = vpop.f32.mrb[15].mxu0  ;;  %v1200_v19 = vpop.f32.mrb[13].mxu1 }
 0x121   :  { %v851_v17 = vadd.f32 %v1173_v13, %v802_v56  ;;  %v1176_v18 = vadd.f32 %v1175_v16, %v1174_v14  ;;  %v1201_v20 = vadd.f32 %v1200_v19, %v1199_v15  ;;  %v1202_v21 = vpop.f32.mrb[14].mxu1 }
 0x122   :  { %v1203_v23 = vpop.f32.mrb[15].mxu1 }
 0x123   :  { %v854_v22 = vadd.f32 %v1176_v18, %v805_v58  ;;  %v1204_v24 = vadd.f32 %v1203_v23, %v1202_v21  ;;  %v900_v25 = vadd.f32 %v1201_v20, %v851_v17 }
 0x125   :  { %v903_v26 = vadd.f32 %v1204_v24, %v854_v22 }
 0x135   :  { %v1233_v27 = vpop.f32.mrb[16].mxu0 }
 0x136   :  { %v949_v28 = vadd.f32 %v1233_v27, %v900_v25  ;;  %v940_v29 = vpop.f32.mrb[17].mxu0 }
 0x137   :  { %v941_v30 = vadd.f32 %v940_v29, %v892_v9  ;;  %v1234_v31 = vpop.f32.mrb[18].mxu0 }
 0x138   :  { %v952_v32 = vadd.f32 %v1234_v31, %v903_v26  ;;  %v943_v33 = vpop.f32.mrb[19].mxu0  ;;  %v957_v35 = vmax.f32 %v949_v28, 0.0 }
 0x139   :  { %v944_v34 = vadd.f32 %v943_v33, %v895_v12  ;;  %v955_v37 = vmax.f32 %v941_v30, 0.0 }
 0x13a   :  { %v958_v36 = vmax.f32 %v952_v32, 0.0 }
 0x13b   :  { %v956_v38 = vmax.f32 %v944_v34, 0.0 }
 0x13c   :  { %v1090_v39 = vpack.c.bf16 %v958_v36, %v957_v35 }
 0x13d   :  { %v1085_v40 = vpack.c.bf16 %v956_v38, %v955_v37 }
 0x13e   :  { %1092 = vst [vmem:[%s1635_s3 + $0x8] sm:$0xff] %v1090_v39  }
 0x13f   :  { %1086 = vst [vmem:[%s1635_s3] sm:$0xff] %v1085_v40  }

// kernel: _lambda_.14
= control target key start
LH: loop header
LB: loop body
LE: loop exit
PB: predicated region body
PF: predicated region fallthrough
CT: control target
= control target key end

     0   :  { %s1770_s1 = inlined_call_operand.vmem [shape: bf16[1280,128], index: 1, kind: input, shape index: {}]   ;;  %s1771_s0 = inlined_call_operand.vmem [shape: bf16[32,1280], index: 0, kind: input, shape index: {}]   ;;  %s1772_s2 = inlined_call_operand.vmem [shape: f32[1,128], index: 2, kind: input, shape index: {}]   ;;  %s1773_s3 = inlined_call_operand.vmem [shape: bf16[32,128], index: 3, kind: output, shape index: {}]  }
   0x1   :  { %v1331_v0 = vld [vmem:[%s1770_s1 + $0x40] sm:$0xff]   ;;  %v1335_v4 = vld [vmem:[%s1770_s1 + $0x48] sm:$0xff]   ;;  %v1339_v8 = vld [vmem:[%s1770_s1 + $0x50] sm:$0xff]  }
   0x2   :  { %v1332_v1 = vld [vmem:[%s1770_s1 + $0xc0] sm:$0xff]   ;;  %1175 = vmatprep.subr.bf16.mxu0 %v1331_v0  ;;  %v1336_v5 = vld [vmem:[%s1770_s1 + $0xc8] sm:$0xff]   ;;  %v1340_v9 = vld [vmem:[%s1770_s1 + $0xd0] sm:$0xff]  }
   0x3   :  { %v1333_v2 = vld [vmem:[%s1770_s1] sm:$0xff]   ;;  %1203 = vmatprep.subr.bf16.mxu1 %v1332_v1  ;;  %v1337_v6 = vld [vmem:[%s1770_s1 + $0x8] sm:$0xff]   ;;  %v1341_v10 = vld [vmem:[%s1770_s1 + $0x10] sm:$0xff]  }
   0x4   :  { %v1334_v3 = vld [vmem:[%s1770_s1 + $0x80] sm:$0xff]   ;;  %1176 = vmatpush3.bf16.msra.mxu0 %v1333_v2  ;;  %v1338_v7 = vld [vmem:[%s1770_s1 + $0x88] sm:$0xff]   ;;  %v1342_v11 = vld [vmem:[%s1770_s1 + $0x90] sm:$0xff]  }
   0x5   :  { %1204 = vmatpush3.bf16.msra.mxu1 %v1334_v3  ;;  %1177 = vmatprep.subr.bf16.mxu0 %v1335_v4  ;;  %v1343_v12 = vld [vmem:[%s1770_s1 + $0x58] sm:$0xff]   ;;  %v1347_v16 = vld [vmem:[%s1770_s1 + $0x60] sm:$0xff]   ;;  %v1351_v20 = vld [vmem:[%s1770_s1 + $0x68] sm:$0xff]  }
   0x6   :  { %1205 = vmatprep.subr.bf16.mxu1 %v1336_v5  ;;  %v1344_v13 = vld [vmem:[%s1770_s1 + $0xd8] sm:$0xff]   ;;  %v1348_v17 = vld [vmem:[%s1770_s1 + $0xe0] sm:$0xff]   ;;  %v1352_v21 = vld [vmem:[%s1770_s1 + $0xe8] sm:$0xff]  }
   0x7   :  { %v1345_v14 = vld [vmem:[%s1770_s1 + $0x18] sm:$0xff]   ;;  %v1349_v18 = vld [vmem:[%s1770_s1 + $0x20] sm:$0xff]   ;;  %v1353_v22 = vld [vmem:[%s1770_s1 + $0x28] sm:$0xff]  }
   0x8   :  { %1178 = vmatpush3.bf16.msra.mxu0 %v1337_v6  ;;  %v1346_v15 = vld [vmem:[%s1770_s1 + $0x98] sm:$0xff]   ;;  %v1350_v19 = vld [vmem:[%s1770_s1 + $0xa0] sm:$0xff]   ;;  %v1354_v23 = vld [vmem:[%s1770_s1 + $0xa8] sm:$0xff]  }
   0x9   :  { %1206 = vmatpush3.bf16.msra.mxu1 %v1338_v7  ;;  %1179 = vmatprep.subr.bf16.mxu0 %v1339_v8  ;;  %v1355_v24 = vld [vmem:[%s1770_s1 + $0x70] sm:$0xff]   ;;  %v1359_v28 = vld [vmem:[%s1770_s1 + $0x78] sm:$0xff]   ;;  %v1363_v32 = vld [vmem:[%s1771_s0] ss:$40 sps:$4 sm:$0xff]  }
   0xa   :  { %1207 = vmatprep.subr.bf16.mxu1 %v1340_v9  ;;  %v1356_v25 = vld [vmem:[%s1770_s1 + $0xf0] sm:$0xff]   ;;  %v1360_v29 = vld [vmem:[%s1770_s1 + $0xf8] sm:$0xff]   ;;  %v1365_v33 = vld [vmem:[%s1771_s0 + $0x4] ss:$40 sps:$4 sm:$0xff]  }
   0xb   :  { %v1357_v26 = vld [vmem:[%s1770_s1 + $0x30] sm:$0xff]   ;;  %v1361_v30 = vld [vmem:[%s1770_s1 + $0x38] sm:$0xff]   ;;  %814 = vmatprep.mubr.bf16.mxu0 %v1365_v33  ;;  %v1369_v36 = vld [vmem:[%s1770_s1 + $0x140] sm:$0xff]  }
   0xc   :  { %1180 = vmatpush3.bf16.msra.mxu0 %v1341_v10  ;;  %v1358_v27 = vld [vmem:[%s1770_s1 + $0xb0] sm:$0xff]   ;;  %v1362_v31 = vld [vmem:[%s1770_s1 + $0xb8] sm:$0xff]   ;;  %v1370_v37 = vld [vmem:[%s1770_s1 + $0x1c0] sm:$0xff]  }
   0xd   :  { %1208 = vmatpush3.bf16.msra.mxu1 %v1342_v11  ;;  %1181 = vmatprep.subr.bf16.mxu0 %v1343_v12  ;;  %v1366_v34 = vld [vmem:[%s1771_s0 + $0x8] ss:$40 sps:$4 sm:$0xff]   ;;  %v1368_v35 = vld [vmem:[%s1771_s0 + $0xc] ss:$40 sps:$4 sm:$0xff]   ;;  %v1371_v38 = vld [vmem:[%s1770_s1 + $0x100] sm:$0xff]  }
   0xe   :  { %1209 = vmatprep.subr.bf16.mxu1 %v1344_v13  ;;  %863 = vmatprep.mubr.bf16.mxu1 %v1368_v35  ;;  %v1372_v39 = vld [vmem:[%s1770_s1 + $0x180] sm:$0xff]   ;;  %v1373_v40 = vld [vmem:[%s1770_s1 + $0x148] sm:$0xff]   ;;  %v1377_v44 = vld [vmem:[%s1770_s1 + $0x150] sm:$0xff]  }
   0xf   :  { %v1374_v41 = vld [vmem:[%s1770_s1 + $0x1c8] sm:$0xff]   ;;  %v1378_v45 = vld [vmem:[%s1770_s1 + $0x1d0] sm:$0xff]   ;;  %v1381_v48 = vld [vmem:[%s1770_s1 + $0x158] sm:$0xff]  }
  0x10   :  { %1182 = vmatpush3.bf16.msra.mxu0 %v1345_v14  ;;  %v1375_v42 = vld [vmem:[%s1770_s1 + $0x108] sm:$0xff]   ;;  %v1379_v46 = vld [vmem:[%s1770_s1 + $0x110] sm:$0xff]   ;;  %v1382_v49 = vld [vmem:[%s1770_s1 + $0x1d8] sm:$0xff]  }
  0x11   :  { %1210 = vmatpush3.bf16.msra.mxu1 %v1346_v15  ;;  %1183 = vmatprep.subr.bf16.mxu0 %v1347_v16  ;;  %v1376_v43 = vld [vmem:[%s1770_s1 + $0x188] sm:$0xff]   ;;  %v1380_v47 = vld [vmem:[%s1770_s1 + $0x190] sm:$0xff]   ;;  %v1383_v50 = vld [vmem:[%s1770_s1 + $0x118] sm:$0xff]  }
  0x12   :  { %1211 = vmatprep.subr.bf16.mxu1 %v1348_v17  ;;  %v1384_v51 = vld [vmem:[%s1770_s1 + $0x198] sm:$0xff]   ;;  %v1385_v52 = vld [vmem:[%s1770_s1 + $0x160] sm:$0xff]   ;;  %v1392_v58 = vld [vmem:[%s1770_s1 + $0x168] sm:$0xff]  }
  0x13   :  { %v1386_v53 = vld [vmem:[%s1770_s1 + $0x1e0] sm:$0xff]   ;;  %v1389_v56 = vld [vmem:[%s1771_s0 + $0x54] ss:$40 sps:$4 sm:$0xff]   ;;  %v1391_v57 = vld [vmem:[%s1771_s0 + $0x50] ss:$40 sps:$4 sm:$0xff]  }
  0x14   :  { %1184 = vmatpush3.bf16.msra.mxu0 %v1349_v18  ;;  %v1387_v54 = vld [vmem:[%s1770_s1 + $0x120] sm:$0xff]   ;;  %v1393_v59 = vld [vmem:[%s1770_s1 + $0x1e8] sm:$0xff]   ;;  %v1399_v0 = vld [vmem:[%s1770_s1 + $0x170] sm:$0xff]  }
  0x15   :  { %1212 = vmatpush3.bf16.msra.mxu1 %v1350_v19  ;;  %1185 = vmatprep.subr.bf16.mxu0 %v1351_v20  ;;  %v1388_v55 = vld [vmem:[%s1770_s1 + $0x1a0] sm:$0xff]   ;;  %v1396_v61 = vld [vmem:[%s1770_s1 + $0x128] sm:$0xff]   ;;  %v1400_v1 = vld [vmem:[%s1770_s1 + $0x1f0] sm:$0xff]  }
  0x16   :  { %1213 = vmatprep.subr.bf16.mxu1 %v1352_v21  ;;  %v1394_v60 = vld [vmem:[%s1771_s0 + $0x5c] ss:$40 sps:$4 sm:$0xff]   ;;  %v1397_v62 = vld [vmem:[%s1770_s1 + $0x1a8] sm:$0xff]   ;;  %v1398_v63 = vld [vmem:[%s1771_s0 + $0x58] ss:$40 sps:$4 sm:$0xff]  }
  0x17   :  { %v1401_v2 = vld [vmem:[%s1770_s1 + $0x130] sm:$0xff]   ;;  %v1403_v4 = vld [vmem:[%s1770_s1 + $0x178] sm:$0xff]   ;;  %v1413_v12 = vld [vmem:[%s1770_s1 + $0x240] sm:$0xff]  }
  0x18   :  { %1186 = vmatpush3.bf16.msra.mxu0 %v1353_v22  ;;  %v1402_v3 = vld [vmem:[%s1770_s1 + $0x1b0] sm:$0xff]   ;;  %v1404_v5 = vld [vmem:[%s1770_s1 + $0x1f8] sm:$0xff]   ;;  %v1414_v13 = vld [vmem:[%s1770_s1 + $0x200] sm:$0xff]  }
  0x19   :  { %1214 = vmatpush3.bf16.msra.mxu1 %v1354_v23  ;;  %1187 = vmatprep.subr.bf16.mxu0 %v1355_v24  ;;  %v1405_v6 = vld [vmem:[%s1770_s1 + $0x138] sm:$0xff]   ;;  %v1415_v14 = vld [vmem:[%s1770_s1 + $0x248] sm:$0xff]   ;;  %v1420_v18 = vld [vmem:[%s1770_s1 + $0x250] sm:$0xff]  }
  0x1a   :  { %1215 = vmatprep.subr.bf16.mxu1 %v1356_v25  ;;  %v1406_v7 = vld [vmem:[%s1770_s1 + $0x1b8] sm:$0xff]   ;;  %v1416_v15 = vld [vmem:[%s1770_s1 + $0x208] sm:$0xff]   ;;  %v1423_v20 = vld [vmem:[%s1770_s1 + $0x210] sm:$0xff]  }
  0x1b   :  { %v1407_v8 = vld [vmem:[%s1771_s0 + $0x10] ss:$40 sps:$4 sm:$0xff]   ;;  %v1409_v9 = vld [vmem:[%s1771_s0 + $0x14] ss:$40 sps:$4 sm:$0xff]   ;;  %v1417_v16 = vld [vmem:[%s1771_s0 + $0x64] ss:$40 sps:$4 sm:$0xff]  }
  0x1c   :  { %1188 = vmatpush3.bf16.msra.mxu0 %v1357_v26  ;;  %v1410_v10 = vld [vmem:[%s1771_s0 + $0x18] ss:$40 sps:$4 sm:$0xff]   ;;  %v1412_v11 = vld [vmem:[%s1771_s0 + $0x1c] ss:$40 sps:$4 sm:$0xff]   ;;  %v1421_v19 = vld [vmem:[%s1771_s0 + $0x6c] ss:$40 sps:$4 sm:$0xff]  }
  0x1d   :  { %1216 = vmatpush3.bf16.msra.mxu1 %v1358_v27  ;;  %1189 = vmatprep.subr.bf16.mxu0 %v1359_v28  ;;  %v1419_v17 = vld [vmem:[%s1771_s0 + $0x60] ss:$40 sps:$4 sm:$0xff]   ;;  %v1425_v22 = vld [vmem:[%s1770_s1 + $0x258] sm:$0xff]   ;;  %v1437_v28 = vld [vmem:[%s1771_s0 + $0x24] ss:$40 sps:$4 sm:$0xff]  }
  0x1e   :  { %1217 = vmatprep.subr.bf16.mxu1 %v1360_v29  ;;  %v1424_v21 = vld [vmem:[%s1771_s0 + $0x68] ss:$40 sps:$4 sm:$0xff]   ;;  %v1426_v23 = vld [vmem:[%s1770_s1 + $0x218] sm:$0xff]   ;;  %v1427_v24 = vld [vmem:[%s1770_s1 + $0x260] sm:$0xff]  }
  0x1f   :  { %v1428_v25 = vld [vmem:[%s1770_s1 + $0x220] sm:$0xff]   ;;  %v1429_v26 = vld [vmem:[%s1770_s1 + $0x268] sm:$0xff]   ;;  %v1431_v29 = vld [vmem:[%s1770_s1 + $0x270] sm:$0xff]  }
  0x20   :  { %1190 = vmatpush3.bf16.msra.mxu0 %v1361_v30  ;;  %v1430_v27 = vld [vmem:[%s1770_s1 + $0x228] sm:$0xff]   ;;  %v1440_v30 = vld [vmem:[%s1771_s0 + $0x74] ss:$40 sps:$4 sm:$0xff]   ;;  %v1438_v35 = vld [vmem:[%s1771_s0 + $0x70] ss:$40 sps:$4 sm:$0xff]  }
  0x21   :  { %1218 = vmatpush3.bf16.msra.mxu1 %v1362_v31  ;;  %1231 = vmatprep.subr.bf16.mxu0 %v1369_v36  ;;  %v1432_v31 = vld [vmem:[%s1770_s1 + $0x230] sm:$0xff]   ;;  %v1434_v33 = vld [vmem:[%s1770_s1 + $0x238] sm:$0xff]  }
  0x22   :  { %1259 = vmatprep.subr.bf16.mxu1 %v1370_v37 }
  0x23   :  { %815 = vmatmul.mubr.bf16.vlgmr.msra.gmra.mrb[0].mxu0 %v1363_v32  ;;  %v1433_v32 = vld [vmem:[%s1770_s1 + $0x278] sm:$0xff]  }
  0x24   :  { %864 = vmatmul.mubr.bf16.vlgmr.msra.gmra.mrb[0].mxu1 %v1366_v34  ;;  %1232 = vmatpush3.bf16.msra.mxu0 %v1371_v38  ;;  %v1435_v34 = vld [vmem:[%s1771_s0 + $0x20] ss:$40 sps:$4 sm:$0xff]  }
  0x25   :  { %1260 = vmatpush3.bf16.msra.mxu1 %v1372_v39  ;;  %1233 = vmatprep.subr.bf16.mxu0 %v1373_v40  ;;  %v1055_v38 = vld [vmem:[%s1772_s2] ss:$0 sm:$0xff] }
  0x26   :  { %1261 = vmatprep.subr.bf16.mxu1 %v1374_v41  ;;  %822 = vmatprep.mubr.bf16.mxu0 %v1389_v56 }
  0x27   :  { %871 = vmatprep.mubr.bf16.mxu1 %v1394_v60 }
  0x28   :  { %1234 = vmatpush3.bf16.msra.mxu0 %v1375_v42 }
  0x29   :  { %1262 = vmatpush3.bf16.msra.mxu1 %v1376_v43  ;;  %1235 = vmatprep.subr.bf16.mxu0 %v1377_v44 }
  0x2a   :  { %1263 = vmatprep.subr.bf16.mxu1 %v1378_v45 }
  0x2b   :  { %823 = vmatmul.mubr.bf16.gmra.mrb[4].mxu0 %v1391_v57 }
  0x2c   :  { %1236 = vmatpush3.bf16.msra.mxu0 %v1379_v46  ;;  %872 = vmatmul.mubr.bf16.gmra.mrb[4].mxu1 %v1398_v63 }
  0x2d   :  { %1264 = vmatpush3.bf16.msra.mxu1 %v1380_v47  ;;  %1237 = vmatprep.subr.bf16.mxu0 %v1381_v48 }
  0x2e   :  { %1265 = vmatprep.subr.bf16.mxu1 %v1382_v49  ;;  %912 = vmatprep.mubr.bf16.mxu0 %v1409_v9 }
  0x2f   :  { %961 = vmatprep.mubr.bf16.mxu1 %v1412_v11 }
  0x30   :  { %1238 = vmatpush3.bf16.msra.mxu0 %v1383_v50 }
  0x31   :  { %1266 = vmatpush3.bf16.msra.mxu1 %v1384_v51  ;;  %1239 = vmatprep.subr.bf16.mxu0 %v1385_v52 }
  0x32   :  { %1267 = vmatprep.subr.bf16.mxu1 %v1386_v53 }
  0x34   :  { %1240 = vmatpush3.bf16.msra.mxu0 %v1387_v54 }
  0x35   :  { %1268 = vmatpush3.bf16.msra.mxu1 %v1388_v55  ;;  %1241 = vmatprep.subr.bf16.mxu0 %v1392_v58 }
  0x36   :  { %1269 = vmatprep.subr.bf16.mxu1 %v1393_v59 }
  0x38   :  { %1242 = vmatpush3.bf16.msra.mxu0 %v1396_v61 }
  0x39   :  { %1270 = vmatpush3.bf16.msra.mxu1 %v1397_v62  ;;  %1243 = vmatprep.subr.bf16.mxu0 %v1399_v0 }
  0x3a   :  { %1271 = vmatprep.subr.bf16.mxu1 %v1400_v1 }
  0x3c   :  { %1244 = vmatpush3.bf16.msra.mxu0 %v1401_v2 }
  0x3d   :  { %1272 = vmatpush3.bf16.msra.mxu1 %v1402_v3  ;;  %1245 = vmatprep.subr.bf16.mxu0 %v1403_v4 }
  0x3e   :  { %1273 = vmatprep.subr.bf16.mxu1 %v1404_v5 }
  0x40   :  { %1246 = vmatpush3.bf16.msra.mxu0 %v1405_v6 }
  0x41   :  { %1274 = vmatpush3.bf16.msra.mxu1 %v1406_v7  ;;  %1287 = vmatprep.subr.bf16.mxu0 %v1413_v12 }
  0x42   :  { %1315 = vmatprep.subr.bf16.mxu1 %v1413_v12 }
  0x43   :  { %913 = vmatmul.mubr.bf16.vlgmr.msra.gmra.mrb[8].mxu0 %v1407_v8 }
  0x44   :  { %962 = vmatmul.mubr.bf16.vlgmr.msra.gmra.mrb[8].mxu1 %v1410_v10  ;;  %1288 = vmatpush3.bf16.msra.mxu0 %v1414_v13 }
  0x45   :  { %1323 = vmatpush3.bf16.msra.mxu1 %v1414_v13  ;;  %1289 = vmatprep.subr.bf16.mxu0 %v1415_v14 }
  0x46   :  { %1316 = vmatprep.subr.bf16.mxu1 %v1415_v14  ;;  %920 = vmatprep.mubr.bf16.mxu0 %v1417_v16 }
  0x47   :  { %969 = vmatprep.mubr.bf16.mxu1 %v1421_v19 }
  0x48   :  { %1290 = vmatpush3.bf16.msra.mxu0 %v1416_v15 }
  0x49   :  { %1324 = vmatpush3.bf16.msra.mxu1 %v1416_v15  ;;  %1291 = vmatprep.subr.bf16.mxu0 %v1420_v18 }
  0x4a   :  { %1317 = vmatprep.subr.bf16.mxu1 %v1420_v18 }
  0x4b   :  { %921 = vmatmul.mubr.bf16.gmra.mrb[12].mxu0 %v1419_v17 }
  0x4c   :  { %1292 = vmatpush3.bf16.msra.mxu0 %v1423_v20  ;;  %970 = vmatmul.mubr.bf16.gmra.mrb[12].mxu1 %v1424_v21 }
  0x4d   :  { %1325 = vmatpush3.bf16.msra.mxu1 %v1423_v20  ;;  %1293 = vmatprep.subr.bf16.mxu0 %v1425_v22 }
  0x4e   :  { %1318 = vmatprep.subr.bf16.mxu1 %v1425_v22  ;;  %1010 = vmatprep.mubr.bf16.mxu0 %v1437_v28 }
  0x4f   :  { %1018 = vmatprep.mubr.bf16.mxu1 %v1440_v30 }
  0x50   :  { %1294 = vmatpush3.bf16.msra.mxu0 %v1426_v23 }
  0x51   :  { %1326 = vmatpush3.bf16.msra.mxu1 %v1426_v23  ;;  %1295 = vmatprep.subr.bf16.mxu0 %v1427_v24 }
  0x52   :  { %1319 = vmatprep.subr.bf16.mxu1 %v1427_v24 }
  0x54   :  { %1296 = vmatpush3.bf16.msra.mxu0 %v1428_v25 }
  0x55   :  { %1327 = vmatpush3.bf16.msra.mxu1 %v1428_v25  ;;  %1297 = vmatprep.subr.bf16.mxu0 %v1429_v26 }
  0x56   :  { %1320 = vmatprep.subr.bf16.mxu1 %v1429_v26 }
  0x58   :  { %1298 = vmatpush3.bf16.msra.mxu0 %v1430_v27 }
  0x59   :  { %1328 = vmatpush3.bf16.msra.mxu1 %v1430_v27  ;;  %1299 = vmatprep.subr.bf16.mxu0 %v1431_v29 }
  0x5a   :  { %1321 = vmatprep.subr.bf16.mxu1 %v1431_v29 }
  0x5c   :  { %1300 = vmatpush3.bf16.msra.mxu0 %v1432_v31 }
  0x5d   :  { %1329 = vmatpush3.bf16.msra.mxu1 %v1432_v31  ;;  %1301 = vmatprep.subr.bf16.mxu0 %v1433_v32 }
  0x5e   :  { %1322 = vmatprep.subr.bf16.mxu1 %v1433_v32 }
  0x60   :  { %1302 = vmatpush3.bf16.msra.mxu0 %v1434_v33 }
  0x61   :  { %1330 = vmatpush3.bf16.msra.mxu1 %v1434_v33 }
  0x63   :  { %1011 = vmatmul.mubr.bf16.vlgmr.msra.gmra.mrb[16].mxu0 %v1435_v34 }
  0x64   :  { %1019 = vmatmul.mubr.bf16.vlgmr.msra.gmra.mrb[16].mxu1 %v1438_v35 }
  0xf6   :  { %v1191_v36 = vpop.f32.mrb[0].mxu0 }
  0xf7   :  { %v1219_v37 = vpop.f32.mrb[0].mxu1  ;;  %v1192_v39 = vpop.f32.mrb[1].mxu0 }
  0xf8   :  { %v1193_v40 = vadd.f32 %v1192_v39, %v1191_v36  ;;  %v1220_v41 = vpop.f32.mrb[1].mxu1  ;;  %v1194_v42 = vpop.f32.mrb[2].mxu0 }
  0xf9   :  { %v1221_v43 = vadd.f32 %v1220_v41, %v1219_v37  ;;  %v1222_v44 = vpop.f32.mrb[2].mxu1  ;;  %v1195_v45 = vpop.f32.mrb[3].mxu0 }
  0xfa   :  { %v817_v46 = vadd.f32 %v1193_v40, %v1055_v38  ;;  %v1196_v47 = vadd.f32 %v1195_v45, %v1194_v42  ;;  %v1223_v48 = vpop.f32.mrb[3].mxu1 }
  0xfb   :  { %v1224_v49 = vadd.f32 %v1223_v48, %v1222_v44 }
  0xfc   :  { %v866_v50 = vadd.f32 %v1221_v43, %v817_v46  ;;  %v820_v51 = vadd.f32 %v1196_v47, %v1055_v38 }
  0xfe   :  { %v869_v52 = vadd.f32 %v1224_v49, %v820_v51  ;;  %v1197_v53 = vpop.f32.mrb[4].mxu0 }
  0xff   :  { %v1198_v54 = vpop.f32.mrb[5].mxu0  ;;  %v1225_v60 = vpop.f32.mrb[4].mxu1 }
 0x100   :  { %v1199_v55 = vadd.f32 %v1198_v54, %v1197_v53  ;;  %v1200_v56 = vpop.f32.mrb[6].mxu0  ;;  %v1226_v61 = vpop.f32.mrb[5].mxu1 }
 0x101   :  { %v1201_v57 = vpop.f32.mrb[7].mxu0  ;;  %v1227_v63 = vadd.f32 %v1226_v61, %v1225_v60  ;;  %v1228_v0 = vpop.f32.mrb[6].mxu1 }
 0x102   :  { %v1202_v58 = vadd.f32 %v1201_v57, %v1200_v56  ;;  %v825_v59 = vadd.f32 %v1199_v55, %v1055_v38  ;;  %v1229_v1 = vpop.f32.mrb[7].mxu1 }
 0x103   :  { %v1230_v3 = vadd.f32 %v1229_v1, %v1228_v0 }
 0x104   :  { %v828_v62 = vadd.f32 %v1202_v58, %v1055_v38  ;;  %v874_v2 = vadd.f32 %v1227_v63, %v825_v59 }
 0x106   :  { %v877_v4 = vadd.f32 %v1230_v3, %v828_v62 }
 0x116   :  { %v1247_v5 = vpop.f32.mrb[8].mxu0 }
 0x117   :  { %v1275_v6 = vpop.f32.mrb[8].mxu1  ;;  %v1248_v7 = vpop.f32.mrb[9].mxu0 }
 0x118   :  { %v1249_v8 = vadd.f32 %v1248_v7, %v1247_v5  ;;  %v1276_v9 = vpop.f32.mrb[9].mxu1  ;;  %v1250_v10 = vpop.f32.mrb[10].mxu0 }
 0x119   :  { %v1277_v11 = vadd.f32 %v1276_v9, %v1275_v6  ;;  %v1278_v12 = vpop.f32.mrb[10].mxu1  ;;  %v1251_v13 = vpop.f32.mrb[11].mxu0 }
 0x11a   :  { %v915_v14 = vadd.f32 %v1249_v8, %v866_v50  ;;  %v1252_v15 = vadd.f32 %v1251_v13, %v1250_v10  ;;  %v1279_v16 = vpop.f32.mrb[11].mxu1 }
 0x11b   :  { %v1280_v17 = vadd.f32 %v1279_v16, %v1278_v12 }
 0x11c   :  { %v964_v18 = vadd.f32 %v1277_v11, %v915_v14  ;;  %v918_v19 = vadd.f32 %v1252_v15, %v869_v52 }
 0x11e   :  { %v967_v20 = vadd.f32 %v1280_v17, %v918_v19  ;;  %v1253_v21 = vpop.f32.mrb[12].mxu0 }
 0x11f   :  { %v1254_v22 = vpop.f32.mrb[13].mxu0  ;;  %v1281_v25 = vpop.f32.mrb[12].mxu1 }
 0x120   :  { %v1255_v23 = vadd.f32 %v1254_v22, %v1253_v21  ;;  %v1256_v24 = vpop.f32.mrb[14].mxu0  ;;  %v1282_v27 = vpop.f32.mrb[13].mxu1 }
 0x121   :  { %v1257_v26 = vpop.f32.mrb[15].mxu0  ;;  %v1283_v30 = vadd.f32 %v1282_v27, %v1281_v25  ;;  %v1284_v31 = vpop.f32.mrb[14].mxu1 }
 0x122   :  { %v923_v28 = vadd.f32 %v1255_v23, %v874_v2  ;;  %v1258_v29 = vadd.f32 %v1257_v26, %v1256_v24  ;;  %v1285_v32 = vpop.f32.mrb[15].mxu1 }
 0x123   :  { %v1286_v35 = vadd.f32 %v1285_v32, %v1284_v31 }
 0x124   :  { %v926_v33 = vadd.f32 %v1258_v29, %v877_v4  ;;  %v972_v34 = vadd.f32 %v1283_v30, %v923_v28 }
 0x126   :  { %v975_v36 = vadd.f32 %v1286_v35, %v926_v33 }
 0x136   :  { %v1303_v37 = vpop.f32.mrb[16].mxu0 }
 0x137   :  { %v1309_v38 = vpop.f32.mrb[16].mxu1  ;;  %v1304_v39 = vpop.f32.mrb[17].mxu0 }
 0x138   :  { %v1305_v40 = vadd.f32 %v1304_v39, %v1303_v37  ;;  %v1310_v41 = vpop.f32.mrb[17].mxu1  ;;  %v1306_v42 = vpop.f32.mrb[18].mxu0 }
 0x139   :  { %v1311_v43 = vadd.f32 %v1310_v41, %v1309_v38  ;;  %v1312_v44 = vpop.f32.mrb[18].mxu1  ;;  %v1307_v45 = vpop.f32.mrb[19].mxu0 }
 0x13a   :  { %v1013_v46 = vadd.f32 %v1305_v40, %v964_v18  ;;  %v1308_v47 = vadd.f32 %v1307_v45, %v1306_v42  ;;  %v1313_v48 = vpop.f32.mrb[19].mxu1 }
 0x13b   :  { %v1021_v49 = vadd.f32 %v1311_v43, %v972_v34  ;;  %v1314_v50 = vadd.f32 %v1313_v48, %v1312_v44 }
 0x13c   :  { %v1016_v51 = vadd.f32 %v1308_v47, %v967_v20  ;;  %v1027_v53 = vmax.f32 %v1013_v46, 0.0 }
 0x13d   :  { %v1024_v52 = vadd.f32 %v1314_v50, %v975_v36  ;;  %v1029_v55 = vmax.f32 %v1021_v49, 0.0 }
 0x13e   :  { %v1028_v54 = vmax.f32 %v1016_v51, 0.0 }
 0x13f   :  { %v1030_v56 = vmax.f32 %v1024_v52, 0.0 }
 0x140   :  { %v1167_v57 = vpack.c.bf16 %v1028_v54, %v1027_v53 }
 0x141   :  { %v1172_v58 = vpack.c.bf16 %v1030_v56, %v1029_v55 }
 0x142   :  { %1168 = vst [vmem:[%s1773_s3] sm:$0xff] %v1167_v57  }
 0x143   :  { %1174 = vst [vmem:[%s1773_s3 + $0x8] sm:$0xff] %v1172_v58  }

// kernel: _lambda_.15
= control target key start
LH: loop header
LB: loop body
LE: loop exit
PB: predicated region body
PF: predicated region fallthrough
CT: control target
= control target key end

     0   :  { %vm1125_vm0 = vmmov 0   ;;  %s1383_s1 = inlined_call_operand.vmem [shape: bf16[1152,128], index: 1, kind: input, shape index: {}]   ;;  %s1384_s0 = inlined_call_operand.vmem [shape: bf16[8,1152], index: 0, kind: input, shape index: {}]   ;;  %s1385_s2 = inlined_call_operand.vmem [shape: f32[1,128], index: 2, kind: input, shape index: {}]   ;;  %s1386_s3 = inlined_call_operand.vmem [shape: bf16[8,128], index: 3, kind: output, shape index: {}]  }
   0x1   :  { %v1043_v0 = vld [vmem:[%s1383_s1 + $0x40] sm:$0xff]   ;;  %v1047_v4 = vld [vmem:[%s1383_s1 + $0x48] sm:$0xff]   ;;  %v1051_v8 = vld [vmem:[%s1383_s1 + $0x50] sm:$0xff]  }
   0x2   :  { %v1044_v1 = vld [vmem:[%s1383_s1] sm:$0xff]   ;;  %924 = vmatprep.subr.bf16.mxu0 %v1043_v0  ;;  %v1048_v5 = vld [vmem:[%s1383_s1 + $0x8] sm:$0xff]   ;;  %v1052_v9 = vld [vmem:[%s1383_s1 + $0x10] sm:$0xff]  }
   0x3   :  { %v1045_v2 = vld [vmem:[%s1383_s1 + $0xc0] sm:$0xff]   ;;  %925 = vmatpush3.bf16.msra.mxu0 %v1044_v1  ;;  %v1049_v6 = vld [vmem:[%s1383_s1 + $0xc8] sm:$0xff]   ;;  %v1053_v10 = vld [vmem:[%s1383_s1 + $0xd0] sm:$0xff]  }
   0x4   :  { %v1046_v3 = vld [vmem:[%s1383_s1 + $0x80] sm:$0xff]   ;;  %946 = vmatprep.subr.bf16.mxu1 %v1045_v2  ;;  %926 = vmatprep.subr.bf16.mxu0 %v1047_v4  ;;  %v1050_v7 = vld [vmem:[%s1383_s1 + $0x88] sm:$0xff]   ;;  %v1054_v11 = vld [vmem:[%s1383_s1 + $0x90] sm:$0xff]  }
   0x5   :  { %947 = vmatpush3.bf16.msra.mxu1 %v1046_v3  ;;  %v1055_v12 = vld [vmem:[%s1383_s1 + $0x58] sm:$0xff]   ;;  %v1059_v16 = vld [vmem:[%s1383_s1 + $0x60] sm:$0xff]   ;;  %v1063_v20 = vld [vmem:[%s1383_s1 + $0x68] sm:$0xff]  }
   0x6   :  { %948 = vmatprep.subr.bf16.mxu1 %v1049_v6  ;;  %v1056_v13 = vld [vmem:[%s1383_s1 + $0x18] sm:$0xff]   ;;  %v1060_v17 = vld [vmem:[%s1383_s1 + $0x20] sm:$0xff]   ;;  %v1064_v21 = vld [vmem:[%s1383_s1 + $0x28] sm:$0xff]  }
   0x7   :  { %927 = vmatpush3.bf16.msra.mxu0 %v1048_v5  ;;  %v1057_v14 = vld [vmem:[%s1383_s1 + $0xd8] sm:$0xff]   ;;  %v1061_v18 = vld [vmem:[%s1383_s1 + $0xe0] sm:$0xff]   ;;  %v1065_v22 = vld [vmem:[%s1383_s1 + $0xe8] sm:$0xff]  }
   0x8   :  { %928 = vmatprep.subr.bf16.mxu0 %v1051_v8  ;;  %v1058_v15 = vld [vmem:[%s1383_s1 + $0x98] sm:$0xff]   ;;  %v1062_v19 = vld [vmem:[%s1383_s1 + $0xa0] sm:$0xff]   ;;  %v1066_v23 = vld [vmem:[%s1383_s1 + $0xa8] sm:$0xff]  }
   0x9   :  { %949 = vmatpush3.bf16.msra.mxu1 %v1050_v7  ;;  %v1067_v24 = vld [vmem:[%s1383_s1 + $0x70] sm:$0xff]   ;;  %v1071_v28 = vld [vmem:[%s1383_s1 + $0x78] sm:$0xff]   ;;  %v15_v31 = vld [vmem:[%s1384_s0] sm:$0xff] }
   0xa   :  { %950 = vmatprep.subr.bf16.mxu1 %v1053_v10  ;;  %v1068_v25 = vld [vmem:[%s1383_s1 + $0x30] sm:$0xff]   ;;  %v1072_v29 = vld [vmem:[%s1383_s1 + $0x38] sm:$0xff]   ;;  %v843_v32 = vcombine.low %v15_v31, %v15_v31  ;;  %v844_v33 = vcombine.high %v15_v31, %v15_v31  ;;  %v1077_v35 = vld [vmem:[%s1383_s1 + $0x140] sm:$0xff]  }
   0xb   :  { %929 = vmatpush3.bf16.msra.mxu0 %v1052_v9  ;;  %v1069_v26 = vld [vmem:[%s1383_s1 + $0xf0] sm:$0xff]   ;;  %v1073_v30 = vld [vmem:[%s1383_s1 + $0xf8] sm:$0xff]   ;;  %v16_v36 = vld [vmem:[%s1384_s0 + $0x8] sm:$0xff]  ;;  %v1124_v9 = vmov 0.0  }
   0xc   :  { %930 = vmatprep.subr.bf16.mxu0 %v1055_v12  ;;  %v1070_v27 = vld [vmem:[%s1383_s1 + $0xb0] sm:$0xff]   ;;  %v1076_v34 = vld [vmem:[%s1383_s1 + $0xb8] sm:$0xff]   ;;  %667 = vmatprep.mubr.bf16.mxu0 %v844_v33  ;;  %v845_v37 = vcombine.low %v16_v36, %v16_v36  ;;  %v846_v38 = vcombine.high %v16_v36, %v16_v36  ;;  %v1080_v39 = vld [vmem:[%s1383_s1 + $0x100] sm:$0xff]  }
   0xd   :  { %951 = vmatpush3.bf16.msra.mxu1 %v1054_v11  ;;  %v1081_v40 = vld [vmem:[%s1383_s1 + $0x1c0] sm:$0xff]   ;;  %v1083_v42 = vld [vmem:[%s1383_s1 + $0x148] sm:$0xff]   ;;  %v1087_v46 = vld [vmem:[%s1383_s1 + $0x150] sm:$0xff]  }
   0xe   :  { %952 = vmatprep.subr.bf16.mxu1 %v1057_v14  ;;  %707 = vmatprep.mubr.bf16.mxu1 %v846_v38  ;;  %v1082_v41 = vld [vmem:[%s1383_s1 + $0x180] sm:$0xff]   ;;  %v1084_v43 = vld [vmem:[%s1383_s1 + $0x108] sm:$0xff]   ;;  %v1088_v47 = vld [vmem:[%s1383_s1 + $0x110] sm:$0xff]  }
   0xf   :  { %931 = vmatpush3.bf16.msra.mxu0 %v1056_v13  ;;  %v1085_v44 = vld [vmem:[%s1383_s1 + $0x1c8] sm:$0xff]   ;;  %v1089_v48 = vld [vmem:[%s1383_s1 + $0x1d0] sm:$0xff]   ;;  %v1091_v50 = vld [vmem:[%s1383_s1 + $0x158] sm:$0xff]  }
  0x10   :  { %932 = vmatprep.subr.bf16.mxu0 %v1059_v16  ;;  %v1086_v45 = vld [vmem:[%s1383_s1 + $0x188] sm:$0xff]   ;;  %v1090_v49 = vld [vmem:[%s1383_s1 + $0x190] sm:$0xff]   ;;  %v1092_v51 = vld [vmem:[%s1383_s1 + $0x118] sm:$0xff]  }
  0x11   :  { %953 = vmatpush3.bf16.msra.mxu1 %v1058_v15  ;;  %v1093_v52 = vld [vmem:[%s1383_s1 + $0x1d8] sm:$0xff]   ;;  %v1095_v54 = vld [vmem:[%s1383_s1 + $0x160] sm:$0xff]   ;;  %v1099_v58 = vld [vmem:[%s1383_s1 + $0x168] sm:$0xff]  }
  0x12   :  { %954 = vmatprep.subr.bf16.mxu1 %v1061_v18  ;;  %v1094_v53 = vld [vmem:[%s1383_s1 + $0x198] sm:$0xff]   ;;  %v1096_v55 = vld [vmem:[%s1383_s1 + $0x120] sm:$0xff]   ;;  %v1100_v59 = vld [vmem:[%s1383_s1 + $0x128] sm:$0xff]  }
  0x13   :  { %933 = vmatpush3.bf16.msra.mxu0 %v1060_v17  ;;  %v1097_v56 = vld [vmem:[%s1383_s1 + $0x1e0] sm:$0xff]   ;;  %v1101_v60 = vld [vmem:[%s1383_s1 + $0x1e8] sm:$0xff]   ;;  %v1103_v62 = vld [vmem:[%s1383_s1 + $0x170] sm:$0xff]  }
  0x14   :  { %934 = vmatprep.subr.bf16.mxu0 %v1063_v20  ;;  %v1098_v57 = vld [vmem:[%s1383_s1 + $0x1a0] sm:$0xff]   ;;  %v1102_v61 = vld [vmem:[%s1383_s1 + $0x1a8] sm:$0xff]   ;;  %v1104_v63 = vld [vmem:[%s1383_s1 + $0x130] sm:$0xff]  }
  0x15   :  { %955 = vmatpush3.bf16.msra.mxu1 %v1062_v19  ;;  %v1105_v0 = vld [vmem:[%s1383_s1 + $0x1f0] sm:$0xff]   ;;  %v1107_v2 = vld [vmem:[%s1383_s1 + $0x178] sm:$0xff]   ;;  %v1115_v13 = vld [vmem:[%s1383_s1 + $0x200] sm:$0xff]  }
  0x16   :  { %956 = vmatprep.subr.bf16.mxu1 %v1065_v22  ;;  %v1106_v1 = vld [vmem:[%s1383_s1 + $0x1b0] sm:$0xff]   ;;  %v1108_v3 = vld [vmem:[%s1383_s1 + $0x138] sm:$0xff]   ;;  %v1116_v14 = vld [vmem:[%s1383_s1 + $0x208] sm:$0xff]  }
  0x17   :  { %935 = vmatpush3.bf16.msra.mxu0 %v1064_v21  ;;  %v1109_v4 = vld [vmem:[%s1383_s1 + $0x1f8] sm:$0xff]   ;;  %v17_v5 = vld [vmem:[%s1384_s0 + $0x10] sm:$0xff]  ;;  %v1119_v17 = vld [vmem:[%s1383_s1 + $0x220] sm:$0xff]  }
  0x18   :  { %936 = vmatprep.subr.bf16.mxu0 %v1067_v24  ;;  %v847_v6 = vcombine.low %v17_v5, %v17_v5  ;;  %v848_v7 = vcombine.high %v17_v5, %v17_v5  ;;  %v1112_v8 = vld [vmem:[%s1383_s1 + $0x1b8] sm:$0xff]   ;;  %v1117_v15 = vld [vmem:[%s1383_s1 + $0x210] sm:$0xff]   ;;  %v1120_v18 = vld [vmem:[%s1383_s1 + $0x228] sm:$0xff]  }
  0x19   :  { %957 = vmatpush3.bf16.msra.mxu1 %v1066_v23  ;;  %v18_v10 = vld [vmem:[%s1384_s0 + $0x18] sm:$0xff]  ;;  %v1121_v19 = vld [vmem:[%s1383_s1 + $0x230] sm:$0xff]   ;;  %v1123_v21 = vld [vmem:[%s1384_s0 + $0x20] ss:$0 sps:$4 sm:$0xff]  }
  0x1a   :  { %958 = vmatprep.subr.bf16.mxu1 %v1069_v26  ;;  %v849_v11 = vcombine.low %v18_v10, %v18_v10  ;;  %v850_v12 = vcombine.high %v18_v10, %v18_v10  ;;  %v1118_v16 = vld [vmem:[%s1383_s1 + $0x218] sm:$0xff]   ;;  %v842_v23 = vld [vmem:[%s1385_s2] ss:$0 sm:$0xff] }
  0x1b   :  { %937 = vmatpush3.bf16.msra.mxu0 %v1068_v25  ;;  %v1122_v20 = vld [vmem:[%s1383_s1 + $0x238] sm:$0xff]  }
  0x1c   :  { %938 = vmatprep.subr.bf16.mxu0 %v1071_v28 }
  0x1d   :  { %959 = vmatpush3.bf16.msra.mxu1 %v1070_v27 }
  0x1e   :  { %960 = vmatprep.subr.bf16.mxu1 %v1073_v30 }
  0x1f   :  { %939 = vmatpush3.bf16.msra.mxu0 %v1072_v29 }
  0x20   :  { %968 = vmatprep.subr.bf16.mxu0 %v1077_v35 }
  0x21   :  { %961 = vmatpush3.bf16.msra.mxu1 %v1076_v34 }
  0x22   :  { %668 = vmatmul.mubr.bf16.vlgmr.msra.gmra.mrb[0].mxu0 %v843_v32  ;;  %990 = vmatprep.subr.bf16.mxu1 %v1081_v40 }
  0x23   :  { %969 = vmatpush3.bf16.msra.mxu0 %v1080_v39  ;;  %747 = vmatprep.mubr.bf16.mxu0 %v848_v7 }
  0x24   :  { %708 = vmatmul.mubr.bf16.vlgmr.msra.gmra.mrb[0].mxu1 %v845_v37  ;;  %970 = vmatprep.subr.bf16.mxu0 %v1083_v42 }
  0x25   :  { %991 = vmatpush3.bf16.msra.mxu1 %v1082_v41  ;;  %787 = vmatprep.mubr.bf16.mxu1 %v850_v12 }
  0x26   :  { %992 = vmatprep.subr.bf16.mxu1 %v1085_v44 }
  0x27   :  { %971 = vmatpush3.bf16.msra.mxu0 %v1084_v43 }
  0x28   :  { %972 = vmatprep.subr.bf16.mxu0 %v1087_v46 }
  0x29   :  { %993 = vmatpush3.bf16.msra.mxu1 %v1086_v45 }
  0x2a   :  { %994 = vmatprep.subr.bf16.mxu1 %v1089_v48 }
  0x2b   :  { %973 = vmatpush3.bf16.msra.mxu0 %v1088_v47 }
  0x2c   :  { %974 = vmatprep.subr.bf16.mxu0 %v1091_v50 }
  0x2d   :  { %995 = vmatpush3.bf16.msra.mxu1 %v1090_v49 }
  0x2e   :  { %996 = vmatprep.subr.bf16.mxu1 %v1093_v52 }
  0x2f   :  { %975 = vmatpush3.bf16.msra.mxu0 %v1092_v51 }
  0x30   :  { %976 = vmatprep.subr.bf16.mxu0 %v1095_v54 }
  0x31   :  { %997 = vmatpush3.bf16.msra.mxu1 %v1094_v53 }
  0x32   :  { %998 = vmatprep.subr.bf16.mxu1 %v1097_v56 }
  0x33   :  { %977 = vmatpush3.bf16.msra.mxu0 %v1096_v55 }
  0x34   :  { %978 = vmatprep.subr.bf16.mxu0 %v1099_v58 }
  0x35   :  { %999 = vmatpush3.bf16.msra.mxu1 %v1098_v57 }
  0x36   :  { %1000 = vmatprep.subr.bf16.mxu1 %v1101_v60 }
  0x37   :  { %979 = vmatpush3.bf16.msra.mxu0 %v1100_v59 }
  0x38   :  { %980 = vmatprep.subr.bf16.mxu0 %v1103_v62 }
  0x39   :  { %1001 = vmatpush3.bf16.msra.mxu1 %v1102_v61 }
  0x3a   :  { %1002 = vmatprep.subr.bf16.mxu1 %v1105_v0 }
  0x3b   :  { %981 = vmatpush3.bf16.msra.mxu0 %v1104_v63 }
  0x3c   :  { %982 = vmatprep.subr.bf16.mxu0 %v1107_v2 }
  0x3d   :  { %1003 = vmatpush3.bf16.msra.mxu1 %v1106_v1 }
  0x3e   :  { %1004 = vmatprep.subr.bf16.mxu1 %v1109_v4 }
  0x3f   :  { %983 = vmatpush3.bf16.msra.mxu0 %v1108_v3 }
  0x40   :  { %1021 = vmatprep.subr.bf16.mxu0 %v1124_v9 }
  0x41   :  { %1005 = vmatpush3.bf16.msra.mxu1 %v1112_v8 }
  0x42   :  { %748 = vmatmul.mubr.bf16.vlgmr.msra.gmra.mrb[4].mxu0 %v847_v6 }
  0x43   :  { %1022 = vmatpush3.bf16.msra.mxu0 %v1115_v13  ;;  %1037 = vmatprep.mubr.msk.bf16.mxu0 %vm1125_vm0, %v1124_v9 }
  0x44   :  { %788 = vmatmul.mubr.bf16.vlgmr.msra.gmra.mrb[4].mxu1 %v849_v11  ;;  %1023 = vmatprep.subr.bf16.mxu0 %v1124_v9 }
  0x47   :  { %1024 = vmatpush3.bf16.msra.mxu0 %v1116_v14 }
  0x48   :  { %1025 = vmatprep.subr.bf16.mxu0 %v1124_v9 }
  0x4b   :  { %1026 = vmatpush3.bf16.msra.mxu0 %v1117_v15 }
  0x4c   :  { %1027 = vmatprep.subr.bf16.mxu0 %v1124_v9 }
  0x4f   :  { %1028 = vmatpush3.bf16.msra.mxu0 %v1118_v16 }
  0x50   :  { %1029 = vmatprep.subr.bf16.mxu0 %v1124_v9 }
  0x53   :  { %1030 = vmatpush3.bf16.msra.mxu0 %v1119_v17 }
  0x54   :  { %1031 = vmatprep.subr.bf16.mxu0 %v1124_v9 }
  0x57   :  { %1032 = vmatpush3.bf16.msra.mxu0 %v1120_v18 }
  0x58   :  { %1033 = vmatprep.subr.bf16.mxu0 %v1124_v9 }
  0x5b   :  { %1034 = vmatpush3.bf16.msra.mxu0 %v1121_v19 }
  0x5c   :  { %1035 = vmatprep.subr.bf16.mxu0 %v1124_v9 }
  0x5f   :  { %1036 = vmatpush3.bf16.msra.mxu0 %v1122_v20 }
  0x62   :  { %1038 = vmatmul.mubr.bf16.vlgmr.msra.gmra.mrb[8].mxu0 %v1123_v21 }
  0xf5   :  { %v940_v22 = vpop.f32.mrb[0].mxu0 }
  0xf6   :  { %v941_v24 = vpop.f32.mrb[1].mxu0 }
  0xf7   :  { %v942_v25 = vadd.f32 %v941_v24, %v940_v22  ;;  %v943_v26 = vpop.f32.mrb[2].mxu0  ;;  %v962_v27 = vpop.f32.mrb[0].mxu1 }
  0xf8   :  { %v944_v28 = vpop.f32.mrb[3].mxu0  ;;  %v963_v29 = vpop.f32.mrb[1].mxu1 }
  0xf9   :  { %v670_v30 = vadd.f32 %v942_v25, %v842_v23  ;;  %v964_v31 = vadd.f32 %v963_v29, %v962_v27  ;;  %v965_v32 = vpop.f32.mrb[2].mxu1 }
  0xfa   :  { %v966_v33 = vpop.f32.mrb[3].mxu1 }
  0xfb   :  { %v710_v34 = vadd.f32 %v964_v31, %v670_v30 }
 0x115   :  { %v984_v35 = vpop.f32.mrb[4].mxu0 }
 0x116   :  { %v985_v36 = vpop.f32.mrb[5].mxu0 }
 0x117   :  { %v986_v37 = vadd.f32 %v985_v36, %v984_v35  ;;  %v987_v38 = vpop.f32.mrb[6].mxu0  ;;  %v1006_v39 = vpop.f32.mrb[4].mxu1 }
 0x118   :  { %v988_v40 = vpop.f32.mrb[7].mxu0  ;;  %v1007_v41 = vpop.f32.mrb[5].mxu1 }
 0x119   :  { %v750_v42 = vadd.f32 %v986_v37, %v710_v34  ;;  %v1008_v43 = vadd.f32 %v1007_v41, %v1006_v39  ;;  %v1009_v44 = vpop.f32.mrb[6].mxu1 }
 0x11a   :  { %v1010_v45 = vpop.f32.mrb[7].mxu1 }
 0x11b   :  { %v790_v46 = vadd.f32 %v1008_v43, %v750_v42 }
 0x135   :  { %v829_v47 = vpop.f32.mrb[8].mxu0 }
 0x136   :  { %v830_v48 = vadd.f32 %v829_v47, %v790_v46  ;;  %v1039_v49 = vpop.f32.mrb[9].mxu0 }
 0x137   :  { %v832_v50 = vpop.f32.mrb[10].mxu0 }
 0x138   :  { %v835_v51 = vmax.f32 %v830_v48, 0.0  ;;  %v1040_v52 = vpop.f32.mrb[11].mxu0 }
 0x13a   :  { %v836_v53 = vpack.c.bf16 %v835_v51, %v835_v51 }
 0x13c   :  { %837 = vst [vmem:[%s1386_s3] sm:$0xf] %v836_v53 }

// kernel: _lambda_.17
= control target key start
LH: loop header
LB: loop body
LE: loop exit
PB: predicated region body
PF: predicated region fallthrough
CT: control target
= control target key end

     0   :  { %v1148_v21 = vmov 1966171168   ;;  %v174_v23 = vlaneseq  ;;  %vm1150_vm0 = vmmov 0   ;;  %s1413_s1 = inlined_call_operand.vmem [shape: bf16[1152,128], index: 1, kind: input, shape index: {}]   ;;  %s1414_s0 = inlined_call_operand.vmem [shape: bf16[2,1152], index: 0, kind: input, shape index: {}]   ;;  %s1415_s2 = inlined_call_operand.vmem [shape: f32[1,128], index: 2, kind: input, shape index: {}]   ;;  %s1416_s3 = inlined_call_operand.vmem [shape: bf16[2,128], index: 3, kind: output, shape index: {}]  }
   0x1   :  { %v1075_v0 = vld [vmem:[%s1413_s1 + $0x40] sm:$0xff]   ;;  %v1079_v4 = vld [vmem:[%s1413_s1 + $0x48] sm:$0xff]   ;;  %v1083_v8 = vld [vmem:[%s1413_s1 + $0x50] sm:$0xff]   ;;  %v172_v22 = vunpack.c.l.s4 %v1148_v21 }
   0x2   :  { %v1076_v1 = vld [vmem:[%s1413_s1] sm:$0xff]   ;;  %955 = vmatprep.subr.bf16.mxu0 %v1075_v0  ;;  %v1080_v5 = vld [vmem:[%s1413_s1 + $0x8] sm:$0xff]   ;;  %v1084_v9 = vld [vmem:[%s1413_s1 + $0x10] sm:$0xff]   ;;  %v175_v29 = vshrl.u32 %v174_v23, 7 }
   0x3   :  { %v1077_v2 = vld [vmem:[%s1413_s1 + $0xc0] sm:$0xff]   ;;  %956 = vmatpush3.bf16.msra.mxu0 %v1076_v1  ;;  %v1081_v6 = vld [vmem:[%s1413_s1 + $0xc8] sm:$0xff]   ;;  %v1085_v10 = vld [vmem:[%s1413_s1 + $0xd0] sm:$0xff]   ;;  %v173_v28 = vunpack.c.0.s8 %v172_v22 }
   0x4   :  { %v1078_v3 = vld [vmem:[%s1413_s1 + $0x80] sm:$0xff]   ;;  %977 = vmatprep.subr.bf16.mxu1 %v1077_v2  ;;  %957 = vmatprep.subr.bf16.mxu0 %v1079_v4  ;;  %v1082_v7 = vld [vmem:[%s1413_s1 + $0x88] sm:$0xff]   ;;  %v1086_v11 = vld [vmem:[%s1413_s1 + $0x90] sm:$0xff]  }
   0x5   :  { %978 = vmatpush3.bf16.msra.mxu1 %v1078_v3  ;;  %v1087_v12 = vld [vmem:[%s1413_s1 + $0x58] sm:$0xff]   ;;  %v1091_v16 = vld [vmem:[%s1413_s1 + $0x60] sm:$0xff]   ;;  %v1095_v20 = vld [vmem:[%s1413_s1 + $0x68] sm:$0xff]   ;;  %v1258_v34 = vsub.s32 %v173_v28, %v175_v29 }
   0x6   :  { %979 = vmatprep.subr.bf16.mxu1 %v1081_v6  ;;  %v1088_v13 = vld [vmem:[%s1413_s1 + $0x18] sm:$0xff]   ;;  %v1092_v17 = vld [vmem:[%s1413_s1 + $0x20] sm:$0xff]   ;;  %v1096_v24 = vld [vmem:[%s1413_s1 + $0x28] sm:$0xff]  }
   0x7   :  { %958 = vmatpush3.bf16.msra.mxu0 %v1080_v5  ;;  %v1089_v14 = vld [vmem:[%s1413_s1 + $0xd8] sm:$0xff]   ;;  %v1093_v18 = vld [vmem:[%s1413_s1 + $0xe0] sm:$0xff]   ;;  %v1097_v25 = vld [vmem:[%s1413_s1 + $0xe8] sm:$0xff]  }
   0x8   :  { %959 = vmatprep.subr.bf16.mxu0 %v1083_v8  ;;  %v1090_v15 = vld [vmem:[%s1413_s1 + $0x98] sm:$0xff]   ;;  %v1094_v19 = vld [vmem:[%s1413_s1 + $0xa0] sm:$0xff]   ;;  %v1098_v26 = vld [vmem:[%s1413_s1 + $0xa8] sm:$0xff]  }
   0x9   :  { %980 = vmatpush3.bf16.msra.mxu1 %v1082_v7  ;;  %v1099_v27 = vld [vmem:[%s1413_s1 + $0x70] sm:$0xff]   ;;  %v1103_v33 = vld [vmem:[%s1413_s1 + $0x78] sm:$0xff]   ;;  %v15_v37 = vld [vmem:[%s1414_s0] sm:$0xff] }
   0xa   :  { %981 = vmatprep.subr.bf16.mxu1 %v1085_v10  ;;  %v1100_v30 = vld [vmem:[%s1413_s1 + $0x30] sm:$0xff]   ;;  %v1104_v35 = vld [vmem:[%s1413_s1 + $0x38] sm:$0xff]   ;;  %v170_v38 = vcombine.high %v15_v37, %v15_v37  ;;  %v177_v39 = vrot.slane %v15_v37, %v1258_v34  ;;  %v1108_v41 = vld [vmem:[%s1413_s1 + $0x140] sm:$0xff]  }
   0xb   :  { %960 = vmatpush3.bf16.msra.mxu0 %v1084_v9  ;;  %v1101_v31 = vld [vmem:[%s1413_s1 + $0xf0] sm:$0xff]   ;;  %v1105_v36 = vld [vmem:[%s1413_s1 + $0xf8] sm:$0xff]   ;;  %v1110_v45 = vld [vmem:[%s1413_s1 + $0x1c0] sm:$0xff]  }
   0xc   :  { %961 = vmatprep.subr.bf16.mxu0 %v1087_v12  ;;  %v1102_v32 = vld [vmem:[%s1413_s1 + $0xb0] sm:$0xff]   ;;  %v1107_v40 = vld [vmem:[%s1413_s1 + $0xb8] sm:$0xff]   ;;  %v185_v42 = vcombine.high %v177_v39, %v177_v39  ;;  %v193_v43 = vrot.slane %v177_v39, %v1258_v34  ;;  %v1278_v44 = vrot.slane %v170_v38, %v1258_v34  ;;  %v1109_v47 = vld [vmem:[%s1413_s1 + $0x100] sm:$0xff]  }
   0xd   :  { %982 = vmatpush3.bf16.msra.mxu1 %v1086_v11  ;;  %v1112_v50 = vld [vmem:[%s1413_s1 + $0x148] sm:$0xff]   ;;  %v1111_v52 = vld [vmem:[%s1413_s1 + $0x180] sm:$0xff]   ;;  %v1116_v57 = vld [vmem:[%s1413_s1 + $0x150] sm:$0xff]  }
   0xe   :  { %983 = vmatprep.subr.bf16.mxu1 %v1089_v14  ;;  %v207_v46 = vrot.slane %v185_v42, %v1258_v34  ;;  %v186_v48 = vcombine.high %v1278_v44, %v1278_v44  ;;  %v215_v49 = vcombine.high %v193_v43, %v193_v43  ;;  %v1114_v54 = vld [vmem:[%s1413_s1 + $0x1c8] sm:$0xff]   ;;  %v1118_v59 = vld [vmem:[%s1413_s1 + $0x1d0] sm:$0xff]   ;;  %v1120_v61 = vld [vmem:[%s1413_s1 + $0x158] sm:$0xff]  }
   0xf   :  { %962 = vmatpush3.bf16.msra.mxu0 %v1088_v13  ;;  %v1113_v55 = vld [vmem:[%s1413_s1 + $0x108] sm:$0xff]   ;;  %v1117_v60 = vld [vmem:[%s1413_s1 + $0x110] sm:$0xff]   ;;  %v1122_v63 = vld [vmem:[%s1413_s1 + $0x1d8] sm:$0xff]  }
  0x10   :  { %963 = vmatprep.subr.bf16.mxu0 %v1091_v16  ;;  %706 = vmatprep.mubr.bf16.mxu0 %v207_v46  ;;  %v217_v51 = vcombine.high %v207_v46, %v207_v46  ;;  %v214_v53 = vrot.slane %v186_v48, %v1258_v34  ;;  %v1115_v58 = vld [vmem:[%s1413_s1 + $0x188] sm:$0xff]   ;;  %v1119_v62 = vld [vmem:[%s1413_s1 + $0x190] sm:$0xff]   ;;  %v1121_v0 = vld [vmem:[%s1413_s1 + $0x118] sm:$0xff]  }
  0x11   :  { %984 = vmatpush3.bf16.msra.mxu1 %v1090_v15  ;;  %v1124_v1 = vld [vmem:[%s1413_s1 + $0x160] sm:$0xff]   ;;  %v1123_v2 = vld [vmem:[%s1413_s1 + $0x198] sm:$0xff]   ;;  %v1128_v5 = vld [vmem:[%s1413_s1 + $0x168] sm:$0xff]  }
  0x12   :  { %985 = vmatprep.subr.bf16.mxu1 %v1093_v18  ;;  %746 = vmatprep.mubr.bf16.mxu1 %v217_v51  ;;  %v218_v56 = vcombine.high %v214_v53, %v214_v53  ;;  %v1126_v3 = vld [vmem:[%s1413_s1 + $0x1e0] sm:$0xff]   ;;  %v1130_v7 = vld [vmem:[%s1413_s1 + $0x1e8] sm:$0xff]   ;;  %v1132_v9 = vld [vmem:[%s1413_s1 + $0x170] sm:$0xff]  }
  0x13   :  { %964 = vmatpush3.bf16.msra.mxu0 %v1092_v17  ;;  %v1125_v4 = vld [vmem:[%s1413_s1 + $0x120] sm:$0xff]   ;;  %v1129_v8 = vld [vmem:[%s1413_s1 + $0x128] sm:$0xff]   ;;  %v1134_v11 = vld [vmem:[%s1413_s1 + $0x1f0] sm:$0xff]   ;;  %v200_v17 = vrot.slane %v1278_v44, %v1258_v34 }
  0x14   :  { %965 = vmatprep.subr.bf16.mxu0 %v1095_v20  ;;  %v1127_v6 = vld [vmem:[%s1413_s1 + $0x1a0] sm:$0xff]   ;;  %v1131_v10 = vld [vmem:[%s1413_s1 + $0x1a8] sm:$0xff]   ;;  %v1133_v12 = vld [vmem:[%s1413_s1 + $0x130] sm:$0xff]   ;;  %v1149_v20 = vmov 0.0  }
  0x15   :  { %986 = vmatpush3.bf16.msra.mxu1 %v1094_v19  ;;  %v1136_v13 = vld [vmem:[%s1413_s1 + $0x178] sm:$0xff]   ;;  %v1135_v14 = vld [vmem:[%s1413_s1 + $0x1b0] sm:$0xff]   ;;  %v1140_v19 = vld [vmem:[%s1413_s1 + $0x200] sm:$0xff]   ;;  %v216_v21 = vcombine.high %v200_v17, %v200_v17 }
  0x16   :  { %987 = vmatprep.subr.bf16.mxu1 %v1097_v25  ;;  %v1138_v15 = vld [vmem:[%s1413_s1 + $0x1f8] sm:$0xff]   ;;  %v1141_v22 = vld [vmem:[%s1413_s1 + $0x208] sm:$0xff]   ;;  %v1142_v25 = vld [vmem:[%s1413_s1 + $0x210] sm:$0xff]  }
  0x17   :  { %966 = vmatpush3.bf16.msra.mxu0 %v1096_v24  ;;  %v1137_v16 = vld [vmem:[%s1413_s1 + $0x138] sm:$0xff]   ;;  %v882_v23 = vld.sshfl [vmem:[%s1414_s0 + $0x8] sm:$0x1 pattern:$0x75316420]  ;;  %v1146_v29 = vld [vmem:[%s1413_s1 + $0x230] sm:$0xff]  }
  0x18   :  { %967 = vmatprep.subr.bf16.mxu0 %v1099_v27  ;;  %v1139_v18 = vld [vmem:[%s1413_s1 + $0x1b8] sm:$0xff]   ;;  %v232_v24 = vrot.slane %v882_v23, %v1258_v34  ;;  %v1144_v27 = vld [vmem:[%s1413_s1 + $0x220] sm:$0xff]   ;;  %v1145_v28 = vld [vmem:[%s1413_s1 + $0x228] sm:$0xff]  }
  0x19   :  { %988 = vmatpush3.bf16.msra.mxu1 %v1098_v26  ;;  %v1143_v26 = vld [vmem:[%s1413_s1 + $0x218] sm:$0xff]  }
  0x1a   :  { %989 = vmatprep.subr.bf16.mxu1 %v1101_v31 }
  0x1b   :  { %968 = vmatpush3.bf16.msra.mxu0 %v1100_v30  ;;  %v1147_v30 = vld [vmem:[%s1413_s1 + $0x238] sm:$0xff]  }
  0x1c   :  { %969 = vmatprep.subr.bf16.mxu0 %v1103_v33 }
  0x1d   :  { %990 = vmatpush3.bf16.msra.mxu1 %v1102_v32  ;;  %v881_v32 = vld [vmem:[%s1415_s2] ss:$0 sm:$0xff] }
  0x1e   :  { %991 = vmatprep.subr.bf16.mxu1 %v1105_v36 }
  0x1f   :  { %970 = vmatpush3.bf16.msra.mxu0 %v1104_v35 }
  0x20   :  { %999 = vmatprep.subr.bf16.mxu0 %v1108_v41 }
  0x21   :  { %992 = vmatpush3.bf16.msra.mxu1 %v1107_v40 }
  0x22   :  { %1021 = vmatprep.subr.bf16.mxu1 %v1110_v45  ;;  %707 = vmatmul.mubr.bf16.vlgmr.msra.gmra.mrb[0].mxu0 %v193_v43 }
  0x23   :  { %1000 = vmatpush3.bf16.msra.mxu0 %v1109_v47  ;;  %786 = vmatprep.mubr.bf16.mxu0 %v214_v53 }
  0x24   :  { %747 = vmatmul.mubr.bf16.vlgmr.msra.gmra.mrb[0].mxu1 %v215_v49  ;;  %1001 = vmatprep.subr.bf16.mxu0 %v1112_v50 }
  0x25   :  { %1022 = vmatpush3.bf16.msra.mxu1 %v1111_v52  ;;  %826 = vmatprep.mubr.bf16.mxu1 %v218_v56 }
  0x26   :  { %1023 = vmatprep.subr.bf16.mxu1 %v1114_v54 }
  0x27   :  { %1002 = vmatpush3.bf16.msra.mxu0 %v1113_v55 }
  0x28   :  { %1003 = vmatprep.subr.bf16.mxu0 %v1116_v57 }
  0x29   :  { %1024 = vmatpush3.bf16.msra.mxu1 %v1115_v58 }
  0x2a   :  { %1025 = vmatprep.subr.bf16.mxu1 %v1118_v59 }
  0x2b   :  { %1004 = vmatpush3.bf16.msra.mxu0 %v1117_v60 }
  0x2c   :  { %1005 = vmatprep.subr.bf16.mxu0 %v1120_v61 }
  0x2d   :  { %1026 = vmatpush3.bf16.msra.mxu1 %v1119_v62 }
  0x2e   :  { %1027 = vmatprep.subr.bf16.mxu1 %v1122_v63 }
  0x2f   :  { %1006 = vmatpush3.bf16.msra.mxu0 %v1121_v0 }
  0x30   :  { %1007 = vmatprep.subr.bf16.mxu0 %v1124_v1 }
  0x31   :  { %1028 = vmatpush3.bf16.msra.mxu1 %v1123_v2 }
  0x32   :  { %1029 = vmatprep.subr.bf16.mxu1 %v1126_v3 }
  0x33   :  { %1008 = vmatpush3.bf16.msra.mxu0 %v1125_v4 }
  0x34   :  { %1009 = vmatprep.subr.bf16.mxu0 %v1128_v5 }
  0x35   :  { %1030 = vmatpush3.bf16.msra.mxu1 %v1127_v6 }
  0x36   :  { %1031 = vmatprep.subr.bf16.mxu1 %v1130_v7 }
  0x37   :  { %1010 = vmatpush3.bf16.msra.mxu0 %v1129_v8 }
  0x38   :  { %1011 = vmatprep.subr.bf16.mxu0 %v1132_v9 }
  0x39   :  { %1032 = vmatpush3.bf16.msra.mxu1 %v1131_v10 }
  0x3a   :  { %1033 = vmatprep.subr.bf16.mxu1 %v1134_v11 }
  0x3b   :  { %1012 = vmatpush3.bf16.msra.mxu0 %v1133_v12 }
  0x3c   :  { %1013 = vmatprep.subr.bf16.mxu0 %v1136_v13 }
  0x3d   :  { %1034 = vmatpush3.bf16.msra.mxu1 %v1135_v14 }
  0x3e   :  { %1035 = vmatprep.subr.bf16.mxu1 %v1138_v15 }
  0x3f   :  { %1014 = vmatpush3.bf16.msra.mxu0 %v1137_v16 }
  0x40   :  { %1052 = vmatprep.subr.bf16.mxu0 %v1149_v20 }
  0x41   :  { %1036 = vmatpush3.bf16.msra.mxu1 %v1139_v18 }
  0x42   :  { %787 = vmatmul.mubr.bf16.vlgmr.msra.gmra.mrb[4].mxu0 %v200_v17 }
  0x43   :  { %1053 = vmatpush3.bf16.msra.mxu0 %v1140_v19  ;;  %1068 = vmatprep.mubr.msk.bf16.mxu0 %vm1150_vm0, %v1149_v20 }
  0x44   :  { %827 = vmatmul.mubr.bf16.vlgmr.msra.gmra.mrb[4].mxu1 %v216_v21  ;;  %1054 = vmatprep.subr.bf16.mxu0 %v1149_v20 }
  0x47   :  { %1055 = vmatpush3.bf16.msra.mxu0 %v1141_v22 }
  0x48   :  { %1056 = vmatprep.subr.bf16.mxu0 %v1149_v20 }
  0x4b   :  { %1057 = vmatpush3.bf16.msra.mxu0 %v1142_v25 }
  0x4c   :  { %1058 = vmatprep.subr.bf16.mxu0 %v1149_v20 }
  0x4f   :  { %1059 = vmatpush3.bf16.msra.mxu0 %v1143_v26 }
  0x50   :  { %1060 = vmatprep.subr.bf16.mxu0 %v1149_v20 }
  0x53   :  { %1061 = vmatpush3.bf16.msra.mxu0 %v1144_v27 }
  0x54   :  { %1062 = vmatprep.subr.bf16.mxu0 %v1149_v20 }
  0x57   :  { %1063 = vmatpush3.bf16.msra.mxu0 %v1145_v28 }
  0x58   :  { %1064 = vmatprep.subr.bf16.mxu0 %v1149_v20 }
  0x5b   :  { %1065 = vmatpush3.bf16.msra.mxu0 %v1146_v29 }
  0x5c   :  { %1066 = vmatprep.subr.bf16.mxu0 %v1149_v20 }
  0x5f   :  { %1067 = vmatpush3.bf16.msra.mxu0 %v1147_v30 }
  0x62   :  { %1069 = vmatmul.mubr.bf16.vlgmr.msra.gmra.mrb[8].mxu0 %v232_v24 }
  0xf5   :  { %v971_v31 = vpop.f32.mrb[0].mxu0 }
  0xf6   :  { %v972_v33 = vpop.f32.mrb[1].mxu0 }
  0xf7   :  { %v973_v34 = vadd.f32 %v972_v33, %v971_v31  ;;  %v974_v35 = vpop.f32.mrb[2].mxu0  ;;  %v993_v36 = vpop.f32.mrb[0].mxu1 }
  0xf8   :  { %v975_v37 = vpop.f32.mrb[3].mxu0  ;;  %v994_v38 = vpop.f32.mrb[1].mxu1 }
  0xf9   :  { %v709_v39 = vadd.f32 %v973_v34, %v881_v32  ;;  %v995_v40 = vadd.f32 %v994_v38, %v993_v36  ;;  %v996_v41 = vpop.f32.mrb[2].mxu1 }
  0xfa   :  { %v997_v42 = vpop.f32.mrb[3].mxu1 }
  0xfb   :  { %v749_v43 = vadd.f32 %v995_v40, %v709_v39 }
 0x115   :  { %v1015_v44 = vpop.f32.mrb[4].mxu0 }
 0x116   :  { %v1016_v45 = vpop.f32.mrb[5].mxu0 }
 0x117   :  { %v1017_v46 = vadd.f32 %v1016_v45, %v1015_v44  ;;  %v1018_v47 = vpop.f32.mrb[6].mxu0  ;;  %v1037_v48 = vpop.f32.mrb[4].mxu1 }
 0x118   :  { %v1019_v49 = vpop.f32.mrb[7].mxu0  ;;  %v1038_v50 = vpop.f32.mrb[5].mxu1 }
 0x119   :  { %v789_v51 = vadd.f32 %v1017_v46, %v749_v43  ;;  %v1039_v52 = vadd.f32 %v1038_v50, %v1037_v48  ;;  %v1040_v53 = vpop.f32.mrb[6].mxu1 }
 0x11a   :  { %v1041_v54 = vpop.f32.mrb[7].mxu1 }
 0x11b   :  { %v829_v55 = vadd.f32 %v1039_v52, %v789_v51 }
 0x135   :  { %v868_v56 = vpop.f32.mrb[8].mxu0 }
 0x136   :  { %v869_v57 = vadd.f32 %v868_v56, %v829_v55  ;;  %v1070_v58 = vpop.f32.mrb[9].mxu0 }
 0x137   :  { %v871_v59 = vpop.f32.mrb[10].mxu0 }
 0x138   :  { %v874_v60 = vmax.f32 %v869_v57, 0.0  ;;  %v1071_v61 = vpop.f32.mrb[11].mxu0 }
 0x13a   :  { %v875_v62 = vpack.c.bf16 %v874_v60, %v874_v60 }
 0x13c   :  { %876 = vst [vmem:[%s1416_s3] sm:$0x1] %v875_v62 }

// kernel: _lambda_.19
= control target key start
LH: loop header
LB: loop body
LE: loop exit
PB: predicated region body
PF: predicated region fallthrough
CT: control target
= control target key end

     0   :  { %v216_v1 = vmov 0.0   ;;  %vm217_vm0 = vmmov 0   ;;  %s281_s0 = inlined_call_operand.vmem [shape: bf16[2,128], index: 0, kind: input, shape index: {}]   ;;  %s282_s1 = inlined_call_operand.vmem [shape: bf16[128,128], index: 1, kind: input, shape index: {}]   ;;  %s283_s2 = inlined_call_operand.vmem [shape: f32[1,128], index: 2, kind: input, shape index: {}]   ;;  %s284_s3 = inlined_call_operand.hbm [shape: f32[2,128], index: 3, kind: output, shape index: {}]  }
   0x1   :  { %v184_v0 = vld [vmem:[%s282_s1] sm:$0xff]   ;;  %161 = vmatprep.subr.bf16.mxu0 %v216_v1  ;;  %v185_v2 = vld [vmem:[%s282_s1 + $0x8] sm:$0xff]   ;;  %177 = vmatprep.mubr.msk.bf16.mxu0 %vm217_vm0, %v216_v1  ;;  %v186_v3 = vld [vmem:[%s282_s1 + $0x10] sm:$0xff]  }
   0x2   :  { %162 = vmatpush3.bf16.msra.mxu0 %v184_v0 }
   0x3   :  { %163 = vmatprep.subr.bf16.mxu0 %v216_v1 }
   0x6   :  { %164 = vmatpush3.bf16.msra.mxu0 %v185_v2 }
   0x7   :  { %165 = vmatprep.subr.bf16.mxu0 %v216_v1 }
   0x8   :  { %8 = vsyncpa [#allocation3], 0  ;;  %v187_v4 = vld [vmem:[%s282_s1 + $0x18] sm:$0xff]   ;;  %v188_v5 = vld [vmem:[%s282_s1 + $0x20] sm:$0xff]   ;;  %s218_s5 = smov [#allocation2]  }
   0x9   :  { %v189_v6 = vld [vmem:[%s282_s1 + $0x28] sm:$0xff]   ;;  %v190_v7 = vld [vmem:[%s282_s1 + $0x30] sm:$0xff]   ;;  %v191_v8 = vld [vmem:[%s282_s1 + $0x38] sm:$0xff]   ;;  %s135_s6 = sshll.u32 %s218_s5, 4  ;;  %s136_s6 = int_to_ptr.vmem [resolvable:$true] %s135_s6 }
   0xa   :  { %166 = vmatpush3.bf16.msra.mxu0 %v186_v3  ;;  %v16_v9 = vld [vmem:[%s281_s0] sm:$0x1]  ;;  %s192_s1 = scalar_lea.vmem %s136_s6, 32  ;;  %p197_p1 = scmp.lt.s32.totalorder %s136_s6, %s136_s6 }
   0xb   :  { %167 = vmatprep.subr.bf16.mxu0 %v216_v1  ;;  %v143_v10 = vld [vmem:[%s283_s2] ss:$0 sm:$0xff]  ;;  %p193_p0 = scmp.ne.s32.totalorder %s136_s6, %s192_s1  ;;  %p198_p2 = scmp.lt.s32.totalorder %s192_s1, %s192_s1 }
   0xd   :  { %p199_p3 = por %p198_p2, %p197_p1 }
   0xe   :  { %168 = vmatpush3.bf16.msra.mxu0 %v187_v4 }
   0xf   :  { %169 = vmatprep.subr.bf16.mxu0 %v216_v1  ;;  %p200_p4 = pnand %p199_p3, %p193_p0 }
  0x12   :  { %170 = vmatpush3.bf16.msra.mxu0 %v188_v5 }
  0x13   :  { %171 = vmatprep.subr.bf16.mxu0 %v216_v1 }
  0x16   :  { %172 = vmatpush3.bf16.msra.mxu0 %v189_v6 }
  0x17   :  { %173 = vmatprep.subr.bf16.mxu0 %v216_v1 }
  0x1a   :  { %174 = vmatpush3.bf16.msra.mxu0 %v190_v7 }
  0x1b   :  { %175 = vmatprep.subr.bf16.mxu0 %v216_v1 }
  0x1e   :  { %176 = vmatpush3.bf16.msra.mxu0 %v191_v8 }
  0x21   :  { %178 = vmatmul.mubr.bf16.vlgmr.msra.gmra.mrb[0].mxu0 %v16_v9 }
  0xf4   :  { %v122_v11 = vpop.f32.mrb[0].mxu0 }
  0xf5   :  { %v123_v12 = vadd.f32 %v143_v10, %v122_v11  ;;  %v179_v13 = vpop.f32.mrb[1].mxu0 }
  0xf6   :  { %v125_v14 = vpop.f32.mrb[2].mxu0 }
  0xf7   :  { %128 = vst [vmem:[#allocation2] sm:$0x3] %v123_v12  ;;  %v180_v15 = vpop.f32.mrb[3].mxu0 }
  0xf8   :  { %203 = shalt.err (!%p200_p4)
}
  0xf9   :  { %s204_s2 = scalar_lea.hbm %s284_s3, 32 }
  0xfa   :  { %p205_p5 = scmp.ne.s32.totalorder %s284_s3, %s204_s2  ;;  %p208_p6 = scmp.lt.u32.totalorder %s204_s2, %s284_s3 }
  0xfc   :  { %p210_p7 = pnand %p208_p6, %p205_p5 }
  0xfe   :  { %213 = shalt.err (!%p210_p7)
}
  0xff   :  { %138 = dma.vmem_to_hbm [thread:$0]  %s136_s6, 32, %s284_s3, [#allocation3]  }
 0x100   :  { %214 = dma.done.wait [#allocation3], 32  }
 0x101   :  { %215 = vsyncadd [#allocation3], 4294967264 }
 0x102   :  { %142 = vsyncpa [#allocation3], 1 }

// kernel: _lambda_.16
= control target key start
LH: loop header
LB: loop body
LE: loop exit
PB: predicated region body
PF: predicated region fallthrough
CT: control target
= control target key end

     0   :  { %s1481_s1 = inlined_call_operand.vmem [shape: bf16[1280,128], index: 1, kind: input, shape index: {}]   ;;  %s1482_s0 = inlined_call_operand.vmem [shape: bf16[8,1280], index: 0, kind: input, shape index: {}]   ;;  %s1483_s2 = inlined_call_operand.vmem [shape: f32[1,128], index: 2, kind: input, shape index: {}]   ;;  %s1484_s3 = inlined_call_operand.vmem [shape: bf16[8,128], index: 3, kind: output, shape index: {}]  }
   0x1   :  { %v1110_v0 = vld [vmem:[%s1481_s1 + $0x40] sm:$0xff]   ;;  %v1114_v4 = vld [vmem:[%s1481_s1 + $0x48] sm:$0xff]   ;;  %v1118_v8 = vld [vmem:[%s1481_s1 + $0x50] sm:$0xff]  }
   0x2   :  { %v1111_v1 = vld [vmem:[%s1481_s1] sm:$0xff]   ;;  %1000 = vmatprep.subr.bf16.mxu0 %v1110_v0  ;;  %v1115_v5 = vld [vmem:[%s1481_s1 + $0x8] sm:$0xff]   ;;  %v1119_v9 = vld [vmem:[%s1481_s1 + $0x10] sm:$0xff]  }
   0x3   :  { %v1112_v2 = vld [vmem:[%s1481_s1 + $0xc0] sm:$0xff]   ;;  %1001 = vmatpush3.bf16.msra.mxu0 %v1111_v1  ;;  %v1116_v6 = vld [vmem:[%s1481_s1 + $0xc8] sm:$0xff]   ;;  %v1120_v10 = vld [vmem:[%s1481_s1 + $0xd0] sm:$0xff]  }
   0x4   :  { %v1113_v3 = vld [vmem:[%s1481_s1 + $0x80] sm:$0xff]   ;;  %1022 = vmatprep.subr.bf16.mxu1 %v1112_v2  ;;  %1002 = vmatprep.subr.bf16.mxu0 %v1114_v4  ;;  %v1117_v7 = vld [vmem:[%s1481_s1 + $0x88] sm:$0xff]   ;;  %v1121_v11 = vld [vmem:[%s1481_s1 + $0x90] sm:$0xff]  }
   0x5   :  { %1023 = vmatpush3.bf16.msra.mxu1 %v1113_v3  ;;  %v1122_v12 = vld [vmem:[%s1481_s1 + $0x58] sm:$0xff]   ;;  %v1126_v16 = vld [vmem:[%s1481_s1 + $0x60] sm:$0xff]   ;;  %v1130_v20 = vld [vmem:[%s1481_s1 + $0x68] sm:$0xff]  }
   0x6   :  { %1024 = vmatprep.subr.bf16.mxu1 %v1116_v6  ;;  %v1123_v13 = vld [vmem:[%s1481_s1 + $0x18] sm:$0xff]   ;;  %v1127_v17 = vld [vmem:[%s1481_s1 + $0x20] sm:$0xff]   ;;  %v1131_v21 = vld [vmem:[%s1481_s1 + $0x28] sm:$0xff]  }
   0x7   :  { %1003 = vmatpush3.bf16.msra.mxu0 %v1115_v5  ;;  %v1124_v14 = vld [vmem:[%s1481_s1 + $0xd8] sm:$0xff]   ;;  %v1128_v18 = vld [vmem:[%s1481_s1 + $0xe0] sm:$0xff]   ;;  %v1132_v22 = vld [vmem:[%s1481_s1 + $0xe8] sm:$0xff]  }
   0x8   :  { %1004 = vmatprep.subr.bf16.mxu0 %v1118_v8  ;;  %v1125_v15 = vld [vmem:[%s1481_s1 + $0x98] sm:$0xff]   ;;  %v1129_v19 = vld [vmem:[%s1481_s1 + $0xa0] sm:$0xff]   ;;  %v1133_v23 = vld [vmem:[%s1481_s1 + $0xa8] sm:$0xff]  }
   0x9   :  { %1025 = vmatpush3.bf16.msra.mxu1 %v1117_v7  ;;  %v1134_v24 = vld [vmem:[%s1481_s1 + $0x70] sm:$0xff]   ;;  %v1138_v28 = vld [vmem:[%s1481_s1 + $0x78] sm:$0xff]   ;;  %v15_v31 = vld [vmem:[%s1482_s0] sm:$0xff] }
   0xa   :  { %1026 = vmatprep.subr.bf16.mxu1 %v1120_v10  ;;  %v1135_v25 = vld [vmem:[%s1481_s1 + $0x30] sm:$0xff]   ;;  %v1139_v29 = vld [vmem:[%s1481_s1 + $0x38] sm:$0xff]   ;;  %v910_v32 = vcombine.low %v15_v31, %v15_v31  ;;  %v911_v33 = vcombine.high %v15_v31, %v15_v31  ;;  %v1144_v35 = vld [vmem:[%s1481_s1 + $0x140] sm:$0xff]  }
   0xb   :  { %1005 = vmatpush3.bf16.msra.mxu0 %v1119_v9  ;;  %v1136_v26 = vld [vmem:[%s1481_s1 + $0xf0] sm:$0xff]   ;;  %v1140_v30 = vld [vmem:[%s1481_s1 + $0xf8] sm:$0xff]   ;;  %v16_v36 = vld [vmem:[%s1482_s0 + $0x8] sm:$0xff] }
   0xc   :  { %1006 = vmatprep.subr.bf16.mxu0 %v1122_v12  ;;  %v1137_v27 = vld [vmem:[%s1481_s1 + $0xb0] sm:$0xff]   ;;  %v1143_v34 = vld [vmem:[%s1481_s1 + $0xb8] sm:$0xff]   ;;  %734 = vmatprep.mubr.bf16.mxu0 %v911_v33  ;;  %v912_v37 = vcombine.low %v16_v36, %v16_v36  ;;  %v913_v38 = vcombine.high %v16_v36, %v16_v36  ;;  %v1147_v39 = vld [vmem:[%s1481_s1 + $0x100] sm:$0xff]  }
   0xd   :  { %1027 = vmatpush3.bf16.msra.mxu1 %v1121_v11  ;;  %v1148_v40 = vld [vmem:[%s1481_s1 + $0x1c0] sm:$0xff]   ;;  %v1150_v42 = vld [vmem:[%s1481_s1 + $0x148] sm:$0xff]   ;;  %v1154_v46 = vld [vmem:[%s1481_s1 + $0x150] sm:$0xff]  }
   0xe   :  { %1028 = vmatprep.subr.bf16.mxu1 %v1124_v14  ;;  %774 = vmatprep.mubr.bf16.mxu1 %v913_v38  ;;  %v1149_v41 = vld [vmem:[%s1481_s1 + $0x180] sm:$0xff]   ;;  %v1151_v43 = vld [vmem:[%s1481_s1 + $0x108] sm:$0xff]   ;;  %v1155_v47 = vld [vmem:[%s1481_s1 + $0x110] sm:$0xff]  }
   0xf   :  { %1007 = vmatpush3.bf16.msra.mxu0 %v1123_v13  ;;  %v1152_v44 = vld [vmem:[%s1481_s1 + $0x1c8] sm:$0xff]   ;;  %v1156_v48 = vld [vmem:[%s1481_s1 + $0x1d0] sm:$0xff]   ;;  %v1158_v50 = vld [vmem:[%s1481_s1 + $0x158] sm:$0xff]  }
  0x10   :  { %1008 = vmatprep.subr.bf16.mxu0 %v1126_v16  ;;  %v1153_v45 = vld [vmem:[%s1481_s1 + $0x188] sm:$0xff]   ;;  %v1157_v49 = vld [vmem:[%s1481_s1 + $0x190] sm:$0xff]   ;;  %v1159_v51 = vld [vmem:[%s1481_s1 + $0x118] sm:$0xff]  }
  0x11   :  { %1029 = vmatpush3.bf16.msra.mxu1 %v1125_v15  ;;  %v1160_v52 = vld [vmem:[%s1481_s1 + $0x1d8] sm:$0xff]   ;;  %v1162_v54 = vld [vmem:[%s1481_s1 + $0x160] sm:$0xff]   ;;  %v1166_v58 = vld [vmem:[%s1481_s1 + $0x168] sm:$0xff]  }
  0x12   :  { %1030 = vmatprep.subr.bf16.mxu1 %v1128_v18  ;;  %v1161_v53 = vld [vmem:[%s1481_s1 + $0x198] sm:$0xff]   ;;  %v1163_v55 = vld [vmem:[%s1481_s1 + $0x120] sm:$0xff]   ;;  %v1167_v59 = vld [vmem:[%s1481_s1 + $0x128] sm:$0xff]  }
  0x13   :  { %1009 = vmatpush3.bf16.msra.mxu0 %v1127_v17  ;;  %v1164_v56 = vld [vmem:[%s1481_s1 + $0x1e0] sm:$0xff]   ;;  %v1168_v60 = vld [vmem:[%s1481_s1 + $0x1e8] sm:$0xff]   ;;  %v1170_v62 = vld [vmem:[%s1481_s1 + $0x170] sm:$0xff]  }
  0x14   :  { %1010 = vmatprep.subr.bf16.mxu0 %v1130_v20  ;;  %v1165_v57 = vld [vmem:[%s1481_s1 + $0x1a0] sm:$0xff]   ;;  %v1169_v61 = vld [vmem:[%s1481_s1 + $0x1a8] sm:$0xff]   ;;  %v1171_v63 = vld [vmem:[%s1481_s1 + $0x130] sm:$0xff]  }
  0x15   :  { %1031 = vmatpush3.bf16.msra.mxu1 %v1129_v19  ;;  %v1172_v0 = vld [vmem:[%s1481_s1 + $0x1f0] sm:$0xff]   ;;  %v1174_v2 = vld [vmem:[%s1481_s1 + $0x178] sm:$0xff]   ;;  %v1180_v9 = vld [vmem:[%s1481_s1 + $0x240] sm:$0xff]  }
  0x16   :  { %1032 = vmatprep.subr.bf16.mxu1 %v1132_v22  ;;  %v1173_v1 = vld [vmem:[%s1481_s1 + $0x1b0] sm:$0xff]   ;;  %v1175_v3 = vld [vmem:[%s1481_s1 + $0x138] sm:$0xff]   ;;  %v1183_v13 = vld [vmem:[%s1481_s1 + $0x200] sm:$0xff]  }
  0x17   :  { %1011 = vmatpush3.bf16.msra.mxu0 %v1131_v21  ;;  %v1176_v4 = vld [vmem:[%s1481_s1 + $0x1f8] sm:$0xff]   ;;  %v17_v5 = vld [vmem:[%s1482_s0 + $0x10] sm:$0xff]  ;;  %v1184_v14 = vld [vmem:[%s1481_s1 + $0x248] sm:$0xff]  }
  0x18   :  { %1012 = vmatprep.subr.bf16.mxu0 %v1134_v24  ;;  %v914_v6 = vcombine.low %v17_v5, %v17_v5  ;;  %v915_v7 = vcombine.high %v17_v5, %v17_v5  ;;  %v1179_v8 = vld [vmem:[%s1481_s1 + $0x1b8] sm:$0xff]   ;;  %v1185_v15 = vld [vmem:[%s1481_s1 + $0x208] sm:$0xff]   ;;  %v1186_v16 = vld [vmem:[%s1481_s1 + $0x250] sm:$0xff]  }
  0x19   :  { %1033 = vmatpush3.bf16.msra.mxu1 %v1133_v23  ;;  %v18_v10 = vld [vmem:[%s1482_s0 + $0x18] sm:$0xff]  ;;  %v1187_v17 = vld [vmem:[%s1481_s1 + $0x210] sm:$0xff]   ;;  %v1190_v20 = vld [vmem:[%s1481_s1 + $0x260] sm:$0xff]  }
  0x1a   :  { %1034 = vmatprep.subr.bf16.mxu1 %v1136_v26  ;;  %v916_v11 = vcombine.low %v18_v10, %v18_v10  ;;  %v917_v12 = vcombine.high %v18_v10, %v18_v10  ;;  %v1188_v18 = vld [vmem:[%s1481_s1 + $0x258] sm:$0xff]   ;;  %v1191_v21 = vld [vmem:[%s1481_s1 + $0x220] sm:$0xff]   ;;  %v1192_v23 = vld [vmem:[%s1481_s1 + $0x268] sm:$0xff]  }
  0x1b   :  { %1013 = vmatpush3.bf16.msra.mxu0 %v1135_v25  ;;  %v1189_v19 = vld [vmem:[%s1481_s1 + $0x218] sm:$0xff]   ;;  %v19_v22 = vld [vmem:[%s1482_s0 + $0x20] sm:$0xff]  ;;  %v1193_v25 = vld [vmem:[%s1481_s1 + $0x228] sm:$0xff]  }
  0x1c   :  { %1014 = vmatprep.subr.bf16.mxu0 %v1138_v28  ;;  %v919_v24 = vcombine.high %v19_v22, %v19_v22  ;;  %v1194_v26 = vld [vmem:[%s1481_s1 + $0x270] sm:$0xff]   ;;  %v1196_v28 = vld [vmem:[%s1481_s1 + $0x278] sm:$0xff]  }
  0x1d   :  { %1035 = vmatpush3.bf16.msra.mxu1 %v1137_v27  ;;  %v1195_v27 = vld [vmem:[%s1481_s1 + $0x230] sm:$0xff]  }
  0x1e   :  { %1036 = vmatprep.subr.bf16.mxu1 %v1140_v30  ;;  %v918_v30 = vcombine.low %v19_v22, %v19_v22 }
  0x1f   :  { %1015 = vmatpush3.bf16.msra.mxu0 %v1139_v29  ;;  %v1197_v29 = vld [vmem:[%s1481_s1 + $0x238] sm:$0xff]  }
  0x20   :  { %1044 = vmatprep.subr.bf16.mxu0 %v1144_v35 }
  0x21   :  { %1037 = vmatpush3.bf16.msra.mxu1 %v1143_v34 }
  0x22   :  { %735 = vmatmul.mubr.bf16.vlgmr.msra.gmra.mrb[0].mxu0 %v910_v32  ;;  %1066 = vmatprep.subr.bf16.mxu1 %v1148_v40  ;;  %v909_v32 = vld [vmem:[%s1483_s2] ss:$0 sm:$0xff] }
  0x23   :  { %1045 = vmatpush3.bf16.msra.mxu0 %v1147_v39  ;;  %814 = vmatprep.mubr.bf16.mxu0 %v915_v7 }
  0x24   :  { %775 = vmatmul.mubr.bf16.vlgmr.msra.gmra.mrb[0].mxu1 %v912_v37  ;;  %1046 = vmatprep.subr.bf16.mxu0 %v1150_v42 }
  0x25   :  { %1067 = vmatpush3.bf16.msra.mxu1 %v1149_v41  ;;  %854 = vmatprep.mubr.bf16.mxu1 %v917_v12 }
  0x26   :  { %1068 = vmatprep.subr.bf16.mxu1 %v1152_v44 }
  0x27   :  { %1047 = vmatpush3.bf16.msra.mxu0 %v1151_v43 }
  0x28   :  { %1048 = vmatprep.subr.bf16.mxu0 %v1154_v46 }
  0x29   :  { %1069 = vmatpush3.bf16.msra.mxu1 %v1153_v45 }
  0x2a   :  { %1070 = vmatprep.subr.bf16.mxu1 %v1156_v48 }
  0x2b   :  { %1049 = vmatpush3.bf16.msra.mxu0 %v1155_v47 }
  0x2c   :  { %1050 = vmatprep.subr.bf16.mxu0 %v1158_v50 }
  0x2d   :  { %1071 = vmatpush3.bf16.msra.mxu1 %v1157_v49 }
  0x2e   :  { %1072 = vmatprep.subr.bf16.mxu1 %v1160_v52 }
  0x2f   :  { %1051 = vmatpush3.bf16.msra.mxu0 %v1159_v51 }
  0x30   :  { %1052 = vmatprep.subr.bf16.mxu0 %v1162_v54 }
  0x31   :  { %1073 = vmatpush3.bf16.msra.mxu1 %v1161_v53 }
  0x32   :  { %1074 = vmatprep.subr.bf16.mxu1 %v1164_v56 }
  0x33   :  { %1053 = vmatpush3.bf16.msra.mxu0 %v1163_v55 }
  0x34   :  { %1054 = vmatprep.subr.bf16.mxu0 %v1166_v58 }
  0x35   :  { %1075 = vmatpush3.bf16.msra.mxu1 %v1165_v57 }
  0x36   :  { %1076 = vmatprep.subr.bf16.mxu1 %v1168_v60 }
  0x37   :  { %1055 = vmatpush3.bf16.msra.mxu0 %v1167_v59 }
  0x38   :  { %1056 = vmatprep.subr.bf16.mxu0 %v1170_v62 }
  0x39   :  { %1077 = vmatpush3.bf16.msra.mxu1 %v1169_v61 }
  0x3a   :  { %1078 = vmatprep.subr.bf16.mxu1 %v1172_v0 }
  0x3b   :  { %1057 = vmatpush3.bf16.msra.mxu0 %v1171_v63 }
  0x3c   :  { %1058 = vmatprep.subr.bf16.mxu0 %v1174_v2 }
  0x3d   :  { %1079 = vmatpush3.bf16.msra.mxu1 %v1173_v1 }
  0x3e   :  { %1080 = vmatprep.subr.bf16.mxu1 %v1176_v4 }
  0x3f   :  { %1059 = vmatpush3.bf16.msra.mxu0 %v1175_v3 }
  0x40   :  { %1088 = vmatprep.subr.bf16.mxu0 %v1180_v9 }
  0x41   :  { %1081 = vmatpush3.bf16.msra.mxu1 %v1179_v8 }
  0x42   :  { %815 = vmatmul.mubr.bf16.vlgmr.msra.gmra.mrb[4].mxu0 %v914_v6 }
  0x43   :  { %1089 = vmatpush3.bf16.msra.mxu0 %v1183_v13  ;;  %894 = vmatprep.mubr.bf16.mxu0 %v919_v24 }
  0x44   :  { %855 = vmatmul.mubr.bf16.vlgmr.msra.gmra.mrb[4].mxu1 %v916_v11  ;;  %1090 = vmatprep.subr.bf16.mxu0 %v1184_v14 }
  0x47   :  { %1091 = vmatpush3.bf16.msra.mxu0 %v1185_v15 }
  0x48   :  { %1092 = vmatprep.subr.bf16.mxu0 %v1186_v16 }
  0x4b   :  { %1093 = vmatpush3.bf16.msra.mxu0 %v1187_v17 }
  0x4c   :  { %1094 = vmatprep.subr.bf16.mxu0 %v1188_v18 }
  0x4f   :  { %1095 = vmatpush3.bf16.msra.mxu0 %v1189_v19 }
  0x50   :  { %1096 = vmatprep.subr.bf16.mxu0 %v1190_v20 }
  0x53   :  { %1097 = vmatpush3.bf16.msra.mxu0 %v1191_v21 }
  0x54   :  { %1098 = vmatprep.subr.bf16.mxu0 %v1192_v23 }
  0x57   :  { %1099 = vmatpush3.bf16.msra.mxu0 %v1193_v25 }
  0x58   :  { %1100 = vmatprep.subr.bf16.mxu0 %v1194_v26 }
  0x5b   :  { %1101 = vmatpush3.bf16.msra.mxu0 %v1195_v27 }
  0x5c   :  { %1102 = vmatprep.subr.bf16.mxu0 %v1196_v28 }
  0x5f   :  { %1103 = vmatpush3.bf16.msra.mxu0 %v1197_v29 }
  0x62   :  { %895 = vmatmul.mubr.bf16.vlgmr.msra.gmra.mrb[8].mxu0 %v918_v30 }
  0xf5   :  { %v1016_v31 = vpop.f32.mrb[0].mxu0 }
  0xf6   :  { %v1017_v33 = vpop.f32.mrb[1].mxu0 }
  0xf7   :  { %v1018_v34 = vadd.f32 %v1017_v33, %v1016_v31  ;;  %v1019_v35 = vpop.f32.mrb[2].mxu0  ;;  %v1038_v36 = vpop.f32.mrb[0].mxu1 }
  0xf8   :  { %v1020_v37 = vpop.f32.mrb[3].mxu0  ;;  %v1039_v38 = vpop.f32.mrb[1].mxu1 }
  0xf9   :  { %v737_v39 = vadd.f32 %v1018_v34, %v909_v32  ;;  %v1040_v40 = vadd.f32 %v1039_v38, %v1038_v36  ;;  %v1041_v41 = vpop.f32.mrb[2].mxu1 }
  0xfa   :  { %v1042_v42 = vpop.f32.mrb[3].mxu1 }
  0xfb   :  { %v777_v43 = vadd.f32 %v1040_v40, %v737_v39 }
 0x115   :  { %v1060_v44 = vpop.f32.mrb[4].mxu0 }
 0x116   :  { %v1061_v45 = vpop.f32.mrb[5].mxu0 }
 0x117   :  { %v1062_v46 = vadd.f32 %v1061_v45, %v1060_v44  ;;  %v1063_v47 = vpop.f32.mrb[6].mxu0  ;;  %v1082_v48 = vpop.f32.mrb[4].mxu1 }
 0x118   :  { %v1064_v49 = vpop.f32.mrb[7].mxu0  ;;  %v1083_v51 = vpop.f32.mrb[5].mxu1 }
 0x119   :  { %v817_v50 = vadd.f32 %v1062_v46, %v777_v43  ;;  %v1084_v52 = vadd.f32 %v1083_v51, %v1082_v48  ;;  %v1085_v53 = vpop.f32.mrb[6].mxu1 }
 0x11a   :  { %v1086_v54 = vpop.f32.mrb[7].mxu1 }
 0x11b   :  { %v857_v55 = vadd.f32 %v1084_v52, %v817_v50 }
 0x135   :  { %v1104_v56 = vpop.f32.mrb[8].mxu0 }
 0x136   :  { %v1105_v57 = vpop.f32.mrb[9].mxu0 }
 0x137   :  { %v1106_v58 = vadd.f32 %v1105_v57, %v1104_v56  ;;  %v1107_v59 = vpop.f32.mrb[10].mxu0 }
 0x138   :  { %v1108_v60 = vpop.f32.mrb[11].mxu0 }
 0x139   :  { %v897_v61 = vadd.f32 %v1106_v58, %v857_v55 }
 0x13b   :  { %v902_v62 = vmax.f32 %v897_v61, 0.0 }
 0x13d   :  { %v903_v63 = vpack.c.bf16 %v902_v62, %v902_v62 }
 0x13f   :  { %904 = vst [vmem:[%s1484_s3] sm:$0xf] %v903_v63 }

// kernel: _lambda_.18
= control target key start
LH: loop header
LB: loop body
LE: loop exit
PB: predicated region body
PF: predicated region fallthrough
CT: control target
= control target key end

     0   :  { %v1228_v21 = vmov 1966171168   ;;  %v190_v23 = vlaneseq  ;;  %s1516_s1 = inlined_call_operand.vmem [shape: bf16[1280,128], index: 1, kind: input, shape index: {}]   ;;  %s1517_s0 = inlined_call_operand.vmem [shape: bf16[2,1280], index: 0, kind: input, shape index: {}]   ;;  %s1518_s2 = inlined_call_operand.vmem [shape: f32[1,128], index: 2, kind: input, shape index: {}]   ;;  %s1519_s3 = inlined_call_operand.vmem [shape: bf16[2,128], index: 3, kind: output, shape index: {}]  }
   0x1   :  { %v1147_v0 = vld [vmem:[%s1516_s1 + $0x40] sm:$0xff]   ;;  %v1151_v4 = vld [vmem:[%s1516_s1 + $0x48] sm:$0xff]   ;;  %v1155_v8 = vld [vmem:[%s1516_s1 + $0x50] sm:$0xff]   ;;  %v188_v22 = vunpack.c.l.s4 %v1228_v21 }
   0x2   :  { %v1148_v1 = vld [vmem:[%s1516_s1] sm:$0xff]   ;;  %1036 = vmatprep.subr.bf16.mxu0 %v1147_v0  ;;  %v1152_v5 = vld [vmem:[%s1516_s1 + $0x8] sm:$0xff]   ;;  %v1156_v9 = vld [vmem:[%s1516_s1 + $0x10] sm:$0xff]   ;;  %v191_v29 = vshrl.u32 %v190_v23, 7 }
   0x3   :  { %v1149_v2 = vld [vmem:[%s1516_s1 + $0xc0] sm:$0xff]   ;;  %1037 = vmatpush3.bf16.msra.mxu0 %v1148_v1  ;;  %v1153_v6 = vld [vmem:[%s1516_s1 + $0xc8] sm:$0xff]   ;;  %v1157_v10 = vld [vmem:[%s1516_s1 + $0xd0] sm:$0xff]   ;;  %v189_v28 = vunpack.c.0.s8 %v188_v22 }
   0x4   :  { %v1150_v3 = vld [vmem:[%s1516_s1 + $0x80] sm:$0xff]   ;;  %1058 = vmatprep.subr.bf16.mxu1 %v1149_v2  ;;  %1038 = vmatprep.subr.bf16.mxu0 %v1151_v4  ;;  %v1154_v7 = vld [vmem:[%s1516_s1 + $0x88] sm:$0xff]   ;;  %v1158_v11 = vld [vmem:[%s1516_s1 + $0x90] sm:$0xff]  }
   0x5   :  { %1059 = vmatpush3.bf16.msra.mxu1 %v1150_v3  ;;  %v1159_v12 = vld [vmem:[%s1516_s1 + $0x58] sm:$0xff]   ;;  %v1163_v16 = vld [vmem:[%s1516_s1 + $0x60] sm:$0xff]   ;;  %v1167_v20 = vld [vmem:[%s1516_s1 + $0x68] sm:$0xff]   ;;  %v1336_v34 = vsub.s32 %v189_v28, %v191_v29 }
   0x6   :  { %1060 = vmatprep.subr.bf16.mxu1 %v1153_v6  ;;  %v1160_v13 = vld [vmem:[%s1516_s1 + $0x18] sm:$0xff]   ;;  %v1164_v17 = vld [vmem:[%s1516_s1 + $0x20] sm:$0xff]   ;;  %v1168_v24 = vld [vmem:[%s1516_s1 + $0x28] sm:$0xff]  }
   0x7   :  { %1039 = vmatpush3.bf16.msra.mxu0 %v1152_v5  ;;  %v1161_v14 = vld [vmem:[%s1516_s1 + $0xd8] sm:$0xff]   ;;  %v1165_v18 = vld [vmem:[%s1516_s1 + $0xe0] sm:$0xff]   ;;  %v1169_v25 = vld [vmem:[%s1516_s1 + $0xe8] sm:$0xff]  }
   0x8   :  { %1040 = vmatprep.subr.bf16.mxu0 %v1155_v8  ;;  %v1162_v15 = vld [vmem:[%s1516_s1 + $0x98] sm:$0xff]   ;;  %v1166_v19 = vld [vmem:[%s1516_s1 + $0xa0] sm:$0xff]   ;;  %v1170_v26 = vld [vmem:[%s1516_s1 + $0xa8] sm:$0xff]  }
   0x9   :  { %1061 = vmatpush3.bf16.msra.mxu1 %v1154_v7  ;;  %v1171_v27 = vld [vmem:[%s1516_s1 + $0x70] sm:$0xff]   ;;  %v1175_v33 = vld [vmem:[%s1516_s1 + $0x78] sm:$0xff]   ;;  %v15_v37 = vld [vmem:[%s1517_s0] sm:$0xff] }
   0xa   :  { %1062 = vmatprep.subr.bf16.mxu1 %v1157_v10  ;;  %v1172_v30 = vld [vmem:[%s1516_s1 + $0x30] sm:$0xff]   ;;  %v1176_v35 = vld [vmem:[%s1516_s1 + $0x38] sm:$0xff]   ;;  %v186_v38 = vcombine.high %v15_v37, %v15_v37  ;;  %v193_v39 = vrot.slane %v15_v37, %v1336_v34  ;;  %v1180_v41 = vld [vmem:[%s1516_s1 + $0x140] sm:$0xff]  }
   0xb   :  { %1041 = vmatpush3.bf16.msra.mxu0 %v1156_v9  ;;  %v1173_v31 = vld [vmem:[%s1516_s1 + $0xf0] sm:$0xff]   ;;  %v1177_v36 = vld [vmem:[%s1516_s1 + $0xf8] sm:$0xff]   ;;  %v1182_v45 = vld [vmem:[%s1516_s1 + $0x1c0] sm:$0xff]  }
   0xc   :  { %1042 = vmatprep.subr.bf16.mxu0 %v1159_v12  ;;  %v1174_v32 = vld [vmem:[%s1516_s1 + $0xb0] sm:$0xff]   ;;  %v1179_v40 = vld [vmem:[%s1516_s1 + $0xb8] sm:$0xff]   ;;  %v201_v42 = vcombine.high %v193_v39, %v193_v39  ;;  %v209_v43 = vrot.slane %v193_v39, %v1336_v34  ;;  %v1356_v44 = vrot.slane %v186_v38, %v1336_v34  ;;  %v1181_v47 = vld [vmem:[%s1516_s1 + $0x100] sm:$0xff]  }
   0xd   :  { %1063 = vmatpush3.bf16.msra.mxu1 %v1158_v11  ;;  %v1184_v50 = vld [vmem:[%s1516_s1 + $0x148] sm:$0xff]   ;;  %v1183_v52 = vld [vmem:[%s1516_s1 + $0x180] sm:$0xff]   ;;  %v1188_v57 = vld [vmem:[%s1516_s1 + $0x150] sm:$0xff]  }
   0xe   :  { %1064 = vmatprep.subr.bf16.mxu1 %v1161_v14  ;;  %v223_v46 = vrot.slane %v201_v42, %v1336_v34  ;;  %v202_v48 = vcombine.high %v1356_v44, %v1356_v44  ;;  %v231_v49 = vcombine.high %v209_v43, %v209_v43  ;;  %v1186_v54 = vld [vmem:[%s1516_s1 + $0x1c8] sm:$0xff]   ;;  %v1190_v59 = vld [vmem:[%s1516_s1 + $0x1d0] sm:$0xff]   ;;  %v1192_v61 = vld [vmem:[%s1516_s1 + $0x158] sm:$0xff]  }
   0xf   :  { %1043 = vmatpush3.bf16.msra.mxu0 %v1160_v13  ;;  %v1185_v55 = vld [vmem:[%s1516_s1 + $0x108] sm:$0xff]   ;;  %v1189_v60 = vld [vmem:[%s1516_s1 + $0x110] sm:$0xff]   ;;  %v1194_v63 = vld [vmem:[%s1516_s1 + $0x1d8] sm:$0xff]  }
  0x10   :  { %1044 = vmatprep.subr.bf16.mxu0 %v1163_v16  ;;  %779 = vmatprep.mubr.bf16.mxu0 %v223_v46  ;;  %v233_v51 = vcombine.high %v223_v46, %v223_v46  ;;  %v230_v53 = vrot.slane %v202_v48, %v1336_v34  ;;  %v1187_v58 = vld [vmem:[%s1516_s1 + $0x188] sm:$0xff]   ;;  %v1191_v62 = vld [vmem:[%s1516_s1 + $0x190] sm:$0xff]   ;;  %v1193_v0 = vld [vmem:[%s1516_s1 + $0x118] sm:$0xff]  }
  0x11   :  { %1065 = vmatpush3.bf16.msra.mxu1 %v1162_v15  ;;  %v1196_v1 = vld [vmem:[%s1516_s1 + $0x160] sm:$0xff]   ;;  %v1195_v2 = vld [vmem:[%s1516_s1 + $0x198] sm:$0xff]   ;;  %v1200_v5 = vld [vmem:[%s1516_s1 + $0x168] sm:$0xff]  }
  0x12   :  { %1066 = vmatprep.subr.bf16.mxu1 %v1165_v18  ;;  %819 = vmatprep.mubr.bf16.mxu1 %v233_v51  ;;  %v234_v56 = vcombine.high %v230_v53, %v230_v53  ;;  %v1198_v3 = vld [vmem:[%s1516_s1 + $0x1e0] sm:$0xff]   ;;  %v1202_v7 = vld [vmem:[%s1516_s1 + $0x1e8] sm:$0xff]   ;;  %v1204_v9 = vld [vmem:[%s1516_s1 + $0x170] sm:$0xff]  }
  0x13   :  { %1045 = vmatpush3.bf16.msra.mxu0 %v1164_v17  ;;  %v1197_v4 = vld [vmem:[%s1516_s1 + $0x120] sm:$0xff]   ;;  %v1201_v8 = vld [vmem:[%s1516_s1 + $0x128] sm:$0xff]   ;;  %v1206_v11 = vld [vmem:[%s1516_s1 + $0x1f0] sm:$0xff]   ;;  %v216_v17 = vrot.slane %v1356_v44, %v1336_v34 }
  0x14   :  { %1046 = vmatprep.subr.bf16.mxu0 %v1167_v20  ;;  %v1199_v6 = vld [vmem:[%s1516_s1 + $0x1a0] sm:$0xff]   ;;  %v1203_v10 = vld [vmem:[%s1516_s1 + $0x1a8] sm:$0xff]   ;;  %v1205_v12 = vld [vmem:[%s1516_s1 + $0x130] sm:$0xff]  }
  0x15   :  { %1067 = vmatpush3.bf16.msra.mxu1 %v1166_v19  ;;  %v1208_v13 = vld [vmem:[%s1516_s1 + $0x178] sm:$0xff]   ;;  %v1207_v14 = vld [vmem:[%s1516_s1 + $0x1b0] sm:$0xff]   ;;  %v1212_v18 = vld [vmem:[%s1516_s1 + $0x240] sm:$0xff]   ;;  %v232_v21 = vcombine.high %v216_v17, %v216_v17 }
  0x16   :  { %1068 = vmatprep.subr.bf16.mxu1 %v1169_v25  ;;  %v1210_v15 = vld [vmem:[%s1516_s1 + $0x1f8] sm:$0xff]   ;;  %v1213_v20 = vld [vmem:[%s1516_s1 + $0x200] sm:$0xff]   ;;  %v1214_v22 = vld [vmem:[%s1516_s1 + $0x248] sm:$0xff]  }
  0x17   :  { %1047 = vmatpush3.bf16.msra.mxu0 %v1168_v24  ;;  %v1209_v16 = vld [vmem:[%s1516_s1 + $0x138] sm:$0xff]   ;;  %v1215_v23 = vld [vmem:[%s1516_s1 + $0x208] sm:$0xff]   ;;  %v1216_v24 = vld [vmem:[%s1516_s1 + $0x250] sm:$0xff]  }
  0x18   :  { %1048 = vmatprep.subr.bf16.mxu0 %v1171_v27  ;;  %v1211_v19 = vld [vmem:[%s1516_s1 + $0x1b8] sm:$0xff]   ;;  %v1217_v25 = vld [vmem:[%s1516_s1 + $0x210] sm:$0xff]   ;;  %v955_v28 = vld.sshfl [vmem:[%s1517_s0 + $0x8] sm:$0x11 pattern:$0x75316420] }
  0x19   :  { %1069 = vmatpush3.bf16.msra.mxu1 %v1170_v26  ;;  %v1218_v26 = vld [vmem:[%s1516_s1 + $0x258] sm:$0xff]   ;;  %v1220_v29 = vld [vmem:[%s1516_s1 + $0x260] sm:$0xff]   ;;  %v1225_v37 = vld [vmem:[%s1516_s1 + $0x230] sm:$0xff]  }
  0x1a   :  { %1070 = vmatprep.subr.bf16.mxu1 %v1173_v31  ;;  %v1219_v27 = vld [vmem:[%s1516_s1 + $0x218] sm:$0xff]   ;;  %v954_v42 = vld [vmem:[%s1518_s2] ss:$0 sm:$0xff] }
  0x1b   :  { %1049 = vmatpush3.bf16.msra.mxu0 %v1172_v30  ;;  %v242_v30 = vcombine.high %v955_v28, %v955_v28  ;;  %v1226_v38 = vld [vmem:[%s1516_s1 + $0x278] sm:$0xff]  }
  0x1c   :  { %1050 = vmatprep.subr.bf16.mxu0 %v1175_v33  ;;  %v1222_v33 = vld [vmem:[%s1516_s1 + $0x268] sm:$0xff]   ;;  %v1227_v39 = vld [vmem:[%s1516_s1 + $0x238] sm:$0xff]  }
  0x1d   :  { %1071 = vmatpush3.bf16.msra.mxu1 %v1174_v32  ;;  %v256_v31 = vrot.slane %v242_v30, %v1336_v34  ;;  %v1221_v32 = vld [vmem:[%s1516_s1 + $0x220] sm:$0xff]  }
  0x1e   :  { %1072 = vmatprep.subr.bf16.mxu1 %v1177_v36  ;;  %v1224_v36 = vld [vmem:[%s1516_s1 + $0x270] sm:$0xff]  }
  0x1f   :  { %1051 = vmatpush3.bf16.msra.mxu0 %v1176_v35  ;;  %v1223_v35 = vld [vmem:[%s1516_s1 + $0x228] sm:$0xff]  }
  0x20   :  { %1080 = vmatprep.subr.bf16.mxu0 %v1180_v41 }
  0x21   :  { %1073 = vmatpush3.bf16.msra.mxu1 %v1179_v40  ;;  %v249_v40 = vrot.slane %v955_v28, %v1336_v34 }
  0x22   :  { %1102 = vmatprep.subr.bf16.mxu1 %v1182_v45  ;;  %780 = vmatmul.mubr.bf16.vlgmr.msra.gmra.mrb[0].mxu0 %v209_v43 }
  0x23   :  { %1081 = vmatpush3.bf16.msra.mxu0 %v1181_v47  ;;  %859 = vmatprep.mubr.bf16.mxu0 %v230_v53 }
  0x24   :  { %820 = vmatmul.mubr.bf16.vlgmr.msra.gmra.mrb[0].mxu1 %v231_v49  ;;  %1082 = vmatprep.subr.bf16.mxu0 %v1184_v50 }
  0x25   :  { %1103 = vmatpush3.bf16.msra.mxu1 %v1183_v52  ;;  %899 = vmatprep.mubr.bf16.mxu1 %v234_v56 }
  0x26   :  { %1104 = vmatprep.subr.bf16.mxu1 %v1186_v54 }
  0x27   :  { %1083 = vmatpush3.bf16.msra.mxu0 %v1185_v55 }
  0x28   :  { %1084 = vmatprep.subr.bf16.mxu0 %v1188_v57 }
  0x29   :  { %1105 = vmatpush3.bf16.msra.mxu1 %v1187_v58 }
  0x2a   :  { %1106 = vmatprep.subr.bf16.mxu1 %v1190_v59 }
  0x2b   :  { %1085 = vmatpush3.bf16.msra.mxu0 %v1189_v60 }
  0x2c   :  { %1086 = vmatprep.subr.bf16.mxu0 %v1192_v61 }
  0x2d   :  { %1107 = vmatpush3.bf16.msra.mxu1 %v1191_v62 }
  0x2e   :  { %1108 = vmatprep.subr.bf16.mxu1 %v1194_v63 }
  0x2f   :  { %1087 = vmatpush3.bf16.msra.mxu0 %v1193_v0 }
  0x30   :  { %1088 = vmatprep.subr.bf16.mxu0 %v1196_v1 }
  0x31   :  { %1109 = vmatpush3.bf16.msra.mxu1 %v1195_v2 }
  0x32   :  { %1110 = vmatprep.subr.bf16.mxu1 %v1198_v3 }
  0x33   :  { %1089 = vmatpush3.bf16.msra.mxu0 %v1197_v4 }
  0x34   :  { %1090 = vmatprep.subr.bf16.mxu0 %v1200_v5 }
  0x35   :  { %1111 = vmatpush3.bf16.msra.mxu1 %v1199_v6 }
  0x36   :  { %1112 = vmatprep.subr.bf16.mxu1 %v1202_v7 }
  0x37   :  { %1091 = vmatpush3.bf16.msra.mxu0 %v1201_v8 }
  0x38   :  { %1092 = vmatprep.subr.bf16.mxu0 %v1204_v9 }
  0x39   :  { %1113 = vmatpush3.bf16.msra.mxu1 %v1203_v10 }
  0x3a   :  { %1114 = vmatprep.subr.bf16.mxu1 %v1206_v11 }
  0x3b   :  { %1093 = vmatpush3.bf16.msra.mxu0 %v1205_v12 }
  0x3c   :  { %1094 = vmatprep.subr.bf16.mxu0 %v1208_v13 }
  0x3d   :  { %1115 = vmatpush3.bf16.msra.mxu1 %v1207_v14 }
  0x3e   :  { %1116 = vmatprep.subr.bf16.mxu1 %v1210_v15 }
  0x3f   :  { %1095 = vmatpush3.bf16.msra.mxu0 %v1209_v16 }
  0x40   :  { %1124 = vmatprep.subr.bf16.mxu0 %v1212_v18 }
  0x41   :  { %1117 = vmatpush3.bf16.msra.mxu1 %v1211_v19 }
  0x42   :  { %860 = vmatmul.mubr.bf16.vlgmr.msra.gmra.mrb[4].mxu0 %v216_v17 }
  0x43   :  { %1125 = vmatpush3.bf16.msra.mxu0 %v1213_v20  ;;  %939 = vmatprep.mubr.bf16.mxu0 %v256_v31 }
  0x44   :  { %900 = vmatmul.mubr.bf16.vlgmr.msra.gmra.mrb[4].mxu1 %v232_v21  ;;  %1126 = vmatprep.subr.bf16.mxu0 %v1214_v22 }
  0x47   :  { %1127 = vmatpush3.bf16.msra.mxu0 %v1215_v23 }
  0x48   :  { %1128 = vmatprep.subr.bf16.mxu0 %v1216_v24 }
  0x4b   :  { %1129 = vmatpush3.bf16.msra.mxu0 %v1217_v25 }
  0x4c   :  { %1130 = vmatprep.subr.bf16.mxu0 %v1218_v26 }
  0x4f   :  { %1131 = vmatpush3.bf16.msra.mxu0 %v1219_v27 }
  0x50   :  { %1132 = vmatprep.subr.bf16.mxu0 %v1220_v29 }
  0x53   :  { %1133 = vmatpush3.bf16.msra.mxu0 %v1221_v32 }
  0x54   :  { %1134 = vmatprep.subr.bf16.mxu0 %v1222_v33 }
  0x57   :  { %1135 = vmatpush3.bf16.msra.mxu0 %v1223_v35 }
  0x58   :  { %1136 = vmatprep.subr.bf16.mxu0 %v1224_v36 }
  0x5b   :  { %1137 = vmatpush3.bf16.msra.mxu0 %v1225_v37 }
  0x5c   :  { %1138 = vmatprep.subr.bf16.mxu0 %v1226_v38 }
  0x5f   :  { %1139 = vmatpush3.bf16.msra.mxu0 %v1227_v39 }
  0x62   :  { %940 = vmatmul.mubr.bf16.vlgmr.msra.gmra.mrb[8].mxu0 %v249_v40 }
  0xf5   :  { %v1052_v41 = vpop.f32.mrb[0].mxu0 }
  0xf6   :  { %v1053_v43 = vpop.f32.mrb[1].mxu0 }
  0xf7   :  { %v1054_v44 = vadd.f32 %v1053_v43, %v1052_v41  ;;  %v1055_v45 = vpop.f32.mrb[2].mxu0  ;;  %v1074_v46 = vpop.f32.mrb[0].mxu1 }
  0xf8   :  { %v1056_v47 = vpop.f32.mrb[3].mxu0  ;;  %v1075_v48 = vpop.f32.mrb[1].mxu1 }
  0xf9   :  { %v782_v49 = vadd.f32 %v1054_v44, %v954_v42  ;;  %v1076_v50 = vadd.f32 %v1075_v48, %v1074_v46  ;;  %v1077_v51 = vpop.f32.mrb[2].mxu1 }
  0xfa   :  { %v1078_v52 = vpop.f32.mrb[3].mxu1 }
  0xfb   :  { %v822_v53 = vadd.f32 %v1076_v50, %v782_v49 }
 0x115   :  { %v1096_v54 = vpop.f32.mrb[4].mxu0 }
 0x116   :  { %v1097_v34 = vpop.f32.mrb[5].mxu0 }
 0x117   :  { %v1098_v55 = vadd.f32 %v1097_v34, %v1096_v54  ;;  %v1099_v56 = vpop.f32.mrb[6].mxu0  ;;  %v1118_v57 = vpop.f32.mrb[4].mxu1 }
 0x118   :  { %v1100_v58 = vpop.f32.mrb[7].mxu0  ;;  %v1119_v59 = vpop.f32.mrb[5].mxu1 }
 0x119   :  { %v862_v60 = vadd.f32 %v1098_v55, %v822_v53  ;;  %v1120_v61 = vadd.f32 %v1119_v59, %v1118_v57  ;;  %v1121_v62 = vpop.f32.mrb[6].mxu1 }
 0x11a   :  { %v1122_v63 = vpop.f32.mrb[7].mxu1 }
 0x11b   :  { %v902_v0 = vadd.f32 %v1120_v61, %v862_v60 }
 0x135   :  { %v1140_v1 = vpop.f32.mrb[8].mxu0 }
 0x136   :  { %v1141_v2 = vpop.f32.mrb[9].mxu0 }
 0x137   :  { %v1142_v3 = vadd.f32 %v1141_v2, %v1140_v1  ;;  %v1143_v4 = vpop.f32.mrb[10].mxu0 }
 0x138   :  { %v1144_v5 = vpop.f32.mrb[11].mxu0 }
 0x139   :  { %v942_v6 = vadd.f32 %v1142_v3, %v902_v0 }
 0x13b   :  { %v947_v7 = vmax.f32 %v942_v6, 0.0 }
 0x13d   :  { %v948_v8 = vpack.c.bf16 %v947_v7, %v947_v7 }
 0x13f   :  { %949 = vst [vmem:[%s1519_s3] sm:$0x1] %v948_v8 }

</bundles_post_ra>
